<compile_context>
chip_gen: v7x
topology: tpu7x:2x2x1
jax: 0.10.0
libtpu: 0.0.40
codegen_flags: <defaults>
</compile_context>

<pallas_src>
import functools

import jax
import jax.numpy as jnp
from jax import lax
from jax.experimental import pallas as pl
from jax.experimental.pallas import tpu as pltpu

EPS = 1e-5

# Polyphase taps of ConvTranspose2d(k=4, s=2, p=1): output pixel (2i+r, 2j+t) =
# sum over taps of w[kh, kw] * x[i+dh, j+dw] (zero outside the image).
# Entries are (kh, kw, dh, dw); phase index p = 2*r + t.
_PHASE_TAPS = (
    ((1, 1, 0, 0), (1, 3, 0, -1), (3, 1, -1, 0), (3, 3, -1, -1)),   # (r=0, t=0)
    ((1, 0, 0, 1), (1, 2, 0, 0), (3, 0, -1, 1), (3, 2, -1, 0)),     # (r=0, t=1)
    ((0, 1, 1, 0), (0, 3, 1, -1), (2, 1, 0, 0), (2, 3, 0, -1)),     # (r=1, t=0)
    ((0, 0, 1, 1), (0, 2, 1, 0), (2, 0, 0, 1), (2, 2, 0, 0)),       # (r=1, t=1)
)


def _make_shifter(xf, H, W):
    """Returns shift(dh, dw): x shifted by (dh, dw) with zero boundaries.

    xf is (C, H*W) with the flattened spatial axis on lanes; a shift is one
    lane-shift (slice + zero fill) plus an iota mask.  Shifted planes are cached
    per (dh, dw) and reused across the 4 phases.
    """
    C, HW = xf.shape
    pos = lax.broadcasted_iota(jnp.int32, (1, HW), 1)
    col = pos % W
    row_ok = {1: pos < (H - 1) * W, -1: pos >= W}
    col_ok = {1: col < (W - 1), -1: col >= 1}
    cache = {}

    def shift(dh, dw):
        key = (dh, dw)
        if key in cache:
            return cache[key]
        off = dh * W + dw
        if off > 0:
            sh = jnp.concatenate([xf[:, off:], jnp.zeros((C, off), xf.dtype)], axis=1)
        elif off < 0:
            sh = jnp.concatenate([jnp.zeros((C, -off), xf.dtype), xf[:, :off]], axis=1)
        else:
            sh = xf
        ok = None
        if dh != 0:
            ok = row_ok[dh]
        if dw != 0:
            ok = col_ok[dw] if ok is None else (ok & col_ok[dw])
        res = sh if ok is None else jnp.where(ok, sh, jnp.zeros_like(sh))
        cache[key] = res
        return res

    return shift


def _dw_phase(shift, wdw, taps):
    """One polyphase plane of the depthwise transposed conv: (Cin, H*W)."""
    y = None
    for kh, kw, dh, dw in taps:
        idx = kh * 4 + kw
        term = wdw[:, idx:idx + 1] * shift(dh, dw)        # (Cin,1)*(Cin,HW) lane-broadcast
        y = term if y is None else y + term
    return y


def _pw_conv(ya, wpwT):
    """1x1 conv as Cin broadcast-FMAs on the VPU: (Cout, H*W)."""
    cin = ya.shape[0]
    z = None
    for ci in range(cin):
        term = wpwT[:, ci:ci + 1] * ya[ci:ci + 1, :]      # (Cout,1)*(1,HW)
        z = term if z is None else z + term
    return z


def _bn_relu6(v, scale, shift):
    # BN folded to a single FMA (scale = g*rstd, shift = b - mean*scale) + ReLU6.
    return jnp.clip(v * scale + shift, 0.0, 6.0)


# ------------------------------ kernels --------------------------------------

def _bn1_stats_kernel(x_ref, wdw_ref, s_ref, *, H, W):
    @pl.when(pl.program_id(0) == 0)
    def _init():
        s_ref[...] = jnp.zeros_like(s_ref)

    xf = x_ref[0].astype(jnp.float32)                     # (Cin, H*W)
    wdw = wdw_ref[...].astype(jnp.float32)                # (Cin, 16)
    shift = _make_shifter(xf, H, W)
    cin = xf.shape[0]
    ssum = jnp.zeros((cin, 1), jnp.float32)
    ssq = jnp.zeros((cin, 1), jnp.float32)
    for taps in _PHASE_TAPS:                              # one phase at a time
        y = _dw_phase(shift, wdw, taps)
        ssum = ssum + jnp.sum(y, axis=1, keepdims=True)
        ssq = ssq + jnp.sum(y * y, axis=1, keepdims=True)
    s_ref[...] = s_ref[...] + jnp.concatenate([ssum, ssq], axis=1)


def _bn2_stats_kernel(x_ref, wdw_ref, sc1_ref, sh1_ref, wpwT_ref, s_ref, *, H, W):
    @pl.when(pl.program_id(0) == 0)
    def _init():
        s_ref[...] = jnp.zeros_like(s_ref)

    xf = x_ref[0].astype(jnp.float32)
    wdw = wdw_ref[...].astype(jnp.float32)
    sc1, sh1 = sc1_ref[...], sh1_ref[...]                 # (Cin, 1)
    wpwT = wpwT_ref[...].astype(jnp.float32)              # (Cout, Cin)
    shift = _make_shifter(xf, H, W)
    cout = wpwT.shape[0]
    zsum = jnp.zeros((cout, 1), jnp.float32)
    zsq = jnp.zeros((cout, 1), jnp.float32)
    for taps in _PHASE_TAPS:
        y = _dw_phase(shift, wdw, taps)
        ya = _bn_relu6(y, sc1, sh1)
        z = _pw_conv(ya, wpwT)
        zsum = zsum + jnp.sum(z, axis=1, keepdims=True)
        zsq = zsq + jnp.sum(z * z, axis=1, keepdims=True)
    s_ref[...] = s_ref[...] + jnp.concatenate([zsum, zsq], axis=1)


def _final_kernel(x_ref, wdw_ref, sc1_ref, sh1_ref, wpwT_ref, sc2_ref, sh2_ref,
                  out_ref, *, H, W):
    xf = x_ref[0].astype(jnp.float32)
    wdw = wdw_ref[...].astype(jnp.float32)
    sc1, sh1 = sc1_ref[...], sh1_ref[...]
    wpwT = wpwT_ref[...].astype(jnp.float32)
    sc2, sh2 = sc2_ref[...], sh2_ref[...]
    shift = _make_shifter(xf, H, W)
    for p, taps in enumerate(_PHASE_TAPS):
        y = _dw_phase(shift, wdw, taps)
        ya = _bn_relu6(y, sc1, sh1)
        z = _pw_conv(ya, wpwT)
        out_ref[0, p] = _bn_relu6(z, sc2, sh2).astype(out_ref.dtype)   # lane-dense store


# ------------------------------ wrapper ---------------------------------------

@jax.jit
def deconv_block(x_nchw, w_dw, g1, b1, w_pw, g2, b2):
    """x_nchw: (N, Cin, H, W); w_dw: (Cin, 1, 4, 4); w_pw: (Cout, Cin, 1, 1)."""
    N, Cin, H, W = x_nchw.shape
    Cout = w_pw.shape[0]
    HW = H * W
    f32 = jnp.float32

    # Minor-dim reshapes only -- no pad / layout transpose passes over HBM.
    xf = x_nchw.reshape(N, Cin, HW).astype(f32)
    wdw = w_dw.reshape(Cin, 16).astype(f32)               # row = channel, col = kh*4+kw
    wpwT = w_pw.reshape(Cout, Cin).astype(f32)

    x_spec = pl.BlockSpec((1, Cin, HW), lambda n: (n, 0, 0))

    def rep(shape):
        return pl.BlockSpec(shape, lambda n: (0,) * len(shape))

    # NOTE: per-step working set is tiny; default scoped VMEM limit leaves
    # headroom for double-buffering on v7x's 64 MiB VMEM (no override needed).
    seq = pltpu.CompilerParams(dimension_semantics=("arbitrary",))
    par = pltpu.CompilerParams(dimension_semantics=("parallel",))

    # Pass 1: BN1 batch stats (per-channel sum / sumsq of the deconv output),
    # accumulated across the batch grid into a resident (Cin, 2) block.
    s1 = pl.pallas_call(
        functools.partial(_bn1_stats_kernel, H=H, W=W),
        out_shape=jax.ShapeDtypeStruct((Cin, 2), f32),
        grid_spec=pl.GridSpec(
            grid=(N,),
            in_specs=[x_spec, rep((Cin, 16))],
            out_specs=rep((Cin, 2))),
        compiler_params=seq,
    )(xf, wdw)

    cnt = float(4 * HW * N)                               # elements per channel (N x 2H x 2W)
    m1 = s1[:, 0] / cnt
    v1 = jnp.maximum(s1[:, 1] / cnt - m1 * m1, 0.0)       # one-pass biased variance
    r1 = lax.rsqrt(v1 + EPS)
    sc1 = (g1.astype(f32) * r1).reshape(Cin, 1)
    sh1 = (b1.astype(f32) - m1 * g1.astype(f32) * r1).reshape(Cin, 1)

    # Pass 2: BN2 batch stats (recomputes the cheap deconv; BN1+ReLU6+1x1 fused).
    s2 = pl.pallas_call(
        functools.partial(_bn2_stats_kernel, H=H, W=W),
        out_shape=jax.ShapeDtypeStruct((Cout, 2), f32),
        grid_spec=pl.GridSpec(
            grid=(N,),
            in_specs=[x_spec, rep((Cin, 16)), rep((Cin, 1)), rep((Cin, 1)),
                      rep((Cout, Cin))],
            out_specs=rep((Cout, 2))),
        compiler_params=seq,
    )(xf, wdw, sc1, sh1, wpwT)

    m2 = s2[:, 0] / cnt
    v2 = jnp.maximum(s2[:, 1] / cnt - m2 * m2, 0.0)
    r2 = lax.rsqrt(v2 + EPS)
    sc2 = (g2.astype(f32) * r2).reshape(Cout, 1)
    sh2 = (b2.astype(f32) - m2 * g2.astype(f32) * r2).reshape(Cout, 1)

    # Pass 3: full fused forward; phase-major, lane-dense output (N, 4, Cout, HW).
    out_ph = pl.pallas_call(
        functools.partial(_final_kernel, H=H, W=W),
        out_shape=jax.ShapeDtypeStruct((N, 4, Cout, HW), f32),
        grid_spec=pl.GridSpec(
            grid=(N,),
            in_specs=[x_spec, rep((Cin, 16)), rep((Cin, 1)), rep((Cin, 1)),
                      rep((Cout, Cin)), rep((Cout, 1)), rep((Cout, 1))],
            out_specs=pl.BlockSpec((1, 4, Cout, HW), lambda n: (n, 0, 0, 0))),
        compiler_params=par,
    )(xf, wdw, sc1, sh1, wpwT, sc2, sh2)

    # TODO(synk): the polyphase de-interleave below is still one XLA transpose of
    # the output; folding it into the kernel would need lane-strided stores.
    y = out_ph.reshape(N, 2, 2, Cout, H, W)               # (n, r, t, cout, i, j)
    y = jnp.transpose(y, (0, 3, 4, 1, 5, 2))              # (n, cout, i, r, j, t)
    return y.reshape(N, Cout, 2 * H, 2 * W)


# ------------------------------ reference -------------------------------------

def deconv_block_ref(x, w_dw, g1, b1, w_pw, g2, b2):
    """Pure-JAX reference (NCHW, same math as the PyTorch module in train mode)."""
    N, C, H, W = x.shape
    y = lax.conv_general_dilated(
        x, jnp.flip(w_dw, axis=(2, 3)),
        window_strides=(1, 1), padding=((2, 2), (2, 2)),
        lhs_dilation=(2, 2), rhs_dilation=(1, 1),
        dimension_numbers=("NCHW", "OIHW", "NCHW"),
        feature_group_count=C, precision=lax.Precision.HIGHEST)

    def bn_relu6(t, g, b):
        m = jnp.mean(t, axis=(0, 2, 3), keepdims=True)
        v = jnp.mean((t - m) ** 2, axis=(0, 2, 3), keepdims=True)
        t = (t - m) * lax.rsqrt(v + EPS) * g.reshape(1, -1, 1, 1) + b.reshape(1, -1, 1, 1)
        return jnp.clip(t, 0.0, 6.0)

    y = bn_relu6(y, g1, b1)
    z = lax.conv_general_dilated(
        y, w_pw, window_strides=(1, 1), padding=((0, 0), (0, 0)),
        dimension_numbers=("NCHW", "OIHW", "NCHW"),
        precision=lax.Precision.HIGHEST)
    return bn_relu6(z, g2, b2)


if __name__ == "__main__":
    key = jax.random.PRNGKey(0)
    kx, kdw, kpw, kg1, kb1, kg2, kb2 = jax.random.split(key, 7)
    N, Cin, Cout, H, W = 2, 4, 8, 16, 16

    x = jax.random.normal(kx, (N, Cin, H, W), dtype=jnp.float32)
    # Deterministic synthetic parameters (shapes from the module's __init__).
    w_dw = 0.5 * jax.random.normal(kdw, (Cin, 1, 4, 4), dtype=jnp.float32)
    w_pw = 0.5 * jax.random.normal(kpw, (Cout, Cin, 1, 1), dtype=jnp.float32)
    g1 = 1.0 + 0.1 * jax.random.normal(kg1, (Cin,), dtype=jnp.float32)
    b1 = 0.1 * jax.random.normal(kb1, (Cin,), dtype=jnp.float32)
    g2 = 1.0 + 0.1 * jax.random.normal(kg2, (Cout,), dtype=jnp.float32)
    b2 = 0.1 * jax.random.normal(kb2, (Cout,), dtype=jnp.float32)
    # TODO(synk): BatchNorm running-stat updates (a training-mode side effect) are
    # not materialized; they do not affect the forward output.

    out = jax.block_until_ready(deconv_block(x, w_dw, g1, b1, w_pw, g2, b2))
    ref = jax.block_until_ready(deconv_block_ref(x, w_dw, g1, b1, w_pw, g2, b2))

    assert out.shape == (N, Cout, 2 * H, 2 * W), out.shape
    err = float(jnp.max(jnp.abs(out - ref)))
    assert jnp.allclose(out, ref, atol=1e-4, rtol=1e-4), err
    print("KERNEL_OK")
</pallas_src>

<mosaic_0001>
module attributes {stable_mosaic.version = 11 : i64} {
  func.func @_bn1_stats_kernel(%arg0: i32, %arg1: memref<1x4x256xf32, #tpu.memory_space<vmem>>, %arg2: memref<4x16xf32, #tpu.memory_space<vmem>>, %arg3: memref<4x2xf32, #tpu.memory_space<vmem>>) attributes {dimension_semantics = [#tpu.dimension_semantics<arbitrary>], iteration_bounds = array<i64: 2>, scalar_prefetch = 0 : i64, scratch_operands = 0 : i64, tpu.core_type = #tpu.core_type<tc>, window_params = [{transform_indices = @transform_0, window_bounds = array<i64: 1, 4, 256>}, {pipeline_mode = #tpu.pipeline_mode<synchronous>, transform_indices = @transform_1, window_bounds = array<i64: 4, 16>}, {pipeline_mode = #tpu.pipeline_mode<synchronous>, transform_indices = @transform_2, window_bounds = array<i64: 4, 2>}]} {
    %c0_i32 = arith.constant 0 : i32
    %0 = arith.cmpi eq, %arg0, %c0_i32 : i32
    %1 = arith.extui %0 : i1 to i32
    %c0_i32_0 = arith.constant 0 : i32
    %2 = arith.cmpi ne, %1, %c0_i32_0 : i32
    scf.if %2 {
      %cst_40 = arith.constant 0.000000e+00 : f32
      %185 = vector.broadcast %cst_40 : f32 to vector<4x2xf32>
      %c0_41 = arith.constant 0 : index
      %c0_42 = arith.constant 0 : index
      %186 = vector.load %arg3[%c0_41, %c0_42] : memref<4x2xf32, #tpu.memory_space<vmem>>, vector<4x2xf32>
      tpu.vector_store %arg3[%c0_41, %c0_42], %185 {strides = array<i32>} : memref<4x2xf32, #tpu.memory_space<vmem>>, vector<4x2xf32>,
    } else {
    }
    %c0 = arith.constant 0 : index
    %c0_1 = arith.constant 0 : index
    %c0_2 = arith.constant 0 : index
    %3 = vector.load %arg1[%c0, %c0_1, %c0_2] : memref<1x4x256xf32, #tpu.memory_space<vmem>>, vector<1x4x256xf32>
    %4 = vector.shape_cast %3 : vector<1x4x256xf32> to vector<4x256xf32>
    %c0_3 = arith.constant 0 : index
    %c0_4 = arith.constant 0 : index
    %5 = vector.load %arg2[%c0_3, %c0_4] : memref<4x16xf32, #tpu.memory_space<vmem>>, vector<4x16xf32>
    %6 = tpu.iota {dimensions = array<i32: 1>} : vector<1x256xi32>
    %c16_i32 = arith.constant 16 : i32
    %c0_i32_5 = arith.constant 0 : i32
    %7 = arith.cmpi eq, %c16_i32, %c0_i32_5 : i32
    %c1_i32 = arith.constant 1 : i32
    %8 = arith.select %7, %c1_i32, %c16_i32 : i32
    %9 = vector.broadcast %8 : i32 to vector<1x256xi32>
    %10 = arith.remsi %6, %9 : vector<1x256xi32>
    %c0_i32_6 = arith.constant 0 : i32
    %11 = vector.broadcast %c0_i32_6 : i32 to vector<1x256xi32>
    %12 = arith.cmpi ne, %10, %11 : vector<1x256xi32>
    %c0_i32_7 = arith.constant 0 : i32
    %13 = vector.broadcast %c0_i32_7 : i32 to vector<1x256xi32>
    %14 = arith.cmpi slt, %10, %13 : vector<1x256xi32>
    %c0_i32_8 = arith.constant 0 : i32
    %15 = arith.cmpi slt, %8, %c0_i32_8 : i32
    %16 = vector.broadcast %15 : i1 to vector<1x256xi1>
    %17 = vector.broadcast %16 : vector<1x256xi1> to vector<1x256xi1>
    %18 = arith.xori %14, %17 : vector<1x256xi1>
    %19 = arith.andi %18, %12 : vector<1x256xi1>
    %20 = vector.broadcast %8 : i32 to vector<1x256xi32>
    %21 = arith.addi %10, %20 : vector<1x256xi32>
    %22 = arith.select %19, %21, %10 : vector<1x256xi1>, vector<1x256xi32>
    %c240_i32 = arith.constant 240 : i32
    %23 = vector.broadcast %c240_i32 : i32 to vector<1x256xi32>
    %24 = arith.cmpi slt, %6, %23 : vector<1x256xi32>
    %c16_i32_9 = arith.constant 16 : i32
    %25 = vector.broadcast %c16_i32_9 : i32 to vector<1x256xi32>
    %26 = arith.cmpi sge, %6, %25 : vector<1x256xi32>
    %c15_i32 = arith.constant 15 : i32
    %27 = vector.broadcast %c15_i32 : i32 to vector<1x256xi32>
    %28 = arith.cmpi slt, %22, %27 : vector<1x256xi32>
    %c1_i32_10 = arith.constant 1 : i32
    %29 = vector.broadcast %c1_i32_10 : i32 to vector<1x256xi32>
    %30 = arith.cmpi sge, %22, %29 : vector<1x256xi32>
    %cst = arith.constant 0.000000e+00 : f32
    %31 = vector.broadcast %cst : f32 to vector<4x1xf32>
    %cst_11 = arith.constant 0.000000e+00 : f32
    %32 = vector.broadcast %cst_11 : f32 to vector<4x1xf32>
    %33 = vector.extract_strided_slice %5 {offsets = [0, 5], sizes = [4, 1], strides = [1, 1]} : vector<4x16xf32> to vector<4x1xf32>
    %34 = vector.broadcast %33 : vector<4x1xf32> to vector<4x256xf32>
    %35 = arith.mulf %34, %4 : vector<4x256xf32>
    %36 = vector.extract_strided_slice %5 {offsets = [0, 7], sizes = [4, 1], strides = [1, 1]} : vector<4x16xf32> to vector<4x1xf32>
    %cst_12 = arith.constant 0.000000e+00 : f32
    %37 = vector.broadcast %cst_12 : f32 to vector<4x1xf32>
    %38 = vector.extract_strided_slice %4 {offsets = [0, 0], sizes = [4, 255], strides = [1, 1]} : vector<4x256xf32> to vector<4x255xf32>
    %39 = tpu.concatenate %37, %38 in 1 : vector<4x1xf32>, vector<4x255xf32> -> vector<4x256xf32>
    %cst_13 = arith.constant 0.000000e+00 : f32
    %40 = vector.broadcast %cst_13 : f32 to vector<4x256xf32>
    %41 = vector.shape_cast %30 : vector<1x256xi1> to vector<1x256xi1>
    %42 = vector.broadcast %41 : vector<1x256xi1> to vector<4x256xi1>
    %43 = arith.select %42, %39, %40 : vector<4x256xi1>, vector<4x256xf32>
    %44 = vector.broadcast %36 : vector<4x1xf32> to vector<4x256xf32>
    %45 = arith.mulf %44, %43 : vector<4x256xf32>
    %46 = arith.addf %35, %45 : vector<4x256xf32>
    %47 = vector.extract_strided_slice %5 {offsets = [0, 13], sizes = [4, 1], strides = [1, 1]} : vector<4x16xf32> to vector<4x1xf32>
    %cst_14 = arith.constant 0.000000e+00 : f32
    %48 = vector.broadcast %cst_14 : f32 to vector<4x16xf32>
    %49 = vector.extract_strided_slice %4 {offsets = [0, 0], sizes = [4, 240], strides = [1, 1]} : vector<4x256xf32> to vector<4x240xf32>
    %50 = tpu.concatenate %48, %49 in 1 : vector<4x16xf32>, vector<4x240xf32> -> vector<4x256xf32>
    %cst_15 = arith.constant 0.000000e+00 : f32
    %51 = vector.broadcast %cst_15 : f32 to vector<4x256xf32>
    %52 = vector.shape_cast %26 : vector<1x256xi1> to vector<1x256xi1>
    %53 = vector.broadcast %52 : vector<1x256xi1> to vector<4x256xi1>
    %54 = arith.select %53, %50, %51 : vector<4x256xi1>, vector<4x256xf32>
    %55 = vector.broadcast %47 : vector<4x1xf32> to vector<4x256xf32>
    %56 = arith.mulf %55, %54 : vector<4x256xf32>
    %57 = arith.addf %46, %56 : vector<4x256xf32>
    %58 = vector.extract_strided_slice %5 {offsets = [0, 15], sizes = [4, 1], strides = [1, 1]} : vector<4x16xf32> to vector<4x1xf32>
    %cst_16 = arith.constant 0.000000e+00 : f32
    %59 = vector.broadcast %cst_16 : f32 to vector<4x17xf32>
    %60 = vector.extract_strided_slice %4 {offsets = [0, 0], sizes = [4, 239], strides = [1, 1]} : vector<4x256xf32> to vector<4x239xf32>
    %61 = tpu.concatenate %59, %60 in 1 : vector<4x17xf32>, vector<4x239xf32> -> vector<4x256xf32>
    %62 = arith.andi %26, %30 : vector<1x256xi1>
    %cst_17 = arith.constant 0.000000e+00 : f32
    %63 = vector.broadcast %cst_17 : f32 to vector<4x256xf32>
    %64 = vector.shape_cast %62 : vector<1x256xi1> to vector<1x256xi1>
    %65 = vector.broadcast %64 : vector<1x256xi1> to vector<4x256xi1>
    %66 = arith.select %65, %61, %63 : vector<4x256xi1>, vector<4x256xf32>
    %67 = vector.broadcast %58 : vector<4x1xf32> to vector<4x256xf32>
    %68 = arith.mulf %67, %66 : vector<4x256xf32>
    %69 = arith.addf %57, %68 : vector<4x256xf32>
    %cst_18 = arith.constant dense<0.000000e+00> : vector<4xf32>
    %70 = vector.multi_reduction <add>, %69, %cst_18 [1] : vector<4x256xf32> to vector<4xf32>
    %71 = vector.shape_cast %70 : vector<4xf32> to vector<4x1xf32>
    %72 = arith.addf %31, %71 : vector<4x1xf32>
    %73 = arith.mulf %69, %69 : vector<4x256xf32>
    %cst_19 = arith.constant dense<0.000000e+00> : vector<4xf32>
    %74 = vector.multi_reduction <add>, %73, %cst_19 [1] : vector<4x256xf32> to vector<4xf32>
    %75 = vector.shape_cast %74 : vector<4xf32> to vector<4x1xf32>
    %76 = arith.addf %32, %75 : vector<4x1xf32>
    %77 = vector.extract_strided_slice %5 {offsets = [0, 4], sizes = [4, 1], strides = [1, 1]} : vector<4x16xf32> to vector<4x1xf32>
    %78 = vector.extract_strided_slice %4 {offsets = [0, 1], sizes = [4, 255], strides = [1, 1]} : vector<4x256xf32> to vector<4x255xf32>
    %cst_20 = arith.constant 0.000000e+00 : f32
    %79 = vector.broadcast %cst_20 : f32 to vector<4x1xf32>
    %80 = tpu.concatenate %78, %79 in 1 : vector<4x255xf32>, vector<4x1xf32> -> vector<4x256xf32>
    %cst_21 = arith.constant 0.000000e+00 : f32
    %81 = vector.broadcast %cst_21 : f32 to vector<4x256xf32>
    %82 = vector.shape_cast %28 : vector<1x256xi1> to vector<1x256xi1>
    %83 = vector.broadcast %82 : vector<1x256xi1> to vector<4x256xi1>
    %84 = arith.select %83, %80, %81 : vector<4x256xi1>, vector<4x256xf32>
    %85 = vector.broadcast %77 : vector<4x1xf32> to vector<4x256xf32>
    %86 = arith.mulf %85, %84 : vector<4x256xf32>
    %87 = vector.extract_strided_slice %5 {offsets = [0, 6], sizes = [4, 1], strides = [1, 1]} : vector<4x16xf32> to vector<4x1xf32>
    %88 = vector.broadcast %87 : vector<4x1xf32> to vector<4x256xf32>
    %89 = arith.mulf %88, %4 : vector<4x256xf32>
    %90 = arith.addf %86, %89 : vector<4x256xf32>
    %91 = vector.extract_strided_slice %5 {offsets = [0, 12], sizes = [4, 1], strides = [1, 1]} : vector<4x16xf32> to vector<4x1xf32>
    %cst_22 = arith.constant 0.000000e+00 : f32
    %92 = vector.broadcast %cst_22 : f32 to vector<4x15xf32>
    %93 = vector.extract_strided_slice %4 {offsets = [0, 0], sizes = [4, 241], strides = [1, 1]} : vector<4x256xf32> to vector<4x241xf32>
    %94 = tpu.concatenate %92, %93 in 1 : vector<4x15xf32>, vector<4x241xf32> -> vector<4x256xf32>
    %95 = arith.andi %26, %28 : vector<1x256xi1>
    %cst_23 = arith.constant 0.000000e+00 : f32
    %96 = vector.broadcast %cst_23 : f32 to vector<4x256xf32>
    %97 = vector.shape_cast %95 : vector<1x256xi1> to vector<1x256xi1>
    %98 = vector.broadcast %97 : vector<1x256xi1> to vector<4x256xi1>
    %99 = arith.select %98, %94, %96 : vector<4x256xi1>, vector<4x256xf32>
    %100 = vector.broadcast %91 : vector<4x1xf32> to vector<4x256xf32>
    %101 = arith.mulf %100, %99 : vector<4x256xf32>
    %102 = arith.addf %90, %101 : vector<4x256xf32>
    %103 = vector.extract_strided_slice %5 {offsets = [0, 14], sizes = [4, 1], strides = [1, 1]} : vector<4x16xf32> to vector<4x1xf32>
    %104 = vector.broadcast %103 : vector<4x1xf32> to vector<4x256xf32>
    %105 = arith.mulf %104, %54 : vector<4x256xf32>
    %106 = arith.addf %102, %105 : vector<4x256xf32>
    %cst_24 = arith.constant dense<0.000000e+00> : vector<4xf32>
    %107 = vector.multi_reduction <add>, %106, %cst_24 [1] : vector<4x256xf32> to vector<4xf32>
    %108 = vector.shape_cast %107 : vector<4xf32> to vector<4x1xf32>
    %109 = arith.addf %72, %108 : vector<4x1xf32>
    %110 = arith.mulf %106, %106 : vector<4x256xf32>
    %cst_25 = arith.constant dense<0.000000e+00> : vector<4xf32>
    %111 = vector.multi_reduction <add>, %110, %cst_25 [1] : vector<4x256xf32> to vector<4xf32>
    %112 = vector.shape_cast %111 : vector<4xf32> to vector<4x1xf32>
    %113 = arith.addf %76, %112 : vector<4x1xf32>
    %114 = vector.extract_strided_slice %5 {offsets = [0, 1], sizes = [4, 1], strides = [1, 1]} : vector<4x16xf32> to vector<4x1xf32>
    %115 = vector.extract_strided_slice %4 {offsets = [0, 16], sizes = [4, 240], strides = [1, 1]} : vector<4x256xf32> to vector<4x240xf32>
    %cst_26 = arith.constant 0.000000e+00 : f32
    %116 = vector.broadcast %cst_26 : f32 to vector<4x16xf32>
    %117 = tpu.concatenate %115, %116 in 1 : vector<4x240xf32>, vector<4x16xf32> -> vector<4x256xf32>
    %cst_27 = arith.constant 0.000000e+00 : f32
    %118 = vector.broadcast %cst_27 : f32 to vector<4x256xf32>
    %119 = vector.shape_cast %24 : vector<1x256xi1> to vector<1x256xi1>
    %120 = vector.broadcast %119 : vector<1x256xi1> to vector<4x256xi1>
    %121 = arith.select %120, %117, %118 : vector<4x256xi1>, vector<4x256xf32>
    %122 = vector.broadcast %114 : vector<4x1xf32> to vector<4x256xf32>
    %123 = arith.mulf %122, %121 : vector<4x256xf32>
    %124 = vector.extract_strided_slice %5 {offsets = [0, 3], sizes = [4, 1], strides = [1, 1]} : vector<4x16xf32> to vector<4x1xf32>
    %125 = vector.extract_strided_slice %4 {offsets = [0, 15], sizes = [4, 241], strides = [1, 1]} : vector<4x256xf32> to vector<4x241xf32>
    %cst_28 = arith.constant 0.000000e+00 : f32
    %126 = vector.broadcast %cst_28 : f32 to vector<4x15xf32>
    %127 = tpu.concatenate %125, %126 in 1 : vector<4x241xf32>, vector<4x15xf32> -> vector<4x256xf32>
    %128 = arith.andi %24, %30 : vector<1x256xi1>
    %cst_29 = arith.constant 0.000000e+00 : f32
    %129 = vector.broadcast %cst_29 : f32 to vector<4x256xf32>
    %130 = vector.shape_cast %128 : vector<1x256xi1> to vector<1x256xi1>
    %131 = vector.broadcast %130 : vector<1x256xi1> to vector<4x256xi1>
    %132 = arith.select %131, %127, %129 : vector<4x256xi1>, vector<4x256xf32>
    %133 = vector.broadcast %124 : vector<4x1xf32> to vector<4x256xf32>
    %134 = arith.mulf %133, %132 : vector<4x256xf32>
    %135 = arith.addf %123, %134 : vector<4x256xf32>
    %136 = vector.extract_strided_slice %5 {offsets = [0, 9], sizes = [4, 1], strides = [1, 1]} : vector<4x16xf32> to vector<4x1xf32>
    %137 = vector.broadcast %136 : vector<4x1xf32> to vector<4x256xf32>
    %138 = arith.mulf %137, %4 : vector<4x256xf32>
    %139 = arith.addf %135, %138 : vector<4x256xf32>
    %140 = vector.extract_strided_slice %5 {offsets = [0, 11], sizes = [4, 1], strides = [1, 1]} : vector<4x16xf32> to vector<4x1xf32>
    %141 = vector.broadcast %140 : vector<4x1xf32> to vector<4x256xf32>
    %142 = arith.mulf %141, %43 : vector<4x256xf32>
    %143 = arith.addf %139, %142 : vector<4x256xf32>
    %cst_30 = arith.constant dense<0.000000e+00> : vector<4xf32>
    %144 = vector.multi_reduction <add>, %143, %cst_30 [1] : vector<4x256xf32> to vector<4xf32>
    %145 = vector.shape_cast %144 : vector<4xf32> to vector<4x1xf32>
    %146 = arith.addf %109, %145 : vector<4x1xf32>
    %147 = arith.mulf %143, %143 : vector<4x256xf32>
    %cst_31 = arith.constant dense<0.000000e+00> : vector<4xf32>
    %148 = vector.multi_reduction <add>, %147, %cst_31 [1] : vector<4x256xf32> to vector<4xf32>
    %149 = vector.shape_cast %148 : vector<4xf32> to vector<4x1xf32>
    %150 = arith.addf %113, %149 : vector<4x1xf32>
    %151 = vector.extract_strided_slice %5 {offsets = [0, 0], sizes = [4, 1], strides = [1, 1]} : vector<4x16xf32> to vector<4x1xf32>
    %152 = vector.extract_strided_slice %4 {offsets = [0, 17], sizes = [4, 239], strides = [1, 1]} : vector<4x256xf32> to vector<4x239xf32>
    %cst_32 = arith.constant 0.000000e+00 : f32
    %153 = vector.broadcast %cst_32 : f32 to vector<4x17xf32>
    %154 = tpu.concatenate %152, %153 in 1 : vector<4x239xf32>, vector<4x17xf32> -> vector<4x256xf32>
    %155 = arith.andi %24, %28 : vector<1x256xi1>
    %cst_33 = arith.constant 0.000000e+00 : f32
    %156 = vector.broadcast %cst_33 : f32 to vector<4x256xf32>
    %157 = vector.shape_cast %155 : vector<1x256xi1> to vector<1x256xi1>
    %158 = vector.broadcast %157 : vector<1x256xi1> to vector<4x256xi1>
    %159 = arith.select %158, %154, %156 : vector<4x256xi1>, vector<4x256xf32>
    %160 = vector.broadcast %151 : vector<4x1xf32> to vector<4x256xf32>
    %161 = arith.mulf %160, %159 : vector<4x256xf32>
    %162 = vector.extract_strided_slice %5 {offsets = [0, 2], sizes = [4, 1], strides = [1, 1]} : vector<4x16xf32> to vector<4x1xf32>
    %163 = vector.broadcast %162 : vector<4x1xf32> to vector<4x256xf32>
    %164 = arith.mulf %163, %121 : vector<4x256xf32>
    %165 = arith.addf %161, %164 : vector<4x256xf32>
    %166 = vector.extract_strided_slice %5 {offsets = [0, 8], sizes = [4, 1], strides = [1, 1]} : vector<4x16xf32> to vector<4x1xf32>
    %167 = vector.broadcast %166 : vector<4x1xf32> to vector<4x256xf32>
    %168 = arith.mulf %167, %84 : vector<4x256xf32>
    %169 = arith.addf %165, %168 : vector<4x256xf32>
    %170 = vector.extract_strided_slice %5 {offsets = [0, 10], sizes = [4, 1], strides = [1, 1]} : vector<4x16xf32> to vector<4x1xf32>
    %171 = vector.broadcast %170 : vector<4x1xf32> to vector<4x256xf32>
    %172 = arith.mulf %171, %4 : vector<4x256xf32>
    %173 = arith.addf %169, %172 : vector<4x256xf32>
    %cst_34 = arith.constant dense<0.000000e+00> : vector<4xf32>
    %174 = vector.multi_reduction <add>, %173, %cst_34 [1] : vector<4x256xf32> to vector<4xf32>
    %175 = vector.shape_cast %174 : vector<4xf32> to vector<4x1xf32>
    %176 = arith.addf %146, %175 : vector<4x1xf32>
    %177 = arith.mulf %173, %173 : vector<4x256xf32>
    %cst_35 = arith.constant dense<0.000000e+00> : vector<4xf32>
    %178 = vector.multi_reduction <add>, %177, %cst_35 [1] : vector<4x256xf32> to vector<4xf32>
    %179 = vector.shape_cast %178 : vector<4xf32> to vector<4x1xf32>
    %180 = arith.addf %150, %179 : vector<4x1xf32>
    %c0_36 = arith.constant 0 : index
    %c0_37 = arith.constant 0 : index
    %181 = vector.load %arg3[%c0_36, %c0_37] : memref<4x2xf32, #tpu.memory_space<vmem>>, vector<4x2xf32>
    %182 = tpu.concatenate %176, %180 in 1 : vector<4x1xf32>, vector<4x1xf32> -> vector<4x2xf32>
    %183 = arith.addf %181, %182 : vector<4x2xf32>
    %c0_38 = arith.constant 0 : index
    %c0_39 = arith.constant 0 : index
    %184 = vector.load %arg3[%c0_38, %c0_39] : memref<4x2xf32, #tpu.memory_space<vmem>>, vector<4x2xf32>
    tpu.vector_store %arg3[%c0_38, %c0_39], %183 {strides = array<i32>} : memref<4x2xf32, #tpu.memory_space<vmem>>, vector<4x2xf32>,
    return
  }
  func.func @transform_0(%arg0: i32) -> (i32, i32, i32) {
    %c0_i32 = arith.constant 0 : i32
    %c0_i32_0 = arith.constant 0 : i32
    %c0_i32_1 = arith.constant 0 : i32
    return %arg0, %c0_i32, %c0_i32_0 : i32, i32, i32
  }
  func.func @transform_1(%arg0: i32) -> (i32, i32) {
    %c0_i32 = arith.constant 0 : i32
    %c0_i32_0 = arith.constant 0 : i32
    %c0_i32_1 = arith.constant 0 : i32
    return %c0_i32, %c0_i32_0 : i32, i32
  }
  func.func @transform_2(%arg0: i32) -> (i32, i32) {
    %c0_i32 = arith.constant 0 : i32
    %c0_i32_0 = arith.constant 0 : i32
    %c0_i32_1 = arith.constant 0 : i32
    return %c0_i32, %c0_i32_0 : i32, i32
  }
}

module attributes {stable_mosaic.version = 11 : i64} {
  func.func @_bn2_stats_kernel(%arg0: i32, %arg1: memref<1x4x256xf32, #tpu.memory_space<vmem>>, %arg2: memref<4x16xf32, #tpu.memory_space<vmem>>, %arg3: memref<4x1xf32, #tpu.memory_space<vmem>>, %arg4: memref<4x1xf32, #tpu.memory_space<vmem>>, %arg5: memref<8x4xf32, #tpu.memory_space<vmem>>, %arg6: memref<8x2xf32, #tpu.memory_space<vmem>>) attributes {dimension_semantics = [#tpu.dimension_semantics<arbitrary>], iteration_bounds = array<i64: 2>, scalar_prefetch = 0 : i64, scratch_operands = 0 : i64, tpu.core_type = #tpu.core_type<tc>, window_params = [{transform_indices = @transform_0, window_bounds = array<i64: 1, 4, 256>}, {pipeline_mode = #tpu.pipeline_mode<synchronous>, transform_indices = @transform_1, window_bounds = array<i64: 4, 16>}, {pipeline_mode = #tpu.pipeline_mode<synchronous>, transform_indices = @transform_2, window_bounds = array<i64: 4, 1>}, {pipeline_mode = #tpu.pipeline_mode<synchronous>, transform_indices = @transform_3, window_bounds = array<i64: 4, 1>}, {pipeline_mode = #tpu.pipeline_mode<synchronous>, transform_indices = @transform_4, window_bounds = array<i64: 8, 4>}, {pipeline_mode = #tpu.pipeline_mode<synchronous>, transform_indices = @transform_5, window_bounds = array<i64: 8, 2>}]} {
    %c0_i32 = arith.constant 0 : i32
    %0 = arith.cmpi eq, %arg0, %c0_i32 : i32
    %1 = arith.extui %0 : i1 to i32
    %c0_i32_0 = arith.constant 0 : i32
    %2 = arith.cmpi ne, %1, %c0_i32_0 : i32
    scf.if %2 {
      %cst_54 = arith.constant 0.000000e+00 : f32
      %312 = vector.broadcast %cst_54 : f32 to vector<8x2xf32>
      %c0_55 = arith.constant 0 : index
      %c0_56 = arith.constant 0 : index
      %313 = vector.load %arg6[%c0_55, %c0_56] : memref<8x2xf32, #tpu.memory_space<vmem>>, vector<8x2xf32>
      tpu.vector_store %arg6[%c0_55, %c0_56], %312 {strides = array<i32>} : memref<8x2xf32, #tpu.memory_space<vmem>>, vector<8x2xf32>,
    } else {
    }
    %c0 = arith.constant 0 : index
    %c0_1 = arith.constant 0 : index
    %c0_2 = arith.constant 0 : index
    %3 = vector.load %arg1[%c0, %c0_1, %c0_2] : memref<1x4x256xf32, #tpu.memory_space<vmem>>, vector<1x4x256xf32>
    %4 = vector.shape_cast %3 : vector<1x4x256xf32> to vector<4x256xf32>
    %c0_3 = arith.constant 0 : index
    %c0_4 = arith.constant 0 : index
    %5 = vector.load %arg2[%c0_3, %c0_4] : memref<4x16xf32, #tpu.memory_space<vmem>>, vector<4x16xf32>
    %c0_5 = arith.constant 0 : index
    %c0_6 = arith.constant 0 : index
    %6 = vector.load %arg3[%c0_5, %c0_6] : memref<4x1xf32, #tpu.memory_space<vmem>>, vector<4x1xf32>
    %c0_7 = arith.constant 0 : index
    %c0_8 = arith.constant 0 : index
    %7 = vector.load %arg4[%c0_7, %c0_8] : memref<4x1xf32, #tpu.memory_space<vmem>>, vector<4x1xf32>
    %c0_9 = arith.constant 0 : index
    %c0_10 = arith.constant 0 : index
    %8 = vector.load %arg5[%c0_9, %c0_10] : memref<8x4xf32, #tpu.memory_space<vmem>>, vector<8x4xf32>
    %9 = tpu.iota {dimensions = array<i32: 1>} : vector<1x256xi32>
    %c16_i32 = arith.constant 16 : i32
    %c0_i32_11 = arith.constant 0 : i32
    %10 = arith.cmpi eq, %c16_i32, %c0_i32_11 : i32
    %c1_i32 = arith.constant 1 : i32
    %11 = arith.select %10, %c1_i32, %c16_i32 : i32
    %12 = vector.broadcast %11 : i32 to vector<1x256xi32>
    %13 = arith.remsi %9, %12 : vector<1x256xi32>
    %c0_i32_12 = arith.constant 0 : i32
    %14 = vector.broadcast %c0_i32_12 : i32 to vector<1x256xi32>
    %15 = arith.cmpi ne, %13, %14 : vector<1x256xi32>
    %c0_i32_13 = arith.constant 0 : i32
    %16 = vector.broadcast %c0_i32_13 : i32 to vector<1x256xi32>
    %17 = arith.cmpi slt, %13, %16 : vector<1x256xi32>
    %c0_i32_14 = arith.constant 0 : i32
    %18 = arith.cmpi slt, %11, %c0_i32_14 : i32
    %19 = vector.broadcast %18 : i1 to vector<1x256xi1>
    %20 = vector.broadcast %19 : vector<1x256xi1> to vector<1x256xi1>
    %21 = arith.xori %17, %20 : vector<1x256xi1>
    %22 = arith.andi %21, %15 : vector<1x256xi1>
    %23 = vector.broadcast %11 : i32 to vector<1x256xi32>
    %24 = arith.addi %13, %23 : vector<1x256xi32>
    %25 = arith.select %22, %24, %13 : vector<1x256xi1>, vector<1x256xi32>
    %c240_i32 = arith.constant 240 : i32
    %26 = vector.broadcast %c240_i32 : i32 to vector<1x256xi32>
    %27 = arith.cmpi slt, %9, %26 : vector<1x256xi32>
    %c16_i32_15 = arith.constant 16 : i32
    %28 = vector.broadcast %c16_i32_15 : i32 to vector<1x256xi32>
    %29 = arith.cmpi sge, %9, %28 : vector<1x256xi32>
    %c15_i32 = arith.constant 15 : i32
    %30 = vector.broadcast %c15_i32 : i32 to vector<1x256xi32>
    %31 = arith.cmpi slt, %25, %30 : vector<1x256xi32>
    %c1_i32_16 = arith.constant 1 : i32
    %32 = vector.broadcast %c1_i32_16 : i32 to vector<1x256xi32>
    %33 = arith.cmpi sge, %25, %32 : vector<1x256xi32>
    %cst = arith.constant 0.000000e+00 : f32
    %34 = vector.broadcast %cst : f32 to vector<8x1xf32>
    %cst_17 = arith.constant 0.000000e+00 : f32
    %35 = vector.broadcast %cst_17 : f32 to vector<8x1xf32>
    %36 = vector.extract_strided_slice %5 {offsets = [0, 5], sizes = [4, 1], strides = [1, 1]} : vector<4x16xf32> to vector<4x1xf32>
    %37 = vector.broadcast %36 : vector<4x1xf32> to vector<4x256xf32>
    %38 = arith.mulf %37, %4 : vector<4x256xf32>
    %39 = vector.extract_strided_slice %5 {offsets = [0, 7], sizes = [4, 1], strides = [1, 1]} : vector<4x16xf32> to vector<4x1xf32>
    %cst_18 = arith.constant 0.000000e+00 : f32
    %40 = vector.broadcast %cst_18 : f32 to vector<4x1xf32>
    %41 = vector.extract_strided_slice %4 {offsets = [0, 0], sizes = [4, 255], strides = [1, 1]} : vector<4x256xf32> to vector<4x255xf32>
    %42 = tpu.concatenate %40, %41 in 1 : vector<4x1xf32>, vector<4x255xf32> -> vector<4x256xf32>
    %cst_19 = arith.constant 0.000000e+00 : f32
    %43 = vector.broadcast %cst_19 : f32 to vector<4x256xf32>
    %44 = vector.shape_cast %33 : vector<1x256xi1> to vector<1x256xi1>
    %45 = vector.broadcast %44 : vector<1x256xi1> to vector<4x256xi1>
    %46 = arith.select %45, %42, %43 : vector<4x256xi1>, vector<4x256xf32>
    %47 = vector.broadcast %39 : vector<4x1xf32> to vector<4x256xf32>
    %48 = arith.mulf %47, %46 : vector<4x256xf32>
    %49 = arith.addf %38, %48 : vector<4x256xf32>
    %50 = vector.extract_strided_slice %5 {offsets = [0, 13], sizes = [4, 1], strides = [1, 1]} : vector<4x16xf32> to vector<4x1xf32>
    %cst_20 = arith.constant 0.000000e+00 : f32
    %51 = vector.broadcast %cst_20 : f32 to vector<4x16xf32>
    %52 = vector.extract_strided_slice %4 {offsets = [0, 0], sizes = [4, 240], strides = [1, 1]} : vector<4x256xf32> to vector<4x240xf32>
    %53 = tpu.concatenate %51, %52 in 1 : vector<4x16xf32>, vector<4x240xf32> -> vector<4x256xf32>
    %cst_21 = arith.constant 0.000000e+00 : f32
    %54 = vector.broadcast %cst_21 : f32 to vector<4x256xf32>
    %55 = vector.shape_cast %29 : vector<1x256xi1> to vector<1x256xi1>
    %56 = vector.broadcast %55 : vector<1x256xi1> to vector<4x256xi1>
    %57 = arith.select %56, %53, %54 : vector<4x256xi1>, vector<4x256xf32>
    %58 = vector.broadcast %50 : vector<4x1xf32> to vector<4x256xf32>
    %59 = arith.mulf %58, %57 : vector<4x256xf32>
    %60 = arith.addf %49, %59 : vector<4x256xf32>
    %61 = vector.extract_strided_slice %5 {offsets = [0, 15], sizes = [4, 1], strides = [1, 1]} : vector<4x16xf32> to vector<4x1xf32>
    %cst_22 = arith.constant 0.000000e+00 : f32
    %62 = vector.broadcast %cst_22 : f32 to vector<4x17xf32>
    %63 = vector.extract_strided_slice %4 {offsets = [0, 0], sizes = [4, 239], strides = [1, 1]} : vector<4x256xf32> to vector<4x239xf32>
    %64 = tpu.concatenate %62, %63 in 1 : vector<4x17xf32>, vector<4x239xf32> -> vector<4x256xf32>
    %65 = arith.andi %29, %33 : vector<1x256xi1>
    %cst_23 = arith.constant 0.000000e+00 : f32
    %66 = vector.broadcast %cst_23 : f32 to vector<4x256xf32>
    %67 = vector.shape_cast %65 : vector<1x256xi1> to vector<1x256xi1>
    %68 = vector.broadcast %67 : vector<1x256xi1> to vector<4x256xi1>
    %69 = arith.select %68, %64, %66 : vector<4x256xi1>, vector<4x256xf32>
    %70 = vector.broadcast %61 : vector<4x1xf32> to vector<4x256xf32>
    %71 = arith.mulf %70, %69 : vector<4x256xf32>
    %72 = arith.addf %60, %71 : vector<4x256xf32>
    %73 = vector.broadcast %6 : vector<4x1xf32> to vector<4x256xf32>
    %74 = arith.mulf %72, %73 : vector<4x256xf32>
    %75 = vector.broadcast %7 : vector<4x1xf32> to vector<4x256xf32>
    %76 = arith.addf %74, %75 : vector<4x256xf32>
    %cst_24 = arith.constant 0.000000e+00 : f32
    %cst_25 = arith.constant 6.000000e+00 : f32
    %77 = vector.broadcast %cst_24 : f32 to vector<4x256xf32>
    %78 = arith.maximumf %77, %76 : vector<4x256xf32>
    %79 = vector.broadcast %cst_25 : f32 to vector<4x256xf32>
    %80 = arith.minimumf %79, %78 : vector<4x256xf32>
    %81 = vector.extract_strided_slice %8 {offsets = [0, 0], sizes = [8, 1], strides = [1, 1]} : vector<8x4xf32> to vector<8x1xf32>
    %82 = vector.extract_strided_slice %80 {offsets = [0, 0], sizes = [1, 256], strides = [1, 1]} : vector<4x256xf32> to vector<1x256xf32>
    %83 = vector.broadcast %81 : vector<8x1xf32> to vector<8x256xf32>
    %84 = vector.broadcast %82 : vector<1x256xf32> to vector<8x256xf32>
    %85 = arith.mulf %83, %84 : vector<8x256xf32>
    %86 = vector.extract_strided_slice %8 {offsets = [0, 1], sizes = [8, 1], strides = [1, 1]} : vector<8x4xf32> to vector<8x1xf32>
    %87 = vector.extract_strided_slice %80 {offsets = [1, 0], sizes = [1, 256], strides = [1, 1]} : vector<4x256xf32> to vector<1x256xf32>
    %88 = vector.broadcast %86 : vector<8x1xf32> to vector<8x256xf32>
    %89 = vector.broadcast %87 : vector<1x256xf32> to vector<8x256xf32>
    %90 = arith.mulf %88, %89 : vector<8x256xf32>
    %91 = arith.addf %85, %90 : vector<8x256xf32>
    %92 = vector.extract_strided_slice %8 {offsets = [0, 2], sizes = [8, 1], strides = [1, 1]} : vector<8x4xf32> to vector<8x1xf32>
    %93 = vector.extract_strided_slice %80 {offsets = [2, 0], sizes = [1, 256], strides = [1, 1]} : vector<4x256xf32> to vector<1x256xf32>
    %94 = vector.broadcast %92 : vector<8x1xf32> to vector<8x256xf32>
    %95 = vector.broadcast %93 : vector<1x256xf32> to vector<8x256xf32>
    %96 = arith.mulf %94, %95 : vector<8x256xf32>
    %97 = arith.addf %91, %96 : vector<8x256xf32>
    %98 = vector.extract_strided_slice %8 {offsets = [0, 3], sizes = [8, 1], strides = [1, 1]} : vector<8x4xf32> to vector<8x1xf32>
    %99 = vector.extract_strided_slice %80 {offsets = [3, 0], sizes = [1, 256], strides = [1, 1]} : vector<4x256xf32> to vector<1x256xf32>
    %100 = vector.broadcast %98 : vector<8x1xf32> to vector<8x256xf32>
    %101 = vector.broadcast %99 : vector<1x256xf32> to vector<8x256xf32>
    %102 = arith.mulf %100, %101 : vector<8x256xf32>
    %103 = arith.addf %97, %102 : vector<8x256xf32>
    %cst_26 = arith.constant dense<0.000000e+00> : vector<8xf32>
    %104 = vector.multi_reduction <add>, %103, %cst_26 [1] : vector<8x256xf32> to vector<8xf32>
    %105 = vector.shape_cast %104 : vector<8xf32> to vector<8x1xf32>
    %106 = arith.addf %34, %105 : vector<8x1xf32>
    %107 = arith.mulf %103, %103 : vector<8x256xf32>
    %cst_27 = arith.constant dense<0.000000e+00> : vector<8xf32>
    %108 = vector.multi_reduction <add>, %107, %cst_27 [1] : vector<8x256xf32> to vector<8xf32>
    %109 = vector.shape_cast %108 : vector<8xf32> to vector<8x1xf32>
    %110 = arith.addf %35, %109 : vector<8x1xf32>
    %111 = vector.extract_strided_slice %5 {offsets = [0, 4], sizes = [4, 1], strides = [1, 1]} : vector<4x16xf32> to vector<4x1xf32>
    %112 = vector.extract_strided_slice %4 {offsets = [0, 1], sizes = [4, 255], strides = [1, 1]} : vector<4x256xf32> to vector<4x255xf32>
    %cst_28 = arith.constant 0.000000e+00 : f32
    %113 = vector.broadcast %cst_28 : f32 to vector<4x1xf32>
    %114 = tpu.concatenate %112, %113 in 1 : vector<4x255xf32>, vector<4x1xf32> -> vector<4x256xf32>
    %cst_29 = arith.constant 0.000000e+00 : f32
    %115 = vector.broadcast %cst_29 : f32 to vector<4x256xf32>
    %116 = vector.shape_cast %31 : vector<1x256xi1> to vector<1x256xi1>
    %117 = vector.broadcast %116 : vector<1x256xi1> to vector<4x256xi1>
    %118 = arith.select %117, %114, %115 : vector<4x256xi1>, vector<4x256xf32>
    %119 = vector.broadcast %111 : vector<4x1xf32> to vector<4x256xf32>
    %120 = arith.mulf %119, %118 : vector<4x256xf32>
    %121 = vector.extract_strided_slice %5 {offsets = [0, 6], sizes = [4, 1], strides = [1, 1]} : vector<4x16xf32> to vector<4x1xf32>
    %122 = vector.broadcast %121 : vector<4x1xf32> to vector<4x256xf32>
    %123 = arith.mulf %122, %4 : vector<4x256xf32>
    %124 = arith.addf %120, %123 : vector<4x256xf32>
    %125 = vector.extract_strided_slice %5 {offsets = [0, 12], sizes = [4, 1], strides = [1, 1]} : vector<4x16xf32> to vector<4x1xf32>
    %cst_30 = arith.constant 0.000000e+00 : f32
    %126 = vector.broadcast %cst_30 : f32 to vector<4x15xf32>
    %127 = vector.extract_strided_slice %4 {offsets = [0, 0], sizes = [4, 241], strides = [1, 1]} : vector<4x256xf32> to vector<4x241xf32>
    %128 = tpu.concatenate %126, %127 in 1 : vector<4x15xf32>, vector<4x241xf32> -> vector<4x256xf32>
    %129 = arith.andi %29, %31 : vector<1x256xi1>
    %cst_31 = arith.constant 0.000000e+00 : f32
    %130 = vector.broadcast %cst_31 : f32 to vector<4x256xf32>
    %131 = vector.shape_cast %129 : vector<1x256xi1> to vector<1x256xi1>
    %132 = vector.broadcast %131 : vector<1x256xi1> to vector<4x256xi1>
    %133 = arith.select %132, %128, %130 : vector<4x256xi1>, vector<4x256xf32>
    %134 = vector.broadcast %125 : vector<4x1xf32> to vector<4x256xf32>
    %135 = arith.mulf %134, %133 : vector<4x256xf32>
    %136 = arith.addf %124, %135 : vector<4x256xf32>
    %137 = vector.extract_strided_slice %5 {offsets = [0, 14], sizes = [4, 1], strides = [1, 1]} : vector<4x16xf32> to vector<4x1xf32>
    %138 = vector.broadcast %137 : vector<4x1xf32> to vector<4x256xf32>
    %139 = arith.mulf %138, %57 : vector<4x256xf32>
    %140 = arith.addf %136, %139 : vector<4x256xf32>
    %141 = vector.broadcast %6 : vector<4x1xf32> to vector<4x256xf32>
    %142 = arith.mulf %140, %141 : vector<4x256xf32>
    %143 = vector.broadcast %7 : vector<4x1xf32> to vector<4x256xf32>
    %144 = arith.addf %142, %143 : vector<4x256xf32>
    %cst_32 = arith.constant 0.000000e+00 : f32
    %cst_33 = arith.constant 6.000000e+00 : f32
    %145 = vector.broadcast %cst_32 : f32 to vector<4x256xf32>
    %146 = arith.maximumf %145, %144 : vector<4x256xf32>
    %147 = vector.broadcast %cst_33 : f32 to vector<4x256xf32>
    %148 = arith.minimumf %147, %146 : vector<4x256xf32>
    %149 = vector.extract_strided_slice %8 {offsets = [0, 0], sizes = [8, 1], strides = [1, 1]} : vector<8x4xf32> to vector<8x1xf32>
    %150 = vector.extract_strided_slice %148 {offsets = [0, 0], sizes = [1, 256], strides = [1, 1]} : vector<4x256xf32> to vector<1x256xf32>
    %151 = vector.broadcast %149 : vector<8x1xf32> to vector<8x256xf32>
    %152 = vector.broadcast %150 : vector<1x256xf32> to vector<8x256xf32>
    %153 = arith.mulf %151, %152 : vector<8x256xf32>
    %154 = vector.extract_strided_slice %8 {offsets = [0, 1], sizes = [8, 1], strides = [1, 1]} : vector<8x4xf32> to vector<8x1xf32>
    %155 = vector.extract_strided_slice %148 {offsets = [1, 0], sizes = [1, 256], strides = [1, 1]} : vector<4x256xf32> to vector<1x256xf32>
    %156 = vector.broadcast %154 : vector<8x1xf32> to vector<8x256xf32>
    %157 = vector.broadcast %155 : vector<1x256xf32> to vector<8x256xf32>
    %158 = arith.mulf %156, %157 : vector<8x256xf32>
    %159 = arith.addf %153, %158 : vector<8x256xf32>
    %160 = vector.extract_strided_slice %8 {offsets = [0, 2], sizes = [8, 1], strides = [1, 1]} : vector<8x4xf32> to vector<8x1xf32>
    %161 = vector.extract_strided_slice %148 {offsets = [2, 0], sizes = [1, 256], strides = [1, 1]} : vector<4x256xf32> to vector<1x256xf32>
    %162 = vector.broadcast %160 : vector<8x1xf32> to vector<8x256xf32>
    %163 = vector.broadcast %161 : vector<1x256xf32> to vector<8x256xf32>
    %164 = arith.mulf %162, %163 : vector<8x256xf32>
    %165 = arith.addf %159, %164 : vector<8x256xf32>
    %166 = vector.extract_strided_slice %8 {offsets = [0, 3], sizes = [8, 1], strides = [1, 1]} : vector<8x4xf32> to vector<8x1xf32>
    %167 = vector.extract_strided_slice %148 {offsets = [3, 0], sizes = [1, 256], strides = [1, 1]} : vector<4x256xf32> to vector<1x256xf32>
    %168 = vector.broadcast %166 : vector<8x1xf32> to vector<8x256xf32>
    %169 = vector.broadcast %167 : vector<1x256xf32> to vector<8x256xf32>
    %170 = arith.mulf %168, %169 : vector<8x256xf32>
    %171 = arith.addf %165, %170 : vector<8x256xf32>
    %cst_34 = arith.constant dense<0.000000e+00> : vector<8xf32>
    %172 = vector.multi_reduction <add>, %171, %cst_34 [1] : vector<8x256xf32> to vector<8xf32>
    %173 = vector.shape_cast %172 : vector<8xf32> to vector<8x1xf32>
    %174 = arith.addf %106, %173 : vector<8x1xf32>
    %175 = arith.mulf %171, %171 : vector<8x256xf32>
    %cst_35 = arith.constant dense<0.000000e+00> : vector<8xf32>
    %176 = vector.multi_reduction <add>, %175, %cst_35 [1] : vector<8x256xf32> to vector<8xf32>
    %177 = vector.shape_cast %176 : vector<8xf32> to vector<8x1xf32>
    %178 = arith.addf %110, %177 : vector<8x1xf32>
    %179 = vector.extract_strided_slice %5 {offsets = [0, 1], sizes = [4, 1], strides = [1, 1]} : vector<4x16xf32> to vector<4x1xf32>
    %180 = vector.extract_strided_slice %4 {offsets = [0, 16], sizes = [4, 240], strides = [1, 1]} : vector<4x256xf32> to vector<4x240xf32>
    %cst_36 = arith.constant 0.000000e+00 : f32
    %181 = vector.broadcast %cst_36 : f32 to vector<4x16xf32>
    %182 = tpu.concatenate %180, %181 in 1 : vector<4x240xf32>, vector<4x16xf32> -> vector<4x256xf32>
    %cst_37 = arith.constant 0.000000e+00 : f32
    %183 = vector.broadcast %cst_37 : f32 to vector<4x256xf32>
    %184 = vector.shape_cast %27 : vector<1x256xi1> to vector<1x256xi1>
    %185 = vector.broadcast %184 : vector<1x256xi1> to vector<4x256xi1>
    %186 = arith.select %185, %182, %183 : vector<4x256xi1>, vector<4x256xf32>
    %187 = vector.broadcast %179 : vector<4x1xf32> to vector<4x256xf32>
    %188 = arith.mulf %187, %186 : vector<4x256xf32>
    %189 = vector.extract_strided_slice %5 {offsets = [0, 3], sizes = [4, 1], strides = [1, 1]} : vector<4x16xf32> to vector<4x1xf32>
    %190 = vector.extract_strided_slice %4 {offsets = [0, 15], sizes = [4, 241], strides = [1, 1]} : vector<4x256xf32> to vector<4x241xf32>
    %cst_38 = arith.constant 0.000000e+00 : f32
    %191 = vector.broadcast %cst_38 : f32 to vector<4x15xf32>
    %192 = tpu.concatenate %190, %191 in 1 : vector<4x241xf32>, vector<4x15xf32> -> vector<4x256xf32>
    %193 = arith.andi %27, %33 : vector<1x256xi1>
    %cst_39 = arith.constant 0.000000e+00 : f32
    %194 = vector.broadcast %cst_39 : f32 to vector<4x256xf32>
    %195 = vector.shape_cast %193 : vector<1x256xi1> to vector<1x256xi1>
    %196 = vector.broadcast %195 : vector<1x256xi1> to vector<4x256xi1>
    %197 = arith.select %196, %192, %194 : vector<4x256xi1>, vector<4x256xf32>
    %198 = vector.broadcast %189 : vector<4x1xf32> to vector<4x256xf32>
    %199 = arith.mulf %198, %197 : vector<4x256xf32>
    %200 = arith.addf %188, %199 : vector<4x256xf32>
    %201 = vector.extract_strided_slice %5 {offsets = [0, 9], sizes = [4, 1], strides = [1, 1]} : vector<4x16xf32> to vector<4x1xf32>
    %202 = vector.broadcast %201 : vector<4x1xf32> to vector<4x256xf32>
    %203 = arith.mulf %202, %4 : vector<4x256xf32>
    %204 = arith.addf %200, %203 : vector<4x256xf32>
    %205 = vector.extract_strided_slice %5 {offsets = [0, 11], sizes = [4, 1], strides = [1, 1]} : vector<4x16xf32> to vector<4x1xf32>
    %206 = vector.broadcast %205 : vector<4x1xf32> to vector<4x256xf32>
    %207 = arith.mulf %206, %46 : vector<4x256xf32>
    %208 = arith.addf %204, %207 : vector<4x256xf32>
    %209 = vector.broadcast %6 : vector<4x1xf32> to vector<4x256xf32>
    %210 = arith.mulf %208, %209 : vector<4x256xf32>
    %211 = vector.broadcast %7 : vector<4x1xf32> to vector<4x256xf32>
    %212 = arith.addf %210, %211 : vector<4x256xf32>
    %cst_40 = arith.constant 0.000000e+00 : f32
    %cst_41 = arith.constant 6.000000e+00 : f32
    %213 = vector.broadcast %cst_40 : f32 to vector<4x256xf32>
    %214 = arith.maximumf %213, %212 : vector<4x256xf32>
    %215 = vector.broadcast %cst_41 : f32 to vector<4x256xf32>
    %216 = arith.minimumf %215, %214 : vector<4x256xf32>
    %217 = vector.extract_strided_slice %8 {offsets = [0, 0], sizes = [8, 1], strides = [1, 1]} : vector<8x4xf32> to vector<8x1xf32>
    %218 = vector.extract_strided_slice %216 {offsets = [0, 0], sizes = [1, 256], strides = [1, 1]} : vector<4x256xf32> to vector<1x256xf32>
    %219 = vector.broadcast %217 : vector<8x1xf32> to vector<8x256xf32>
    %220 = vector.broadcast %218 : vector<1x256xf32> to vector<8x256xf32>
    %221 = arith.mulf %219, %220 : vector<8x256xf32>
    %222 = vector.extract_strided_slice %8 {offsets = [0, 1], sizes = [8, 1], strides = [1, 1]} : vector<8x4xf32> to vector<8x1xf32>
    %223 = vector.extract_strided_slice %216 {offsets = [1, 0], sizes = [1, 256], strides = [1, 1]} : vector<4x256xf32> to vector<1x256xf32>
    %224 = vector.broadcast %222 : vector<8x1xf32> to vector<8x256xf32>
    %225 = vector.broadcast %223 : vector<1x256xf32> to vector<8x256xf32>
    %226 = arith.mulf %224, %225 : vector<8x256xf32>
    %227 = arith.addf %221, %226 : vector<8x256xf32>
    %228 = vector.extract_strided_slice %8 {offsets = [0, 2], sizes = [8, 1], strides = [1, 1]} : vector<8x4xf32> to vector<8x1xf32>
    %229 = vector.extract_strided_slice %216 {offsets = [2, 0], sizes = [1, 256], strides = [1, 1]} : vector<4x256xf32> to vector<1x256xf32>
    %230 = vector.broadcast %228 : vector<8x1xf32> to vector<8x256xf32>
    %231 = vector.broadcast %229 : vector<1x256xf32> to vector<8x256xf32>
    %232 = arith.mulf %230, %231 : vector<8x256xf32>
    %233 = arith.addf %227, %232 : vector<8x256xf32>
    %234 = vector.extract_strided_slice %8 {offsets = [0, 3], sizes = [8, 1], strides = [1, 1]} : vector<8x4xf32> to vector<8x1xf32>
    %235 = vector.extract_strided_slice %216 {offsets = [3, 0], sizes = [1, 256], strides = [1, 1]} : vector<4x256xf32> to vector<1x256xf32>
    %236 = vector.broadcast %234 : vector<8x1xf32> to vector<8x256xf32>
    %237 = vector.broadcast %235 : vector<1x256xf32> to vector<8x256xf32>
    %238 = arith.mulf %236, %237 : vector<8x256xf32>
    %239 = arith.addf %233, %238 : vector<8x256xf32>
    %cst_42 = arith.constant dense<0.000000e+00> : vector<8xf32>
    %240 = vector.multi_reduction <add>, %239, %cst_42 [1] : vector<8x256xf32> to vector<8xf32>
    %241 = vector.shape_cast %240 : vector<8xf32> to vector<8x1xf32>
    %242 = arith.addf %174, %241 : vector<8x1xf32>
    %243 = arith.mulf %239, %239 : vector<8x256xf32>
    %cst_43 = arith.constant dense<0.000000e+00> : vector<8xf32>
    %244 = vector.multi_reduction <add>, %243, %cst_43 [1] : vector<8x256xf32> to vector<8xf32>
    %245 = vector.shape_cast %244 : vector<8xf32> to vector<8x1xf32>
    %246 = arith.addf %178, %245 : vector<8x1xf32>
    %247 = vector.extract_strided_slice %5 {offsets = [0, 0], sizes = [4, 1], strides = [1, 1]} : vector<4x16xf32> to vector<4x1xf32>
    %248 = vector.extract_strided_slice %4 {offsets = [0, 17], sizes = [4, 239], strides = [1, 1]} : vector<4x256xf32> to vector<4x239xf32>
    %cst_44 = arith.constant 0.000000e+00 : f32
    %249 = vector.broadcast %cst_44 : f32 to vector<4x17xf32>
    %250 = tpu.concatenate %248, %249 in 1 : vector<4x239xf32>, vector<4x17xf32> -> vector<4x256xf32>
    %251 = arith.andi %27, %31 : vector<1x256xi1>
    %cst_45 = arith.constant 0.000000e+00 : f32
    %252 = vector.broadcast %cst_45 : f32 to vector<4x256xf32>
    %253 = vector.shape_cast %251 : vector<1x256xi1> to vector<1x256xi1>
    %254 = vector.broadcast %253 : vector<1x256xi1> to vector<4x256xi1>
    %255 = arith.select %254, %250, %252 : vector<4x256xi1>, vector<4x256xf32>
    %256 = vector.broadcast %247 : vector<4x1xf32> to vector<4x256xf32>
    %257 = arith.mulf %256, %255 : vector<4x256xf32>
    %258 = vector.extract_strided_slice %5 {offsets = [0, 2], sizes = [4, 1], strides = [1, 1]} : vector<4x16xf32> to vector<4x1xf32>
    %259 = vector.broadcast %258 : vector<4x1xf32> to vector<4x256xf32>
    %260 = arith.mulf %259, %186 : vector<4x256xf32>
    %261 = arith.addf %257, %260 : vector<4x256xf32>
    %262 = vector.extract_strided_slice %5 {offsets = [0, 8], sizes = [4, 1], strides = [1, 1]} : vector<4x16xf32> to vector<4x1xf32>
    %263 = vector.broadcast %262 : vector<4x1xf32> to vector<4x256xf32>
    %264 = arith.mulf %263, %118 : vector<4x256xf32>
    %265 = arith.addf %261, %264 : vector<4x256xf32>
    %266 = vector.extract_strided_slice %5 {offsets = [0, 10], sizes = [4, 1], strides = [1, 1]} : vector<4x16xf32> to vector<4x1xf32>
    %267 = vector.broadcast %266 : vector<4x1xf32> to vector<4x256xf32>
    %268 = arith.mulf %267, %4 : vector<4x256xf32>
    %269 = arith.addf %265, %268 : vector<4x256xf32>
    %270 = vector.broadcast %6 : vector<4x1xf32> to vector<4x256xf32>
    %271 = arith.mulf %269, %270 : vector<4x256xf32>
    %272 = vector.broadcast %7 : vector<4x1xf32> to vector<4x256xf32>
    %273 = arith.addf %271, %272 : vector<4x256xf32>
    %cst_46 = arith.constant 0.000000e+00 : f32
    %cst_47 = arith.constant 6.000000e+00 : f32
    %274 = vector.broadcast %cst_46 : f32 to vector<4x256xf32>
    %275 = arith.maximumf %274, %273 : vector<4x256xf32>
    %276 = vector.broadcast %cst_47 : f32 to vector<4x256xf32>
    %277 = arith.minimumf %276, %275 : vector<4x256xf32>
    %278 = vector.extract_strided_slice %8 {offsets = [0, 0], sizes = [8, 1], strides = [1, 1]} : vector<8x4xf32> to vector<8x1xf32>
    %279 = vector.extract_strided_slice %277 {offsets = [0, 0], sizes = [1, 256], strides = [1, 1]} : vector<4x256xf32> to vector<1x256xf32>
    %280 = vector.broadcast %278 : vector<8x1xf32> to vector<8x256xf32>
    %281 = vector.broadcast %279 : vector<1x256xf32> to vector<8x256xf32>
    %282 = arith.mulf %280, %281 : vector<8x256xf32>
    %283 = vector.extract_strided_slice %8 {offsets = [0, 1], sizes = [8, 1], strides = [1, 1]} : vector<8x4xf32> to vector<8x1xf32>
    %284 = vector.extract_strided_slice %277 {offsets = [1, 0], sizes = [1, 256], strides = [1, 1]} : vector<4x256xf32> to vector<1x256xf32>
    %285 = vector.broadcast %283 : vector<8x1xf32> to vector<8x256xf32>
    %286 = vector.broadcast %284 : vector<1x256xf32> to vector<8x256xf32>
    %287 = arith.mulf %285, %286 : vector<8x256xf32>
    %288 = arith.addf %282, %287 : vector<8x256xf32>
    %289 = vector.extract_strided_slice %8 {offsets = [0, 2], sizes = [8, 1], strides = [1, 1]} : vector<8x4xf32> to vector<8x1xf32>
    %290 = vector.extract_strided_slice %277 {offsets = [2, 0], sizes = [1, 256], strides = [1, 1]} : vector<4x256xf32> to vector<1x256xf32>
    %291 = vector.broadcast %289 : vector<8x1xf32> to vector<8x256xf32>
    %292 = vector.broadcast %290 : vector<1x256xf32> to vector<8x256xf32>
    %293 = arith.mulf %291, %292 : vector<8x256xf32>
    %294 = arith.addf %288, %293 : vector<8x256xf32>
    %295 = vector.extract_strided_slice %8 {offsets = [0, 3], sizes = [8, 1], strides = [1, 1]} : vector<8x4xf32> to vector<8x1xf32>
    %296 = vector.extract_strided_slice %277 {offsets = [3, 0], sizes = [1, 256], strides = [1, 1]} : vector<4x256xf32> to vector<1x256xf32>
    %297 = vector.broadcast %295 : vector<8x1xf32> to vector<8x256xf32>
    %298 = vector.broadcast %296 : vector<1x256xf32> to vector<8x256xf32>
    %299 = arith.mulf %297, %298 : vector<8x256xf32>
    %300 = arith.addf %294, %299 : vector<8x256xf32>
    %cst_48 = arith.constant dense<0.000000e+00> : vector<8xf32>
    %301 = vector.multi_reduction <add>, %300, %cst_48 [1] : vector<8x256xf32> to vector<8xf32>
    %302 = vector.shape_cast %301 : vector<8xf32> to vector<8x1xf32>
    %303 = arith.addf %242, %302 : vector<8x1xf32>
    %304 = arith.mulf %300, %300 : vector<8x256xf32>
    %cst_49 = arith.constant dense<0.000000e+00> : vector<8xf32>
    %305 = vector.multi_reduction <add>, %304, %cst_49 [1] : vector<8x256xf32> to vector<8xf32>
    %306 = vector.shape_cast %305 : vector<8xf32> to vector<8x1xf32>
    %307 = arith.addf %246, %306 : vector<8x1xf32>
    %c0_50 = arith.constant 0 : index
    %c0_51 = arith.constant 0 : index
    %308 = vector.load %arg6[%c0_50, %c0_51] : memref<8x2xf32, #tpu.memory_space<vmem>>, vector<8x2xf32>
    %309 = tpu.concatenate %303, %307 in 1 : vector<8x1xf32>, vector<8x1xf32> -> vector<8x2xf32>
    %310 = arith.addf %308, %309 : vector<8x2xf32>
    %c0_52 = arith.constant 0 : index
    %c0_53 = arith.constant 0 : index
    %311 = vector.load %arg6[%c0_52, %c0_53] : memref<8x2xf32, #tpu.memory_space<vmem>>, vector<8x2xf32>
    tpu.vector_store %arg6[%c0_52, %c0_53], %310 {strides = array<i32>} : memref<8x2xf32, #tpu.memory_space<vmem>>, vector<8x2xf32>,
    return
  }
  func.func @transform_0(%arg0: i32) -> (i32, i32, i32) {
    %c0_i32 = arith.constant 0 : i32
    %c0_i32_0 = arith.constant 0 : i32
    %c0_i32_1 = arith.constant 0 : i32
    return %arg0, %c0_i32, %c0_i32_0 : i32, i32, i32
  }
  func.func @transform_1(%arg0: i32) -> (i32, i32) {
    %c0_i32 = arith.constant 0 : i32
    %c0_i32_0 = arith.constant 0 : i32
    %c0_i32_1 = arith.constant 0 : i32
    return %c0_i32, %c0_i32_0 : i32, i32
  }
  func.func @transform_2(%arg0: i32) -> (i32, i32) {
    %c0_i32 = arith.constant 0 : i32
    %c0_i32_0 = arith.constant 0 : i32
    %c0_i32_1 = arith.constant 0 : i32
    return %c0_i32, %c0_i32_0 : i32, i32
  }
  func.func @transform_3(%arg0: i32) -> (i32, i32) {
    %c0_i32 = arith.constant 0 : i32
    %c0_i32_0 = arith.constant 0 : i32
    %c0_i32_1 = arith.constant 0 : i32
    return %c0_i32, %c0_i32_0 : i32, i32
  }
  func.func @transform_4(%arg0: i32) -> (i32, i32) {
    %c0_i32 = arith.constant 0 : i32
    %c0_i32_0 = arith.constant 0 : i32
    %c0_i32_1 = arith.constant 0 : i32
    return %c0_i32, %c0_i32_0 : i32, i32
  }
  func.func @transform_5(%arg0: i32) -> (i32, i32) {
    %c0_i32 = arith.constant 0 : i32
    %c0_i32_0 = arith.constant 0 : i32
    %c0_i32_1 = arith.constant 0 : i32
    return %c0_i32, %c0_i32_0 : i32, i32
  }
}

module attributes {stable_mosaic.version = 11 : i64} {
  func.func @_final_kernel(%arg0: i32, %arg1: memref<1x4x256xf32, #tpu.memory_space<vmem>>, %arg2: memref<4x16xf32, #tpu.memory_space<vmem>>, %arg3: memref<4x1xf32, #tpu.memory_space<vmem>>, %arg4: memref<4x1xf32, #tpu.memory_space<vmem>>, %arg5: memref<8x4xf32, #tpu.memory_space<vmem>>, %arg6: memref<8x1xf32, #tpu.memory_space<vmem>>, %arg7: memref<8x1xf32, #tpu.memory_space<vmem>>, %arg8: memref<1x4x8x256xf32, #tpu.memory_space<vmem>>) attributes {dimension_semantics = [#tpu.dimension_semantics<parallel>], iteration_bounds = array<i64: 2>, scalar_prefetch = 0 : i64, scratch_operands = 0 : i64, tpu.core_type = #tpu.core_type<tc>, window_params = [{transform_indices = @transform_0, window_bounds = array<i64: 1, 4, 256>}, {pipeline_mode = #tpu.pipeline_mode<synchronous>, transform_indices = @transform_1, window_bounds = array<i64: 4, 16>}, {pipeline_mode = #tpu.pipeline_mode<synchronous>, transform_indices = @transform_2, window_bounds = array<i64: 4, 1>}, {pipeline_mode = #tpu.pipeline_mode<synchronous>, transform_indices = @transform_3, window_bounds = array<i64: 4, 1>}, {pipeline_mode = #tpu.pipeline_mode<synchronous>, transform_indices = @transform_4, window_bounds = array<i64: 8, 4>}, {pipeline_mode = #tpu.pipeline_mode<synchronous>, transform_indices = @transform_5, window_bounds = array<i64: 8, 1>}, {pipeline_mode = #tpu.pipeline_mode<synchronous>, transform_indices = @transform_6, window_bounds = array<i64: 8, 1>}, {transform_indices = @transform_7, window_bounds = array<i64: 1, 4, 8, 256>}]} {
    %c0 = arith.constant 0 : index
    %c0_0 = arith.constant 0 : index
    %c0_1 = arith.constant 0 : index
    %0 = vector.load %arg1[%c0, %c0_0, %c0_1] : memref<1x4x256xf32, #tpu.memory_space<vmem>>, vector<1x4x256xf32>
    %1 = vector.shape_cast %0 : vector<1x4x256xf32> to vector<4x256xf32>
    %c0_2 = arith.constant 0 : index
    %c0_3 = arith.constant 0 : index
    %2 = vector.load %arg2[%c0_2, %c0_3] : memref<4x16xf32, #tpu.memory_space<vmem>>, vector<4x16xf32>
    %c0_4 = arith.constant 0 : index
    %c0_5 = arith.constant 0 : index
    %3 = vector.load %arg3[%c0_4, %c0_5] : memref<4x1xf32, #tpu.memory_space<vmem>>, vector<4x1xf32>
    %c0_6 = arith.constant 0 : index
    %c0_7 = arith.constant 0 : index
    %4 = vector.load %arg4[%c0_6, %c0_7] : memref<4x1xf32, #tpu.memory_space<vmem>>, vector<4x1xf32>
    %c0_8 = arith.constant 0 : index
    %c0_9 = arith.constant 0 : index
    %5 = vector.load %arg5[%c0_8, %c0_9] : memref<8x4xf32, #tpu.memory_space<vmem>>, vector<8x4xf32>
    %c0_10 = arith.constant 0 : index
    %c0_11 = arith.constant 0 : index
    %6 = vector.load %arg6[%c0_10, %c0_11] : memref<8x1xf32, #tpu.memory_space<vmem>>, vector<8x1xf32>
    %c0_12 = arith.constant 0 : index
    %c0_13 = arith.constant 0 : index
    %7 = vector.load %arg7[%c0_12, %c0_13] : memref<8x1xf32, #tpu.memory_space<vmem>>, vector<8x1xf32>
    %8 = tpu.iota {dimensions = array<i32: 1>} : vector<1x256xi32>
    %c16_i32 = arith.constant 16 : i32
    %c0_i32 = arith.constant 0 : i32
    %9 = arith.cmpi eq, %c16_i32, %c0_i32 : i32
    %c1_i32 = arith.constant 1 : i32
    %10 = arith.select %9, %c1_i32, %c16_i32 : i32
    %11 = vector.broadcast %10 : i32 to vector<1x256xi32>
    %12 = arith.remsi %8, %11 : vector<1x256xi32>
    %c0_i32_14 = arith.constant 0 : i32
    %13 = vector.broadcast %c0_i32_14 : i32 to vector<1x256xi32>
    %14 = arith.cmpi ne, %12, %13 : vector<1x256xi32>
    %c0_i32_15 = arith.constant 0 : i32
    %15 = vector.broadcast %c0_i32_15 : i32 to vector<1x256xi32>
    %16 = arith.cmpi slt, %12, %15 : vector<1x256xi32>
    %c0_i32_16 = arith.constant 0 : i32
    %17 = arith.cmpi slt, %10, %c0_i32_16 : i32
    %18 = vector.broadcast %17 : i1 to vector<1x256xi1>
    %19 = vector.broadcast %18 : vector<1x256xi1> to vector<1x256xi1>
    %20 = arith.xori %16, %19 : vector<1x256xi1>
    %21 = arith.andi %20, %14 : vector<1x256xi1>
    %22 = vector.broadcast %10 : i32 to vector<1x256xi32>
    %23 = arith.addi %12, %22 : vector<1x256xi32>
    %24 = arith.select %21, %23, %12 : vector<1x256xi1>, vector<1x256xi32>
    %c240_i32 = arith.constant 240 : i32
    %25 = vector.broadcast %c240_i32 : i32 to vector<1x256xi32>
    %26 = arith.cmpi slt, %8, %25 : vector<1x256xi32>
    %c16_i32_17 = arith.constant 16 : i32
    %27 = vector.broadcast %c16_i32_17 : i32 to vector<1x256xi32>
    %28 = arith.cmpi sge, %8, %27 : vector<1x256xi32>
    %c15_i32 = arith.constant 15 : i32
    %29 = vector.broadcast %c15_i32 : i32 to vector<1x256xi32>
    %30 = arith.cmpi slt, %24, %29 : vector<1x256xi32>
    %c1_i32_18 = arith.constant 1 : i32
    %31 = vector.broadcast %c1_i32_18 : i32 to vector<1x256xi32>
    %32 = arith.cmpi sge, %24, %31 : vector<1x256xi32>
    %33 = vector.extract_strided_slice %2 {offsets = [0, 5], sizes = [4, 1], strides = [1, 1]} : vector<4x16xf32> to vector<4x1xf32>
    %34 = vector.broadcast %33 : vector<4x1xf32> to vector<4x256xf32>
    %35 = arith.mulf %34, %1 : vector<4x256xf32>
    %36 = vector.extract_strided_slice %2 {offsets = [0, 7], sizes = [4, 1], strides = [1, 1]} : vector<4x16xf32> to vector<4x1xf32>
    %cst = arith.constant 0.000000e+00 : f32
    %37 = vector.broadcast %cst : f32 to vector<4x1xf32>
    %38 = vector.extract_strided_slice %1 {offsets = [0, 0], sizes = [4, 255], strides = [1, 1]} : vector<4x256xf32> to vector<4x255xf32>
    %39 = tpu.concatenate %37, %38 in 1 : vector<4x1xf32>, vector<4x255xf32> -> vector<4x256xf32>
    %cst_19 = arith.constant 0.000000e+00 : f32
    %40 = vector.broadcast %cst_19 : f32 to vector<4x256xf32>
    %41 = vector.shape_cast %32 : vector<1x256xi1> to vector<1x256xi1>
    %42 = vector.broadcast %41 : vector<1x256xi1> to vector<4x256xi1>
    %43 = arith.select %42, %39, %40 : vector<4x256xi1>, vector<4x256xf32>
    %44 = vector.broadcast %36 : vector<4x1xf32> to vector<4x256xf32>
    %45 = arith.mulf %44, %43 : vector<4x256xf32>
    %46 = arith.addf %35, %45 : vector<4x256xf32>
    %47 = vector.extract_strided_slice %2 {offsets = [0, 13], sizes = [4, 1], strides = [1, 1]} : vector<4x16xf32> to vector<4x1xf32>
    %cst_20 = arith.constant 0.000000e+00 : f32
    %48 = vector.broadcast %cst_20 : f32 to vector<4x16xf32>
    %49 = vector.extract_strided_slice %1 {offsets = [0, 0], sizes = [4, 240], strides = [1, 1]} : vector<4x256xf32> to vector<4x240xf32>
    %50 = tpu.concatenate %48, %49 in 1 : vector<4x16xf32>, vector<4x240xf32> -> vector<4x256xf32>
    %cst_21 = arith.constant 0.000000e+00 : f32
    %51 = vector.broadcast %cst_21 : f32 to vector<4x256xf32>
    %52 = vector.shape_cast %28 : vector<1x256xi1> to vector<1x256xi1>
    %53 = vector.broadcast %52 : vector<1x256xi1> to vector<4x256xi1>
    %54 = arith.select %53, %50, %51 : vector<4x256xi1>, vector<4x256xf32>
    %55 = vector.broadcast %47 : vector<4x1xf32> to vector<4x256xf32>
    %56 = arith.mulf %55, %54 : vector<4x256xf32>
    %57 = arith.addf %46, %56 : vector<4x256xf32>
    %58 = vector.extract_strided_slice %2 {offsets = [0, 15], sizes = [4, 1], strides = [1, 1]} : vector<4x16xf32> to vector<4x1xf32>
    %cst_22 = arith.constant 0.000000e+00 : f32
    %59 = vector.broadcast %cst_22 : f32 to vector<4x17xf32>
    %60 = vector.extract_strided_slice %1 {offsets = [0, 0], sizes = [4, 239], strides = [1, 1]} : vector<4x256xf32> to vector<4x239xf32>
    %61 = tpu.concatenate %59, %60 in 1 : vector<4x17xf32>, vector<4x239xf32> -> vector<4x256xf32>
    %62 = arith.andi %28, %32 : vector<1x256xi1>
    %cst_23 = arith.constant 0.000000e+00 : f32
    %63 = vector.broadcast %cst_23 : f32 to vector<4x256xf32>
    %64 = vector.shape_cast %62 : vector<1x256xi1> to vector<1x256xi1>
    %65 = vector.broadcast %64 : vector<1x256xi1> to vector<4x256xi1>
    %66 = arith.select %65, %61, %63 : vector<4x256xi1>, vector<4x256xf32>
    %67 = vector.broadcast %58 : vector<4x1xf32> to vector<4x256xf32>
    %68 = arith.mulf %67, %66 : vector<4x256xf32>
    %69 = arith.addf %57, %68 : vector<4x256xf32>
    %70 = vector.broadcast %3 : vector<4x1xf32> to vector<4x256xf32>
    %71 = arith.mulf %69, %70 : vector<4x256xf32>
    %72 = vector.broadcast %4 : vector<4x1xf32> to vector<4x256xf32>
    %73 = arith.addf %71, %72 : vector<4x256xf32>
    %cst_24 = arith.constant 0.000000e+00 : f32
    %cst_25 = arith.constant 6.000000e+00 : f32
    %74 = vector.broadcast %cst_24 : f32 to vector<4x256xf32>
    %75 = arith.maximumf %74, %73 : vector<4x256xf32>
    %76 = vector.broadcast %cst_25 : f32 to vector<4x256xf32>
    %77 = arith.minimumf %76, %75 : vector<4x256xf32>
    %78 = vector.extract_strided_slice %5 {offsets = [0, 0], sizes = [8, 1], strides = [1, 1]} : vector<8x4xf32> to vector<8x1xf32>
    %79 = vector.extract_strided_slice %77 {offsets = [0, 0], sizes = [1, 256], strides = [1, 1]} : vector<4x256xf32> to vector<1x256xf32>
    %80 = vector.broadcast %78 : vector<8x1xf32> to vector<8x256xf32>
    %81 = vector.broadcast %79 : vector<1x256xf32> to vector<8x256xf32>
    %82 = arith.mulf %80, %81 : vector<8x256xf32>
    %83 = vector.extract_strided_slice %5 {offsets = [0, 1], sizes = [8, 1], strides = [1, 1]} : vector<8x4xf32> to vector<8x1xf32>
    %84 = vector.extract_strided_slice %77 {offsets = [1, 0], sizes = [1, 256], strides = [1, 1]} : vector<4x256xf32> to vector<1x256xf32>
    %85 = vector.broadcast %83 : vector<8x1xf32> to vector<8x256xf32>
    %86 = vector.broadcast %84 : vector<1x256xf32> to vector<8x256xf32>
    %87 = arith.mulf %85, %86 : vector<8x256xf32>
    %88 = arith.addf %82, %87 : vector<8x256xf32>
    %89 = vector.extract_strided_slice %5 {offsets = [0, 2], sizes = [8, 1], strides = [1, 1]} : vector<8x4xf32> to vector<8x1xf32>
    %90 = vector.extract_strided_slice %77 {offsets = [2, 0], sizes = [1, 256], strides = [1, 1]} : vector<4x256xf32> to vector<1x256xf32>
    %91 = vector.broadcast %89 : vector<8x1xf32> to vector<8x256xf32>
    %92 = vector.broadcast %90 : vector<1x256xf32> to vector<8x256xf32>
    %93 = arith.mulf %91, %92 : vector<8x256xf32>
    %94 = arith.addf %88, %93 : vector<8x256xf32>
    %95 = vector.extract_strided_slice %5 {offsets = [0, 3], sizes = [8, 1], strides = [1, 1]} : vector<8x4xf32> to vector<8x1xf32>
    %96 = vector.extract_strided_slice %77 {offsets = [3, 0], sizes = [1, 256], strides = [1, 1]} : vector<4x256xf32> to vector<1x256xf32>
    %97 = vector.broadcast %95 : vector<8x1xf32> to vector<8x256xf32>
    %98 = vector.broadcast %96 : vector<1x256xf32> to vector<8x256xf32>
    %99 = arith.mulf %97, %98 : vector<8x256xf32>
    %100 = arith.addf %94, %99 : vector<8x256xf32>
    %101 = vector.broadcast %6 : vector<8x1xf32> to vector<8x256xf32>
    %102 = arith.mulf %100, %101 : vector<8x256xf32>
    %103 = vector.broadcast %7 : vector<8x1xf32> to vector<8x256xf32>
    %104 = arith.addf %102, %103 : vector<8x256xf32>
    %cst_26 = arith.constant 0.000000e+00 : f32
    %cst_27 = arith.constant 6.000000e+00 : f32
    %105 = vector.broadcast %cst_26 : f32 to vector<8x256xf32>
    %106 = arith.maximumf %105, %104 : vector<8x256xf32>
    %107 = vector.broadcast %cst_27 : f32 to vector<8x256xf32>
    %108 = arith.minimumf %107, %106 : vector<8x256xf32>
    %c0_28 = arith.constant 0 : index
    %c0_29 = arith.constant 0 : index
    %c0_30 = arith.constant 0 : index
    %c0_31 = arith.constant 0 : index
    %109 = vector.load %arg8[%c0_28, %c0_29, %c0_30, %c0_31] : memref<1x4x8x256xf32, #tpu.memory_space<vmem>>, vector<1x1x8x256xf32>
    %110 = vector.shape_cast %109 : vector<1x1x8x256xf32> to vector<8x256xf32>
    %111 = vector.shape_cast %108 : vector<8x256xf32> to vector<1x1x8x256xf32>
    tpu.vector_store %arg8[%c0_28, %c0_29, %c0_30, %c0_31], %111 {strides = array<i32>} : memref<1x4x8x256xf32, #tpu.memory_space<vmem>>, vector<1x1x8x256xf32>,
    %112 = vector.extract_strided_slice %2 {offsets = [0, 4], sizes = [4, 1], strides = [1, 1]} : vector<4x16xf32> to vector<4x1xf32>
    %113 = vector.extract_strided_slice %1 {offsets = [0, 1], sizes = [4, 255], strides = [1, 1]} : vector<4x256xf32> to vector<4x255xf32>
    %cst_32 = arith.constant 0.000000e+00 : f32
    %114 = vector.broadcast %cst_32 : f32 to vector<4x1xf32>
    %115 = tpu.concatenate %113, %114 in 1 : vector<4x255xf32>, vector<4x1xf32> -> vector<4x256xf32>
    %cst_33 = arith.constant 0.000000e+00 : f32
    %116 = vector.broadcast %cst_33 : f32 to vector<4x256xf32>
    %117 = vector.shape_cast %30 : vector<1x256xi1> to vector<1x256xi1>
    %118 = vector.broadcast %117 : vector<1x256xi1> to vector<4x256xi1>
    %119 = arith.select %118, %115, %116 : vector<4x256xi1>, vector<4x256xf32>
    %120 = vector.broadcast %112 : vector<4x1xf32> to vector<4x256xf32>
    %121 = arith.mulf %120, %119 : vector<4x256xf32>
    %122 = vector.extract_strided_slice %2 {offsets = [0, 6], sizes = [4, 1], strides = [1, 1]} : vector<4x16xf32> to vector<4x1xf32>
    %123 = vector.broadcast %122 : vector<4x1xf32> to vector<4x256xf32>
    %124 = arith.mulf %123, %1 : vector<4x256xf32>
    %125 = arith.addf %121, %124 : vector<4x256xf32>
    %126 = vector.extract_strided_slice %2 {offsets = [0, 12], sizes = [4, 1], strides = [1, 1]} : vector<4x16xf32> to vector<4x1xf32>
    %cst_34 = arith.constant 0.000000e+00 : f32
    %127 = vector.broadcast %cst_34 : f32 to vector<4x15xf32>
    %128 = vector.extract_strided_slice %1 {offsets = [0, 0], sizes = [4, 241], strides = [1, 1]} : vector<4x256xf32> to vector<4x241xf32>
    %129 = tpu.concatenate %127, %128 in 1 : vector<4x15xf32>, vector<4x241xf32> -> vector<4x256xf32>
    %130 = arith.andi %28, %30 : vector<1x256xi1>
    %cst_35 = arith.constant 0.000000e+00 : f32
    %131 = vector.broadcast %cst_35 : f32 to vector<4x256xf32>
    %132 = vector.shape_cast %130 : vector<1x256xi1> to vector<1x256xi1>
    %133 = vector.broadcast %132 : vector<1x256xi1> to vector<4x256xi1>
    %134 = arith.select %133, %129, %131 : vector<4x256xi1>, vector<4x256xf32>
    %135 = vector.broadcast %126 : vector<4x1xf32> to vector<4x256xf32>
    %136 = arith.mulf %135, %134 : vector<4x256xf32>
    %137 = arith.addf %125, %136 : vector<4x256xf32>
    %138 = vector.extract_strided_slice %2 {offsets = [0, 14], sizes = [4, 1], strides = [1, 1]} : vector<4x16xf32> to vector<4x1xf32>
    %139 = vector.broadcast %138 : vector<4x1xf32> to vector<4x256xf32>
    %140 = arith.mulf %139, %54 : vector<4x256xf32>
    %141 = arith.addf %137, %140 : vector<4x256xf32>
    %142 = vector.broadcast %3 : vector<4x1xf32> to vector<4x256xf32>
    %143 = arith.mulf %141, %142 : vector<4x256xf32>
    %144 = vector.broadcast %4 : vector<4x1xf32> to vector<4x256xf32>
    %145 = arith.addf %143, %144 : vector<4x256xf32>
    %cst_36 = arith.constant 0.000000e+00 : f32
    %cst_37 = arith.constant 6.000000e+00 : f32
    %146 = vector.broadcast %cst_36 : f32 to vector<4x256xf32>
    %147 = arith.maximumf %146, %145 : vector<4x256xf32>
    %148 = vector.broadcast %cst_37 : f32 to vector<4x256xf32>
    %149 = arith.minimumf %148, %147 : vector<4x256xf32>
    %150 = vector.extract_strided_slice %5 {offsets = [0, 0], sizes = [8, 1], strides = [1, 1]} : vector<8x4xf32> to vector<8x1xf32>
    %151 = vector.extract_strided_slice %149 {offsets = [0, 0], sizes = [1, 256], strides = [1, 1]} : vector<4x256xf32> to vector<1x256xf32>
    %152 = vector.broadcast %150 : vector<8x1xf32> to vector<8x256xf32>
    %153 = vector.broadcast %151 : vector<1x256xf32> to vector<8x256xf32>
    %154 = arith.mulf %152, %153 : vector<8x256xf32>
    %155 = vector.extract_strided_slice %5 {offsets = [0, 1], sizes = [8, 1], strides = [1, 1]} : vector<8x4xf32> to vector<8x1xf32>
    %156 = vector.extract_strided_slice %149 {offsets = [1, 0], sizes = [1, 256], strides = [1, 1]} : vector<4x256xf32> to vector<1x256xf32>
    %157 = vector.broadcast %155 : vector<8x1xf32> to vector<8x256xf32>
    %158 = vector.broadcast %156 : vector<1x256xf32> to vector<8x256xf32>
    %159 = arith.mulf %157, %158 : vector<8x256xf32>
    %160 = arith.addf %154, %159 : vector<8x256xf32>
    %161 = vector.extract_strided_slice %5 {offsets = [0, 2], sizes = [8, 1], strides = [1, 1]} : vector<8x4xf32> to vector<8x1xf32>
    %162 = vector.extract_strided_slice %149 {offsets = [2, 0], sizes = [1, 256], strides = [1, 1]} : vector<4x256xf32> to vector<1x256xf32>
    %163 = vector.broadcast %161 : vector<8x1xf32> to vector<8x256xf32>
    %164 = vector.broadcast %162 : vector<1x256xf32> to vector<8x256xf32>
    %165 = arith.mulf %163, %164 : vector<8x256xf32>
    %166 = arith.addf %160, %165 : vector<8x256xf32>
    %167 = vector.extract_strided_slice %5 {offsets = [0, 3], sizes = [8, 1], strides = [1, 1]} : vector<8x4xf32> to vector<8x1xf32>
    %168 = vector.extract_strided_slice %149 {offsets = [3, 0], sizes = [1, 256], strides = [1, 1]} : vector<4x256xf32> to vector<1x256xf32>
    %169 = vector.broadcast %167 : vector<8x1xf32> to vector<8x256xf32>
    %170 = vector.broadcast %168 : vector<1x256xf32> to vector<8x256xf32>
    %171 = arith.mulf %169, %170 : vector<8x256xf32>
    %172 = arith.addf %166, %171 : vector<8x256xf32>
    %173 = vector.broadcast %6 : vector<8x1xf32> to vector<8x256xf32>
    %174 = arith.mulf %172, %173 : vector<8x256xf32>
    %175 = vector.broadcast %7 : vector<8x1xf32> to vector<8x256xf32>
    %176 = arith.addf %174, %175 : vector<8x256xf32>
    %cst_38 = arith.constant 0.000000e+00 : f32
    %cst_39 = arith.constant 6.000000e+00 : f32
    %177 = vector.broadcast %cst_38 : f32 to vector<8x256xf32>
    %178 = arith.maximumf %177, %176 : vector<8x256xf32>
    %179 = vector.broadcast %cst_39 : f32 to vector<8x256xf32>
    %180 = arith.minimumf %179, %178 : vector<8x256xf32>
    %c0_40 = arith.constant 0 : index
    %c1 = arith.constant 1 : index
    %c0_41 = arith.constant 0 : index
    %c0_42 = arith.constant 0 : index
    %181 = vector.load %arg8[%c0_40, %c1, %c0_41, %c0_42] : memref<1x4x8x256xf32, #tpu.memory_space<vmem>>, vector<1x1x8x256xf32>
    %182 = vector.shape_cast %181 : vector<1x1x8x256xf32> to vector<8x256xf32>
    %183 = vector.shape_cast %180 : vector<8x256xf32> to vector<1x1x8x256xf32>
    tpu.vector_store %arg8[%c0_40, %c1, %c0_41, %c0_42], %183 {strides = array<i32>} : memref<1x4x8x256xf32, #tpu.memory_space<vmem>>, vector<1x1x8x256xf32>,
    %184 = vector.extract_strided_slice %2 {offsets = [0, 1], sizes = [4, 1], strides = [1, 1]} : vector<4x16xf32> to vector<4x1xf32>
    %185 = vector.extract_strided_slice %1 {offsets = [0, 16], sizes = [4, 240], strides = [1, 1]} : vector<4x256xf32> to vector<4x240xf32>
    %cst_43 = arith.constant 0.000000e+00 : f32
    %186 = vector.broadcast %cst_43 : f32 to vector<4x16xf32>
    %187 = tpu.concatenate %185, %186 in 1 : vector<4x240xf32>, vector<4x16xf32> -> vector<4x256xf32>
    %cst_44 = arith.constant 0.000000e+00 : f32
    %188 = vector.broadcast %cst_44 : f32 to vector<4x256xf32>
    %189 = vector.shape_cast %26 : vector<1x256xi1> to vector<1x256xi1>
    %190 = vector.broadcast %189 : vector<1x256xi1> to vector<4x256xi1>
    %191 = arith.select %190, %187, %188 : vector<4x256xi1>, vector<4x256xf32>
    %192 = vector.broadcast %184 : vector<4x1xf32> to vector<4x256xf32>
    %193 = arith.mulf %192, %191 : vector<4x256xf32>
    %194 = vector.extract_strided_slice %2 {offsets = [0, 3], sizes = [4, 1], strides = [1, 1]} : vector<4x16xf32> to vector<4x1xf32>
    %195 = vector.extract_strided_slice %1 {offsets = [0, 15], sizes = [4, 241], strides = [1, 1]} : vector<4x256xf32> to vector<4x241xf32>
    %cst_45 = arith.constant 0.000000e+00 : f32
    %196 = vector.broadcast %cst_45 : f32 to vector<4x15xf32>
    %197 = tpu.concatenate %195, %196 in 1 : vector<4x241xf32>, vector<4x15xf32> -> vector<4x256xf32>
    %198 = arith.andi %26, %32 : vector<1x256xi1>
    %cst_46 = arith.constant 0.000000e+00 : f32
    %199 = vector.broadcast %cst_46 : f32 to vector<4x256xf32>
    %200 = vector.shape_cast %198 : vector<1x256xi1> to vector<1x256xi1>
    %201 = vector.broadcast %200 : vector<1x256xi1> to vector<4x256xi1>
    %202 = arith.select %201, %197, %199 : vector<4x256xi1>, vector<4x256xf32>
    %203 = vector.broadcast %194 : vector<4x1xf32> to vector<4x256xf32>
    %204 = arith.mulf %203, %202 : vector<4x256xf32>
    %205 = arith.addf %193, %204 : vector<4x256xf32>
    %206 = vector.extract_strided_slice %2 {offsets = [0, 9], sizes = [4, 1], strides = [1, 1]} : vector<4x16xf32> to vector<4x1xf32>
    %207 = vector.broadcast %206 : vector<4x1xf32> to vector<4x256xf32>
    %208 = arith.mulf %207, %1 : vector<4x256xf32>
    %209 = arith.addf %205, %208 : vector<4x256xf32>
    %210 = vector.extract_strided_slice %2 {offsets = [0, 11], sizes = [4, 1], strides = [1, 1]} : vector<4x16xf32> to vector<4x1xf32>
    %211 = vector.broadcast %210 : vector<4x1xf32> to vector<4x256xf32>
    %212 = arith.mulf %211, %43 : vector<4x256xf32>
    %213 = arith.addf %209, %212 : vector<4x256xf32>
    %214 = vector.broadcast %3 : vector<4x1xf32> to vector<4x256xf32>
    %215 = arith.mulf %213, %214 : vector<4x256xf32>
    %216 = vector.broadcast %4 : vector<4x1xf32> to vector<4x256xf32>
    %217 = arith.addf %215, %216 : vector<4x256xf32>
    %cst_47 = arith.constant 0.000000e+00 : f32
    %cst_48 = arith.constant 6.000000e+00 : f32
    %218 = vector.broadcast %cst_47 : f32 to vector<4x256xf32>
    %219 = arith.maximumf %218, %217 : vector<4x256xf32>
    %220 = vector.broadcast %cst_48 : f32 to vector<4x256xf32>
    %221 = arith.minimumf %220, %219 : vector<4x256xf32>
    %222 = vector.extract_strided_slice %5 {offsets = [0, 0], sizes = [8, 1], strides = [1, 1]} : vector<8x4xf32> to vector<8x1xf32>
    %223 = vector.extract_strided_slice %221 {offsets = [0, 0], sizes = [1, 256], strides = [1, 1]} : vector<4x256xf32> to vector<1x256xf32>
    %224 = vector.broadcast %222 : vector<8x1xf32> to vector<8x256xf32>
    %225 = vector.broadcast %223 : vector<1x256xf32> to vector<8x256xf32>
    %226 = arith.mulf %224, %225 : vector<8x256xf32>
    %227 = vector.extract_strided_slice %5 {offsets = [0, 1], sizes = [8, 1], strides = [1, 1]} : vector<8x4xf32> to vector<8x1xf32>
    %228 = vector.extract_strided_slice %221 {offsets = [1, 0], sizes = [1, 256], strides = [1, 1]} : vector<4x256xf32> to vector<1x256xf32>
    %229 = vector.broadcast %227 : vector<8x1xf32> to vector<8x256xf32>
    %230 = vector.broadcast %228 : vector<1x256xf32> to vector<8x256xf32>
    %231 = arith.mulf %229, %230 : vector<8x256xf32>
    %232 = arith.addf %226, %231 : vector<8x256xf32>
    %233 = vector.extract_strided_slice %5 {offsets = [0, 2], sizes = [8, 1], strides = [1, 1]} : vector<8x4xf32> to vector<8x1xf32>
    %234 = vector.extract_strided_slice %221 {offsets = [2, 0], sizes = [1, 256], strides = [1, 1]} : vector<4x256xf32> to vector<1x256xf32>
    %235 = vector.broadcast %233 : vector<8x1xf32> to vector<8x256xf32>
    %236 = vector.broadcast %234 : vector<1x256xf32> to vector<8x256xf32>
    %237 = arith.mulf %235, %236 : vector<8x256xf32>
    %238 = arith.addf %232, %237 : vector<8x256xf32>
    %239 = vector.extract_strided_slice %5 {offsets = [0, 3], sizes = [8, 1], strides = [1, 1]} : vector<8x4xf32> to vector<8x1xf32>
    %240 = vector.extract_strided_slice %221 {offsets = [3, 0], sizes = [1, 256], strides = [1, 1]} : vector<4x256xf32> to vector<1x256xf32>
    %241 = vector.broadcast %239 : vector<8x1xf32> to vector<8x256xf32>
    %242 = vector.broadcast %240 : vector<1x256xf32> to vector<8x256xf32>
    %243 = arith.mulf %241, %242 : vector<8x256xf32>
    %244 = arith.addf %238, %243 : vector<8x256xf32>
    %245 = vector.broadcast %6 : vector<8x1xf32> to vector<8x256xf32>
    %246 = arith.mulf %244, %245 : vector<8x256xf32>
    %247 = vector.broadcast %7 : vector<8x1xf32> to vector<8x256xf32>
    %248 = arith.addf %246, %247 : vector<8x256xf32>
    %cst_49 = arith.constant 0.000000e+00 : f32
    %cst_50 = arith.constant 6.000000e+00 : f32
    %249 = vector.broadcast %cst_49 : f32 to vector<8x256xf32>
    %250 = arith.maximumf %249, %248 : vector<8x256xf32>
    %251 = vector.broadcast %cst_50 : f32 to vector<8x256xf32>
    %252 = arith.minimumf %251, %250 : vector<8x256xf32>
    %c0_51 = arith.constant 0 : index
    %c2 = arith.constant 2 : index
    %c0_52 = arith.constant 0 : index
    %c0_53 = arith.constant 0 : index
    %253 = vector.load %arg8[%c0_51, %c2, %c0_52, %c0_53] : memref<1x4x8x256xf32, #tpu.memory_space<vmem>>, vector<1x1x8x256xf32>
    %254 = vector.shape_cast %253 : vector<1x1x8x256xf32> to vector<8x256xf32>
    %255 = vector.shape_cast %252 : vector<8x256xf32> to vector<1x1x8x256xf32>
    tpu.vector_store %arg8[%c0_51, %c2, %c0_52, %c0_53], %255 {strides = array<i32>} : memref<1x4x8x256xf32, #tpu.memory_space<vmem>>, vector<1x1x8x256xf32>,
    %256 = vector.extract_strided_slice %2 {offsets = [0, 0], sizes = [4, 1], strides = [1, 1]} : vector<4x16xf32> to vector<4x1xf32>
    %257 = vector.extract_strided_slice %1 {offsets = [0, 17], sizes = [4, 239], strides = [1, 1]} : vector<4x256xf32> to vector<4x239xf32>
    %cst_54 = arith.constant 0.000000e+00 : f32
    %258 = vector.broadcast %cst_54 : f32 to vector<4x17xf32>
    %259 = tpu.concatenate %257, %258 in 1 : vector<4x239xf32>, vector<4x17xf32> -> vector<4x256xf32>
    %260 = arith.andi %26, %30 : vector<1x256xi1>
    %cst_55 = arith.constant 0.000000e+00 : f32
    %261 = vector.broadcast %cst_55 : f32 to vector<4x256xf32>
    %262 = vector.shape_cast %260 : vector<1x256xi1> to vector<1x256xi1>
    %263 = vector.broadcast %262 : vector<1x256xi1> to vector<4x256xi1>
    %264 = arith.select %263, %259, %261 : vector<4x256xi1>, vector<4x256xf32>
    %265 = vector.broadcast %256 : vector<4x1xf32> to vector<4x256xf32>
    %266 = arith.mulf %265, %264 : vector<4x256xf32>
    %267 = vector.extract_strided_slice %2 {offsets = [0, 2], sizes = [4, 1], strides = [1, 1]} : vector<4x16xf32> to vector<4x1xf32>
    %268 = vector.broadcast %267 : vector<4x1xf32> to vector<4x256xf32>
    %269 = arith.mulf %268, %191 : vector<4x256xf32>
    %270 = arith.addf %266, %269 : vector<4x256xf32>
    %271 = vector.extract_strided_slice %2 {offsets = [0, 8], sizes = [4, 1], strides = [1, 1]} : vector<4x16xf32> to vector<4x1xf32>
    %272 = vector.broadcast %271 : vector<4x1xf32> to vector<4x256xf32>
    %273 = arith.mulf %272, %119 : vector<4x256xf32>
    %274 = arith.addf %270, %273 : vector<4x256xf32>
    %275 = vector.extract_strided_slice %2 {offsets = [0, 10], sizes = [4, 1], strides = [1, 1]} : vector<4x16xf32> to vector<4x1xf32>
    %276 = vector.broadcast %275 : vector<4x1xf32> to vector<4x256xf32>
    %277 = arith.mulf %276, %1 : vector<4x256xf32>
    %278 = arith.addf %274, %277 : vector<4x256xf32>
    %279 = vector.broadcast %3 : vector<4x1xf32> to vector<4x256xf32>
    %280 = arith.mulf %278, %279 : vector<4x256xf32>
    %281 = vector.broadcast %4 : vector<4x1xf32> to vector<4x256xf32>
    %282 = arith.addf %280, %281 : vector<4x256xf32>
    %cst_56 = arith.constant 0.000000e+00 : f32
    %cst_57 = arith.constant 6.000000e+00 : f32
    %283 = vector.broadcast %cst_56 : f32 to vector<4x256xf32>
    %284 = arith.maximumf %283, %282 : vector<4x256xf32>
    %285 = vector.broadcast %cst_57 : f32 to vector<4x256xf32>
    %286 = arith.minimumf %285, %284 : vector<4x256xf32>
    %287 = vector.extract_strided_slice %5 {offsets = [0, 0], sizes = [8, 1], strides = [1, 1]} : vector<8x4xf32> to vector<8x1xf32>
    %288 = vector.extract_strided_slice %286 {offsets = [0, 0], sizes = [1, 256], strides = [1, 1]} : vector<4x256xf32> to vector<1x256xf32>
    %289 = vector.broadcast %287 : vector<8x1xf32> to vector<8x256xf32>
    %290 = vector.broadcast %288 : vector<1x256xf32> to vector<8x256xf32>
    %291 = arith.mulf %289, %290 : vector<8x256xf32>
    %292 = vector.extract_strided_slice %5 {offsets = [0, 1], sizes = [8, 1], strides = [1, 1]} : vector<8x4xf32> to vector<8x1xf32>
    %293 = vector.extract_strided_slice %286 {offsets = [1, 0], sizes = [1, 256], strides = [1, 1]} : vector<4x256xf32> to vector<1x256xf32>
    %294 = vector.broadcast %292 : vector<8x1xf32> to vector<8x256xf32>
    %295 = vector.broadcast %293 : vector<1x256xf32> to vector<8x256xf32>
    %296 = arith.mulf %294, %295 : vector<8x256xf32>
    %297 = arith.addf %291, %296 : vector<8x256xf32>
    %298 = vector.extract_strided_slice %5 {offsets = [0, 2], sizes = [8, 1], strides = [1, 1]} : vector<8x4xf32> to vector<8x1xf32>
    %299 = vector.extract_strided_slice %286 {offsets = [2, 0], sizes = [1, 256], strides = [1, 1]} : vector<4x256xf32> to vector<1x256xf32>
    %300 = vector.broadcast %298 : vector<8x1xf32> to vector<8x256xf32>
    %301 = vector.broadcast %299 : vector<1x256xf32> to vector<8x256xf32>
    %302 = arith.mulf %300, %301 : vector<8x256xf32>
    %303 = arith.addf %297, %302 : vector<8x256xf32>
    %304 = vector.extract_strided_slice %5 {offsets = [0, 3], sizes = [8, 1], strides = [1, 1]} : vector<8x4xf32> to vector<8x1xf32>
    %305 = vector.extract_strided_slice %286 {offsets = [3, 0], sizes = [1, 256], strides = [1, 1]} : vector<4x256xf32> to vector<1x256xf32>
    %306 = vector.broadcast %304 : vector<8x1xf32> to vector<8x256xf32>
    %307 = vector.broadcast %305 : vector<1x256xf32> to vector<8x256xf32>
    %308 = arith.mulf %306, %307 : vector<8x256xf32>
    %309 = arith.addf %303, %308 : vector<8x256xf32>
    %310 = vector.broadcast %6 : vector<8x1xf32> to vector<8x256xf32>
    %311 = arith.mulf %309, %310 : vector<8x256xf32>
    %312 = vector.broadcast %7 : vector<8x1xf32> to vector<8x256xf32>
    %313 = arith.addf %311, %312 : vector<8x256xf32>
    %cst_58 = arith.constant 0.000000e+00 : f32
    %cst_59 = arith.constant 6.000000e+00 : f32
    %314 = vector.broadcast %cst_58 : f32 to vector<8x256xf32>
    %315 = arith.maximumf %314, %313 : vector<8x256xf32>
    %316 = vector.broadcast %cst_59 : f32 to vector<8x256xf32>
    %317 = arith.minimumf %316, %315 : vector<8x256xf32>
    %c0_60 = arith.constant 0 : index
    %c3 = arith.constant 3 : index
    %c0_61 = arith.constant 0 : index
    %c0_62 = arith.constant 0 : index
    %318 = vector.load %arg8[%c0_60, %c3, %c0_61, %c0_62] : memref<1x4x8x256xf32, #tpu.memory_space<vmem>>, vector<1x1x8x256xf32>
    %319 = vector.shape_cast %318 : vector<1x1x8x256xf32> to vector<8x256xf32>
    %320 = vector.shape_cast %317 : vector<8x256xf32> to vector<1x1x8x256xf32>
    tpu.vector_store %arg8[%c0_60, %c3, %c0_61, %c0_62], %320 {strides = array<i32>} : memref<1x4x8x256xf32, #tpu.memory_space<vmem>>, vector<1x1x8x256xf32>,
    return
  }
  func.func @transform_0(%arg0: i32) -> (i32, i32, i32) {
    %c0_i32 = arith.constant 0 : i32
    %c0_i32_0 = arith.constant 0 : i32
    %c0_i32_1 = arith.constant 0 : i32
    return %arg0, %c0_i32, %c0_i32_0 : i32, i32, i32
  }
  func.func @transform_1(%arg0: i32) -> (i32, i32) {
    %c0_i32 = arith.constant 0 : i32
    %c0_i32_0 = arith.constant 0 : i32
    %c0_i32_1 = arith.constant 0 : i32
    return %c0_i32, %c0_i32_0 : i32, i32
  }
  func.func @transform_2(%arg0: i32) -> (i32, i32) {
    %c0_i32 = arith.constant 0 : i32
    %c0_i32_0 = arith.constant 0 : i32
    %c0_i32_1 = arith.constant 0 : i32
    return %c0_i32, %c0_i32_0 : i32, i32
  }
  func.func @transform_3(%arg0: i32) -> (i32, i32) {
    %c0_i32 = arith.constant 0 : i32
    %c0_i32_0 = arith.constant 0 : i32
    %c0_i32_1 = arith.constant 0 : i32
    return %c0_i32, %c0_i32_0 : i32, i32
  }
  func.func @transform_4(%arg0: i32) -> (i32, i32) {
    %c0_i32 = arith.constant 0 : i32
    %c0_i32_0 = arith.constant 0 : i32
    %c0_i32_1 = arith.constant 0 : i32
    return %c0_i32, %c0_i32_0 : i32, i32
  }
  func.func @transform_5(%arg0: i32) -> (i32, i32) {
    %c0_i32 = arith.constant 0 : i32
    %c0_i32_0 = arith.constant 0 : i32
    %c0_i32_1 = arith.constant 0 : i32
    return %c0_i32, %c0_i32_0 : i32, i32
  }
  func.func @transform_6(%arg0: i32) -> (i32, i32) {
    %c0_i32 = arith.constant 0 : i32
    %c0_i32_0 = arith.constant 0 : i32
    %c0_i32_1 = arith.constant 0 : i32
    return %c0_i32, %c0_i32_0 : i32, i32
  }
  func.func @transform_7(%arg0: i32) -> (i32, i32, i32, i32) {
    %c0_i32 = arith.constant 0 : i32
    %c0_i32_0 = arith.constant 0 : i32
    %c0_i32_1 = arith.constant 0 : i32
    %c0_i32_2 = arith.constant 0 : i32
    return %arg0, %c0_i32, %c0_i32_0, %c0_i32_1 : i32, i32, i32, i32
  }
}

</mosaic_0001>

<bundles_post_ra>
// kernel: deconv_block.3
= control target key start
LH: loop header
LB: loop body
LE: loop exit
PB: predicated region body
PF: predicated region fallthrough
CT: control target
= control target key end

     0   :  { %s623_s9 = smov 0   ;;  %s879_s0 = inlined_call_operand.vmem [shape: f32[2,4,256], index: 0, kind: input, shape index: {}]   ;;  %s880_s1 = inlined_call_operand.vmem [shape: f32[4,16], index: 1, kind: input, shape index: {}]   ;;  %s881_s2 = inlined_call_operand.vmem [shape: f32[4,2], index: 2, kind: output, shape index: {}]  }
   0x1 LB: > { %s514_s10 = sadd.s32 4294967295, %s581_s9   ;;  %p517_p0 = scmp.ge.s32.totalorder %s581_s9, 1  ;;  %s581_s9 = sphi %s623_s9, %s12_s9  }
   0x2   : > { %p107_p1 = scmp.lt.s32.totalorder %s581_s9, 3 }
   0x4   : > { %p108_p2 = pnand %p517_p0, %p107_p1 }
   0x5   : > { %p124_p3 = scmp.lt.s32.totalorder (!%p108_p2), %s514_s10, 1  ;;  %p520_p4 = scmp.ne.s32.totalorder (!%p108_p2), %s514_s10, 0 }
   0x6   : > { %111 = sbr.rel (%p108_p2) target bundleno = 392 (0x188), region = 28 }
   0xd   : > { %s125_s11 = scalar_select %p124_p3, %s514_s10, 1 }
   0xe   : > { %132 = sbr.rel (%p520_p4) target bundleno = 21 (0x15), region = 32  ;;  %vm133_vm0 = vcmask (!%p520_p4), 11264   ;;  %v583_v0 = vmov (!%p520_p4), 0.0  }
   0xf   : > { %s523_s12 = sshll.u32 %s125_s11, 3  ;;  %134 = vst.msk [vmem:[%s881_s2] sm:$0xf] (!%p520_p4), %vm133_vm0, %v583_v0 }
  0x10   : > { %s128_s15 = scalar_lea.vmem %s879_s0, %s523_s12 }
  0x15 PF: > { %v640_v1 = vld [vmem:[%s880_s1] sm:$0xf]  ;;  %v584_v3 = vmov 5   ;;  %v585_v5 = vmov 7   ;;  %s586_s20 = smov 1   ;;  %v587_v6 = vmov 13   ;;  %v137_v20 = vlaneseq }
  0x16   : > { %v642_v2 = vld [vmem:[%s128_s15] sm:$0xff]  ;;  %557 = vset.pattern.permute.xlu0 %v584_v3  ;;  %558 = vset.pattern.permute.xlu1 %v585_v5  ;;  %s588_s21 = smov 16   ;;  %v589_v7 = vmov 3   ;;  %s590_s22 = smov 17   ;;  %v591_v8 = vmov 15   ;;  %v592_v9 = vmov 4  }
  0x17   : > { %v646_v4 = vcombine.high %v642_v2, %v642_v2  ;;  %174 = vperm.xlu0 %557, %v640_v1   ;;  %v593_v10 = vmov 0   ;;  %v594_v11 = vmov 6   ;;  %s595_s23 = smov 127   ;;  %v596_v12 = vmov 12   ;;  %s600_s24 = smov 15  }
  0x18   : > { %v597_v13 = vmov 8   ;;  %v598_v14 = vmov 1   ;;  %v599_v15 = vmov 14   ;;  %v601_v16 = vmov 10   ;;  %s603_s25 = smov 112   ;;  %s604_s26 = smov 113  }
  0x19   : > { %184 = vrot.lane.b32.xlu1 %v646_v4, %s586_s20  ;;  %v602_v17 = vmov 9   ;;  %v605_v18 = vmov 2   ;;  %v606_v19 = vmov 11   ;;  %s607_s27 = smov 111   ;;  %v680_v21 = vand.u32 127, %v137_v20 }
  0x1a   : > { %vm186_vm1 = vcmask 7168   ;;  %vm209_vm3 = vcmask 130048   ;;  %vm232_vm6 = vcmask 138240   ;;  %vm253_vm8 = vcmask 1043456  }
  0x1b   : > { %182 = vrot.lane.b32.xlu0 %v642_v2, %s586_s20  ;;  %v683_v24 = vadd.s32 128, %v680_v21  ;;  %v144_v25 = vand.u32 15, %v680_v21  ;;  %vm166_vm5 = vcmp.ge.s32.totalorder %v680_v21, 16  ;;  %vm272_vm9 = vcmask 1039360  }
  0x1c   : > { %559 = vset.pattern.permute.xlu0 %v587_v6  ;;  %vm301_vm10 = vcmask 121856   ;;  %vm369_vm13 = vcmask 924672   ;;  %vm348_vm15 = vcmask 916480  }
  0x1d   : > { %198 = vperm.xlu1 %558, %v640_v1   ;;  %v151_v27 = vand.u32 15, %v683_v24  ;;  %vm690_vm2 = vcmp.ge.s32.totalorder %v144_v25, 1  ;;  %vm758_vm11 = vcmp.lt.s32.totalorder %v144_v25, 15  ;;  %vm165_vm0 = vcmp.lt.s32.totalorder %v683_v24, 240 }
  0x1e   : > { %vm716_vm7 = vmand %vm166_vm5, %vm690_vm2 }
  0x1f   : > { %205 = vrot.lane.b32.xlu0 %v642_v2, %s588_s21  ;;  %vm697_vm4 = vcmp.ge.s32.totalorder %v151_v27, 1  ;;  %vm766_vm12 = vmand %vm166_vm5, %vm758_vm11  ;;  %vm779_vm14 = vcmp.lt.s32.totalorder %v151_v27, 15 }
  0x21   : > { %207 = vrot.lane.b32.xlu1 %v646_v4, %s588_s21 }
  0x22   : > { %565 = vset.pattern.permute.xlu1 %v589_v7 }
  0x23   : > { %221 = vperm.xlu0 %559, %v640_v1  }
  0x25   : > { %228 = vrot.lane.b32.xlu1 %v642_v2, %s590_s22 }
  0x27   : > { %560 = vset.pattern.permute.xlu0 %v591_v8 }
  0x28   : > { %246 = vperm.xlu0 %560, %v640_v1  }
  0x29   : > { %230 = vrot.lane.b32.xlu1 %v646_v4, %s590_s22 }
  0x2c   : > { %561 = vset.pattern.permute.xlu0 %v592_v9 }
  0x2d   : > { %383 = vperm.xlu1 %565, %v640_v1   ;;  %284 = vperm.xlu0 %561, %v640_v1  }
  0x31   : > { %568 = vset.pattern.permute.xlu1 %v593_v10  ;;  %562 = vset.pattern.permute.xlu0 %v594_v11 }
  0x32   : > { %438 = vperm.xlu1 %568, %v640_v1   ;;  %290 = vperm.xlu0 %562, %v640_v1  }
  0x36   : > { %268 = vrot.lane.b32.xlu1 %v642_v2, %s595_s23  ;;  %563 = vset.pattern.permute.xlu0 %v596_v12 }
  0x37   : > { %571 = vset.pattern.permute.xlu1 %v597_v13  ;;  %315 = vperm.xlu0 %563, %v640_v1  }
  0x3a   : > { %270 = vrot.lane.b32.xlu1 %v646_v4, %s595_s23 }
  0x3b   : > { %564 = vset.pattern.permute.xlu0 %v598_v14 }
  0x3c   : > { %360 = vperm.xlu0 %564, %v640_v1  }
  0x3e   : > { %452 = vperm.xlu1 %571, %v640_v1  }
  0x40   : > { %566 = vset.pattern.permute.xlu0 %v599_v15 }
  0x41   : > { %323 = vperm.xlu0 %566, %v640_v1  }
  0x42   : > { %297 = vrot.lane.b32.xlu1 %v642_v2, %s600_s24 }
  0x43   : > { %572 = vset.pattern.permute.xlu1 %v601_v16 }
  0x45   : > { %567 = vset.pattern.permute.xlu0 %v602_v17 }
  0x46   : > { %346 = vrot.lane.b32.xlu1 %v646_v4, %s603_s25  ;;  %391 = vperm.xlu0 %567, %v640_v1  }
  0x4a   : > { %367 = vrot.lane.b32.xlu1 %v646_v4, %s604_s26  ;;  %569 = vset.pattern.permute.xlu0 %v605_v18 }
  0x4b   : > { %444 = vperm.xlu0 %569, %v640_v1  }
  0x4e   : > { %460 = vperm.xlu1 %572, %v640_v1  }
  0x4f   : > { %570 = vset.pattern.permute.xlu0 %v606_v19 }
  0x50   : > { %399 = vperm.xlu0 %570, %v640_v1  }
  0x52   : > { %422 = vrot.lane.b32.xlu1 %v646_v4, %s607_s27 }
  0x54   : > { %299 = vrot.lane.b32.xlu0 %v646_v4, %s600_s24 }
  0x55   : > { %573 = vset.pattern.permute.xlu0 %v601_v16 }
  0x58   : > { %365 = vrot.lane.b32.xlu0 %v642_v2, %s604_s26 }
  0x5c   : > { %344 = vrot.lane.b32.xlu0 %v642_v2, %s603_s25 }
  0x60   : > { %420 = vrot.lane.b32.xlu0 %v642_v2, %s607_s27 }
  0x8b   : > { %v185_v22 = vpop.permute.xlu1 %184 }
  0x96   : > { %v175_v23 = vpop.permute.xlu0 %174 }
  0x97   : > { %v180_v43 = vmul.f32 %v175_v23, %v642_v2  ;;  %v181_v49 = vmul.f32 %v646_v4, %v175_v23 }
  0x9a   : > { %v183_v26 = vpop.permute.xlu0 %182 }
  0x9b   : > { %v190_v29 = vsel %vm186_vm1, 0.0, %v183_v26  ;;  %v187_v31 = vsel %vm186_vm1, %v183_v26, %v185_v22 }
  0x9c   : > { %v199_v28 = vpop.permute.xlu1 %198  ;;  %v703_v34 = vsel %vm690_vm2, %v190_v29, 0.0  ;;  %v709_v37 = vsel %vm697_vm4, %v187_v31, 0.0 }
  0x9d   : > { %v201_v38 = vmul.f32 %v199_v28, %v703_v34  ;;  %v202_v44 = vmul.f32 %v199_v28, %v709_v37 }
  0x9e   : > { %v206_v33 = vpop.permute.xlu0 %205 }
  0x9f   : > { %v213_v36 = vsel %vm209_vm3, 0.0, %v206_v33  ;;  %v203_v50 = vadd.f32 %v201_v38, %v180_v43  ;;  %v204_v54 = vadd.f32 %v202_v44, %v181_v49 }
  0xa0   : > { %v208_v35 = vpop.permute.xlu1 %207  ;;  %v722_v41 = vsel %vm166_vm5, %v213_v36, 0.0  ;;  %vm424_vm5 = vcmask 908288  }
  0xa1   : > { %v729_v47 = vsel %vm209_vm3, %v206_v33, %v208_v35  ;;  %vm792_vm3 = vmand %vm165_vm0, %vm697_vm4 }
  0xa2   : > { %v222_v39 = vpop.permute.xlu0 %221 }
  0xa3   : > { %v224_v45 = vmul.f32 %v222_v39, %v722_v41  ;;  %v225_v51 = vmul.f32 %v222_v39, %v729_v47 }
  0xa4   : > { %v229_v42 = vpop.permute.xlu1 %228 }
  0xa5   : > { %v236_v46 = vsel %vm232_vm6, 0.0, %v229_v42  ;;  %v226_v55 = vadd.f32 %v224_v45, %v203_v50  ;;  %v227_v59 = vadd.f32 %v225_v51, %v204_v54 }
  0xa6   : > { %v243_v48 = vsel %vm716_vm7, %v236_v46, 0.0 }
  0xa7   : > { %v247_v52 = vpop.permute.xlu0 %246 }
  0xa8   : > { %v231_v53 = vpop.permute.xlu1 %230  ;;  %v249_v56 = vmul.f32 %v247_v52, %v243_v48 }
  0xa9   : > { %v233_v57 = vsel %vm232_vm6, %v229_v42, %v231_v53 }
  0xaa   : > { %v244_v58 = vsel %vm697_vm4, %v233_v57, 0.0  ;;  %v738_v60 = vadd.f32 %v249_v56, %v226_v55  ;;  %vm810_vm4 = vmand %vm165_vm0, %vm779_vm14 }
  0xab   : > { %v250_v61 = vmul.f32 %v247_v52, %v244_v58 }
  0xac   : > { %v740_v62 = vpop.permute.xlu1 %383  ;;  %v285_v63 = vpop.permute.xlu0 %284  ;;  %v254_v1 = vsel %vm253_vm8, %v738_v60, 0.0 }
  0xad   : > { %v742_v0 = vadd.f32 %v250_v61, %v227_v59 }
  0xaf   : > { %v255_v3 = vsel %vm253_vm8, %v742_v0, 0.0 }
  0xb0   : > { %v256_v5 = vadd.f32 %v255_v3, %v254_v1 }
  0xb1   : > { %v748_v6 = vpop.permute.xlu1 %438  ;;  %v291_v7 = vpop.permute.xlu0 %290 }
  0xb2   : > { %257 = vadd.xlane.f32.xlu1 %v256_v5  ;;  %v293_v39 = vmul.f32 %v291_v7, %v642_v2  ;;  %v294_v51 = vmul.f32 %v291_v7, %v646_v4 }
  0xb5   : > { %v269_v8 = vpop.permute.xlu1 %268 }
  0xb6   : > { %v316_v9 = vpop.permute.xlu0 %315 }
  0xb9   : > { %v271_v10 = vpop.permute.xlu1 %270 }
  0xba   : > { %v273_v17 = vsel %vm272_vm9, %v269_v8, %v271_v10  ;;  %v276_v26 = vsel %vm272_vm9, %v271_v10, 0.0 }
  0xbb   : > { %v750_v11 = vpop.permute.xlu0 %360  ;;  %v775_v25 = vsel %vm758_vm11, %v273_v17, 0.0  ;;  %v282_v35 = vsel %vm779_vm14, %v276_v26, 0.0 }
  0xbc   : > { %v287_v33 = vmul.f32 %v285_v63, %v775_v25  ;;  %v288_v43 = vmul.f32 %v285_v63, %v282_v35 }
  0xbd   : > { %v752_v12 = vpop.permute.xlu1 %452 }
  0xbe   : > { %v295_v44 = vadd.f32 %v293_v39, %v287_v33  ;;  %v296_v56 = vadd.f32 %v294_v51, %v288_v43  ;;  %v456_v30 = vmul.f32 %v752_v12, %v282_v35 }
  0xc0   : > { %v324_v13 = vpop.permute.xlu0 %323 }
  0xc1   : > { %v298_v14 = vpop.permute.xlu1 %297  ;;  %v326_v57 = vmul.f32 %v324_v13, %v722_v41  ;;  %v327_v59 = vmul.f32 %v324_v13, %v729_v47 }
  0xc2   : > { %v305_v22 = vsel %vm301_vm10, 0.0, %v298_v14 }
  0xc3   : > { %v312_v29 = vsel %vm766_vm12, %v305_v22, 0.0 }
  0xc4   : > { %v318_v32 = vmul.f32 %v316_v9, %v312_v29 }
  0xc5   : > { %v347_v15 = vpop.permute.xlu1 %346  ;;  %v754_v16 = vpop.permute.xlu0 %391 }
  0xc6   : > { %v352_v36 = vsel %vm348_vm15, %v347_v15, 0.0  ;;  %v320_v52 = vadd.f32 %v318_v32, %v295_v44  ;;  %v395_v8 = vmul.f32 %v754_v16, %v646_v4  ;;  %v394_v31 = vmul.f32 %v754_v16, %v642_v2 }
  0xc7   : > { %v358_v45 = vsel %vm165_vm0, %v352_v36, 0.0  ;;  %v261_v44 = vmul.f32 %v742_v0, %v742_v0 }
  0xc8   : > { %v364_v54 = vmul.f32 %v750_v11, %v358_v45  ;;  %v328_v7 = vadd.f32 %v326_v57, %v320_v52 }
  0xc9   : > { %v368_v19 = vpop.permute.xlu1 %367 }
  0xca   : > { %v771_v23 = vpop.permute.xlu0 %444  ;;  %v373_v27 = vsel %vm369_vm13, %v368_v19, 0.0  ;;  %v330_v22 = vsel %vm253_vm8, %v328_v7, 0.0 }
  0xcb   : > { %v381_v40 = vsel %vm792_vm3, %v373_v27, 0.0  ;;  %v448_v10 = vmul.f32 %v771_v23, %v358_v45 }
  0xcc   : > { %v387_v49 = vmul.f32 %v740_v62, %v381_v40 }
  0xcd   : > { %v784_v21 = vpop.permute.xlu1 %460 }
  0xce   : > { %v389_v61 = vadd.f32 %v387_v49, %v364_v54  ;;  %v336_v54 = vmul.f32 %v328_v7, %v328_v7 }
  0xcf   : > { %v400_v38 = vpop.permute.xlu0 %399 }
  0xd0   : > { %v403_v47 = vmul.f32 %v400_v38, %v709_v37  ;;  %v338_v57 = vsel %vm253_vm8, %v336_v54, 0.0 }
  0xd1   : > { %v423_v42 = vpop.permute.xlu1 %422 }
  0xd2   : > { %v428_v48 = vsel %vm424_vm5, %v423_v42, 0.0 }
  0xd3   : > { %v300_v50 = vpop.permute.xlu0 %299  ;;  %v436_v55 = vsel %vm810_vm4, %v428_v48, 0.0 }
  0xd4   : > { %v302_v53 = vsel %vm301_vm10, %v298_v14, %v300_v50  ;;  %v442_v1 = vmul.f32 %v748_v6, %v436_v55 }
  0xd5   : > { %v313_v24 = vsel %vm779_vm14, %v302_v53, 0.0 }
  0xd6   : > { %v319_v58 = vmul.f32 %v316_v9, %v313_v24  ;;  %v397_v9 = vadd.f32 %v395_v8, %v389_v61  ;;  %v450_v17 = vadd.f32 %v448_v10, %v442_v1 }
  0xd7   : > { %v366_v63 = vpop.permute.xlu0 %365 }
  0xd8   : > { %v321_v3 = vadd.f32 %v319_v58, %v296_v56  ;;  %v370_v5 = vsel %vm369_vm13, %v366_v63, %v368_v19  ;;  %v405_v27 = vadd.f32 %v403_v47, %v397_v9  ;;  %v458_v36 = vadd.f32 %v456_v30, %v450_v17 }
  0xd9   : > { %v380_v14 = vsel %vm690_vm2, %v370_v5, 0.0  ;;  %vm484_vm2 = vcmask 11264  }
  0xda   : > { %v329_v41 = vadd.f32 %v327_v59, %v321_v3  ;;  %v386_v26 = vmul.f32 %v740_v62, %v380_v14  ;;  %v402_v62 = vmul.f32 %v400_v38, %v703_v34  ;;  %v413_v43 = vmul.f32 %v405_v27, %v405_v27 }
  0xdb   : > { %v345_v13 = vpop.permute.xlu0 %344  ;;  %v407_v18 = vsel %vm253_vm8, %v405_v27, 0.0 }
  0xdc   : > { %v349_v20 = vsel %vm348_vm15, %v345_v13, %v347_v15  ;;  %v331_v19 = vsel %vm253_vm8, %v329_v41, 0.0  ;;  %v464_v15 = vmul.f32 %v784_v21, %v646_v4  ;;  %v455_v4 = vmul.f32 %v752_v12, %v775_v25 }
  0xdd   : > { %v363_v28 = vmul.f32 %v750_v11, %v349_v20  ;;  %v332_v29 = vadd.f32 %v331_v19, %v330_v22  ;;  %v447_v35 = vmul.f32 %v771_v23, %v349_v20  ;;  %v260_v23 = vmul.f32 %v738_v60, %v738_v60  ;;  %v481_v22 = vld [vmem:[%s881_s2] sm:$0xf] }
  0xde   : > { %v415_v49 = vsel %vm253_vm8, %v413_v43, 0.0  ;;  %v263_v12 = vsel %vm253_vm8, %v261_v44, 0.0  ;;  %v337_v25 = vmul.f32 %v329_v41, %v329_v41 }
  0xdf   : > { %v388_v37 = vadd.f32 %v386_v26, %v363_v28  ;;  %v421_v33 = vpop.permute.xlu0 %420  ;;  %333 = vadd.xlane.f32.xlu1 %v332_v29  ;;  %v262_v53 = vsel %vm253_vm8, %v260_v23, 0.0 }
  0xe0   : > { %v425_v39 = vsel %vm424_vm5, %v421_v33, %v423_v42  ;;  %v466_v42 = vadd.f32 %v464_v15, %v458_v36  ;;  %v264_v60 = vadd.f32 %v263_v12, %v262_v53 }
  0xe1   : > { %v435_v11 = vsel %vm758_vm11, %v425_v39, 0.0  ;;  %v396_v32 = vadd.f32 %v394_v31, %v388_v37 }
  0xe2   : > { %v441_v16 = vmul.f32 %v748_v6, %v435_v11  ;;  %v463_v6 = vmul.f32 %v784_v21, %v642_v2  ;;  %v474_v52 = vmul.f32 %v466_v42, %v466_v42  ;;  %v339_v2 = vsel %vm253_vm8, %v337_v25, 0.0 }
  0xe3   : > { %v404_v40 = vadd.f32 %v402_v62, %v396_v32  ;;  %v340_v58 = vadd.f32 %v339_v2, %v338_v57  ;;  %v468_v61 = vsel %vm253_vm8, %v466_v42, 0.0 }
  0xe4   : > { %v449_v45 = vadd.f32 %v447_v35, %v441_v16  ;;  %v476_v24 = vsel %vm253_vm8, %v474_v52, 0.0 }
  0xe5   : > { %v406_v34 = vsel %vm253_vm8, %v404_v40, 0.0  ;;  %v412_v38 = vmul.f32 %v404_v40, %v404_v40 }
  0xe6   : > { %v457_v46 = vadd.f32 %v455_v4, %v449_v45  ;;  %v408_v48 = vadd.f32 %v407_v18, %v406_v34 }
  0xe7   : > { %v414_v0 = vsel %vm253_vm8, %v412_v38, 0.0 }
  0xe8   : > { %409 = vadd.xlane.f32.xlu0 %v408_v48  ;;  %v416_v50 = vadd.f32 %v415_v49, %v414_v0  ;;  %v465_v51 = vadd.f32 %v463_v6, %v457_v46 }
  0xea   : > { %417 = vadd.xlane.f32.xlu1 %v416_v50  ;;  %v473_v55 = vmul.f32 %v465_v51, %v465_v51  ;;  %v467_v59 = vsel %vm253_vm8, %v465_v51, 0.0 }
  0xeb   : > { %v469_v63 = vadd.f32 %v468_v61, %v467_v59 }
  0xec   : > { %265 = vadd.xlane.f32.xlu0 %v264_v60  ;;  %v475_v21 = vsel %vm253_vm8, %v473_v55, 0.0 }
  0xed   : > { %v477_v56 = vadd.f32 %v476_v24, %v475_v21 }
  0xef   : > { %478 = vadd.xlane.f32.xlu1 %v477_v56 }
  0xf0   : > { %341 = vadd.xlane.f32.xlu0 %v340_v58 }
  0xf4   : > { %470 = vadd.xlane.f32.xlu0 %v469_v63 }
 0x13f   : > { %v258_v1 = vpop.xlane.xlu1 %257 }
 0x16c   : > { %v334_v5 = vpop.xlane.xlu1 %333 }
 0x16d   : > { %v335_v14 = vadd.f32 %v334_v5, %v258_v1 }
 0x175   : > { %v410_v3 = vpop.xlane.xlu0 %409 }
 0x176   : > { %v411_v9 = vadd.f32 %v410_v3, %v335_v14 }
 0x177   : > { %v418_v8 = vpop.xlane.xlu1 %417 }
 0x179   : > { %v266_v7 = vpop.xlane.xlu0 %265 }
 0x17c   : > { %v479_v13 = vpop.xlane.xlu1 %478 }
 0x17d   : > { %v342_v10 = vpop.xlane.xlu0 %341 }
 0x17e   : > { %v343_v41 = vadd.f32 %v342_v10, %v266_v7 }
 0x180   : > { %v419_v47 = vadd.f32 %v418_v8, %v343_v41 }
 0x181   : > { %v471_v17 = vpop.xlane.xlu0 %470 }
 0x182   : > { %v480_v20 = vadd.f32 %v479_v13, %v419_v47  ;;  %v472_v19 = vadd.f32 %v471_v17, %v411_v9 }
 0x184   : > { %v482_v26 = vsel %vm186_vm1, %v472_v19, %v480_v20 }
 0x185   : > { %v483_v28 = vadd.f32 %v482_v26, %v481_v22 }
 0x187   : > { %485 = vst.msk [vmem:[%s881_s2] sm:$0xf] %vm484_vm2, %v483_v28 }
 0x188 PF: > { %s12_s9 = sadd.s32 1, %s581_s9  }
 0x189   : > { %p9_p5 = scmp.ge.s32.totalorder %s12_s9, 4  }
 0x18b   :  { %11 = sbr.rel (!%p9_p5) target bundleno = 1 (0x1), region = 58 }

// kernel: deconv_block.4
= control target key start
LH: loop header
LB: loop body
LE: loop exit
PB: predicated region body
PF: predicated region fallthrough
CT: control target
= control target key end

     0   :  { %s952_s18 = smov 0   ;;  %s1336_s0 = inlined_call_operand.vmem [shape: f32[2,4,256], index: 0, kind: input, shape index: {}]   ;;  %s1337_s1 = inlined_call_operand.vmem [shape: f32[4,16], index: 1, kind: input, shape index: {}]   ;;  %s1338_s2 = inlined_call_operand.vmem [shape: f32[4,1], index: 2, kind: input, shape index: {}]   ;;  %s1339_s3 = inlined_call_operand.vmem [shape: f32[4,1], index: 3, kind: input, shape index: {}]   ;;  %s1340_s4 = inlined_call_operand.vmem [shape: f32[8,4], index: 4, kind: input, shape index: {}]   ;;  %s1341_s5 = inlined_call_operand.vmem [shape: f32[8,2], index: 5, kind: output, shape index: {}]  }
   0x1 LB: > { %s824_s19 = sadd.s32 4294967295, %s895_s18   ;;  %p827_p0 = scmp.ge.s32.totalorder %s895_s18, 1  ;;  %s895_s18 = sphi %s952_s18, %s15_s18  }
   0x2   : > { %p182_p1 = scmp.lt.s32.totalorder %s895_s18, 3 }
   0x4   : > { %p183_p2 = pnand %p827_p0, %p182_p1 }
   0x5   : > { %p205_p3 = scmp.lt.s32.totalorder (!%p183_p2), %s824_s19, 1  ;;  %p830_p4 = scmp.ne.s32.totalorder (!%p183_p2), %s824_s19, 0 }
   0x6   : > { %186 = sbr.rel (%p183_p2) target bundleno = 424 (0x1a8), region = 40 }
   0xd   : > { %s206_s20 = scalar_select %p205_p3, %s824_s19, 1 }
   0xe   : > { %213 = sbr.rel (%p830_p4) target bundleno = 21 (0x15), region = 44  ;;  %vm214_vm0 = vcmask (!%p830_p4), 15360   ;;  %v897_v0 = vmov (!%p830_p4), 0.0  }
   0xf   : > { %s833_s21 = sshll.u32 %s206_s20, 3  ;;  %215 = vst.msk [vmem:[%s1341_s5] sm:$0xff] (!%p830_p4), %vm214_vm0, %v897_v0 }
  0x10   : > { %s209_s24 = scalar_lea.vmem %s1336_s0, %s833_s21 }
  0x15 PF: > { %v969_v1 = vld [vmem:[%s1337_s1] sm:$0xf]  ;;  %v898_v3 = vmov 5   ;;  %v899_v5 = vmov 7   ;;  %s900_s29 = smov 1   ;;  %v901_v6 = vmov 13   ;;  %v221_v35 = vlaneseq }
  0x16   : > { %v971_v2 = vld [vmem:[%s209_s24] sm:$0xff]  ;;  %867 = vset.pattern.permute.xlu0 %v898_v3  ;;  %868 = vset.pattern.permute.xlu1 %v899_v5  ;;  %s902_s30 = smov 16   ;;  %v903_v7 = vmov 0   ;;  %s904_s6 = smov 17   ;;  %v905_v8 = vmov 15   ;;  %v906_v10 = vmov 6  }
  0x17   : > { %v975_v4 = vcombine.high %v971_v2, %v971_v2  ;;  %258 = vperm.xlu0 %867, %v969_v1   ;;  %v218_v9 = vld [vmem:[%s1338_s2] sm:$0xf]  ;;  %v907_v12 = vmov 3   ;;  %v908_v14 = vmov 1   ;;  %v909_v15 = vmov 4   ;;  %s911_s13 = smov 127  }
  0x18   : > { %v219_v11 = vld [vmem:[%s1339_s3] sm:$0xf]  ;;  %v910_v16 = vmov 12   ;;  %v912_v17 = vmov 8   ;;  %s913_s14 = smov 112   ;;  %v914_v18 = vmov 14  }
  0x19   : > { %268 = vrot.lane.b32.xlu1 %v975_v4, %s900_s29  ;;  %v220_v13 = vld [vmem:[%s1340_s4] sm:$0xff]  ;;  %v915_v19 = vmov 10   ;;  %s916_s15 = smov 113   ;;  %v917_v20 = vmov 9   ;;  %v918_v21 = vmov 2   ;;  %v919_v22 = vmov 11  }
  0x1a   : > { %s920_s16 = smov 15   ;;  %s921_s17 = smov 111   ;;  %v1027_v38 = vand.u32 127, %v221_v35  ;;  %vm270_vm1 = vcmask 7168   ;;  %vm293_vm2 = vcmask 130048   ;;  %vm316_vm6 = vcmask 138240  }
  0x1b   : > { %266 = vrot.lane.b32.xlu0 %v971_v2, %s900_s29  ;;  %vm579_vm8 = vcmask 924672   ;;  %vm558_vm9 = vcmask 916480   ;;  %vm432_vm12 = vcmask 1039360   ;;  %vm461_vm15 = vcmask 121856  }
  0x1c   : > { %869 = vset.pattern.permute.xlu0 %v901_v6  ;;  %v1032_v40 = vadd.s32 128, %v1027_v38  ;;  %v228_v43 = vand.u32 15, %v1027_v38  ;;  %vm250_vm5 = vcmp.ge.s32.totalorder %v1027_v38, 16 }
  0x1d   : > { %282 = vperm.xlu1 %868, %v969_v1  }
  0x1e   : > { %v235_v44 = vand.u32 15, %v1032_v40  ;;  %vm1046_vm3 = vcmp.ge.s32.totalorder %v228_v43, 1  ;;  %vm249_vm10 = vcmp.lt.s32.totalorder %v1032_v40, 240  ;;  %vm1123_vm13 = vcmp.lt.s32.totalorder %v228_v43, 15 }
  0x1f   : > { %289 = vrot.lane.b32.xlu0 %v971_v2, %s902_s30  ;;  %vm321_vm7 = vmand %vm250_vm5, %vm1046_vm3 }
  0x20   : > { %vm1052_vm4 = vcmp.ge.s32.totalorder %v235_v44, 1  ;;  %vm1139_vm14 = vcmp.lt.s32.totalorder %v235_v44, 15  ;;  %vm1154_vm0 = vmand %vm250_vm5, %vm1123_vm13 }
  0x21   : > { %291 = vrot.lane.b32.xlu1 %v975_v4, %s902_s30  ;;  %vm585_vm11 = vmand %vm249_vm10, %vm1052_vm4 }
  0x22   : > { %871 = vset.pattern.permute.xlu1 %v903_v7 }
  0x23   : > { %305 = vperm.xlu0 %869, %v969_v1  }
  0x25   : > { %312 = vrot.lane.b32.xlu1 %v971_v2, %s904_s6 }
  0x27   : > { %870 = vset.pattern.permute.xlu0 %v905_v8 }
  0x28   : > { %330 = vperm.xlu0 %870, %v969_v1  }
  0x29   : > { %314 = vrot.lane.b32.xlu1 %v975_v4, %s904_s6 }
  0x2c   : > { %874 = vset.pattern.permute.xlu0 %v906_v10 }
  0x2d   : > { %339 = vperm.xlu1 %871, %v218_v9   ;;  %450 = vperm.xlu0 %874, %v969_v1  }
  0x31   : > { %346 = vperm.xlu1 %871, %v219_v11   ;;  %877 = vset.pattern.permute.xlu0 %v907_v12 }
  0x32   : > { %593 = vperm.xlu0 %877, %v969_v1  }
  0x35   : > { %872 = vset.pattern.permute.xlu1 %v908_v14 }
  0x36   : > { %371 = vperm.xlu1 %872, %v220_v13   ;;  %878 = vset.pattern.permute.xlu0 %v903_v7 }
  0x37   : > { %357 = vperm.xlu0 %878, %v220_v13  }
  0x3a   : > { %873 = vset.pattern.permute.xlu1 %v909_v15 }
  0x3b   : > { %444 = vperm.xlu1 %873, %v969_v1   ;;  %698 = vperm.xlu0 %878, %v969_v1  }
  0x3f   : > { %875 = vset.pattern.permute.xlu1 %v910_v16  ;;  %430 = vrot.lane.b32.xlu0 %v975_v4, %s911_s13 }
  0x40   : > { %475 = vperm.xlu1 %875, %v969_v1   ;;  %883 = vset.pattern.permute.xlu0 %v912_v17 }
  0x43   : > { %712 = vperm.xlu0 %883, %v969_v1  }
  0x44   : > { %876 = vset.pattern.permute.xlu1 %v908_v14 }
  0x45   : > { %570 = vperm.xlu1 %876, %v969_v1  }
  0x47   : > { %556 = vrot.lane.b32.xlu0 %v975_v4, %s913_s14 }
  0x48   : > { %884 = vset.pattern.permute.xlu0 %v915_v19 }
  0x49   : > { %879 = vset.pattern.permute.xlu1 %v914_v18 }
  0x4a   : > { %483 = vperm.xlu1 %879, %v969_v1  }
  0x4b   : > { %577 = vrot.lane.b32.xlu0 %v975_v4, %s916_s15 }
  0x4e   : > { %880 = vset.pattern.permute.xlu1 %v917_v20 }
  0x4f   : > { %601 = vperm.xlu1 %880, %v969_v1   ;;  %720 = vperm.xlu0 %884, %v969_v1  }
  0x53   : > { %881 = vset.pattern.permute.xlu1 %v918_v21  ;;  %885 = vset.pattern.permute.xlu0 %v918_v21 }
  0x54   : > { %704 = vperm.xlu1 %881, %v969_v1   ;;  %387 = vperm.xlu0 %885, %v220_v13  }
  0x58   : > { %428 = vrot.lane.b32.xlu1 %v971_v2, %s911_s13  ;;  %887 = vset.pattern.permute.xlu0 %v915_v19 }
  0x59   : > { %882 = vset.pattern.permute.xlu1 %v919_v22 }
  0x5c   : > { %609 = vperm.xlu1 %882, %v969_v1  }
  0x60   : > { %457 = vrot.lane.b32.xlu1 %v971_v2, %s920_s16 }
  0x61   : > { %886 = vset.pattern.permute.xlu1 %v907_v12 }
  0x64   : > { %459 = vrot.lane.b32.xlu1 %v975_v4, %s920_s16 }
  0x68   : > { %575 = vrot.lane.b32.xlu1 %v971_v2, %s916_s15 }
  0x6c   : > { %554 = vrot.lane.b32.xlu1 %v971_v2, %s913_s14 }
  0x70   : > { %680 = vrot.lane.b32.xlu1 %v971_v2, %s921_s17 }
  0x74   : > { %682 = vrot.lane.b32.xlu1 %v975_v4, %s921_s17 }
  0x78   : > { %403 = vperm.xlu1 %886, %v220_v13  }
  0x8b   : > { %v269_v24 = vpop.permute.xlu1 %268 }
  0x96   : > { %v259_v23 = vpop.permute.xlu0 %258 }
  0x97   : > { %v264_v57 = vmul.f32 %v259_v23, %v971_v2  ;;  %v265_v60 = vmul.f32 %v975_v4, %v259_v23 }
  0x9a   : > { %v267_v25 = vpop.permute.xlu0 %266 }
  0x9b   : > { %v271_v46 = vsel %vm270_vm1, %v267_v25, %v269_v24  ;;  %v274_v47 = vsel %vm270_vm1, 0.0, %v267_v25 }
  0x9c   : > { %v283_v26 = vpop.permute.xlu1 %282  ;;  %v1062_v53 = vsel %vm1046_vm3, %v274_v47, 0.0  ;;  %v280_v54 = vsel %vm1052_vm4, %v271_v46, 0.0 }
  0x9d   : > { %v285_v61 = vmul.f32 %v283_v26, %v1062_v53  ;;  %v286_v62 = vmul.f32 %v283_v26, %v280_v54 }
  0x9e   : > { %v290_v27 = vpop.permute.xlu0 %289 }
  0x9f   : > { %v297_v52 = vsel %vm293_vm2, 0.0, %v290_v27  ;;  %v287_v8 = vadd.f32 %v285_v61, %v264_v57  ;;  %v288_v9 = vadd.f32 %v286_v62, %v265_v60 }
  0xa0   : > { %v292_v28 = vpop.permute.xlu1 %291  ;;  %v1071_v58 = vsel %vm250_vm5, %v297_v52, 0.0 }
  0xa1   : > { %v1082_v0 = vsel %vm293_vm2, %v290_v27, %v292_v28  ;;  %vm684_vm2 = vcmask 908288  }
  0xa2   : > { %v306_v29 = vpop.permute.xlu0 %305 }
  0xa3   : > { %v308_v3 = vmul.f32 %v306_v29, %v1071_v58  ;;  %v309_v5 = vmul.f32 %v306_v29, %v1082_v0 }
  0xa4   : > { %v313_v30 = vpop.permute.xlu1 %312 }
  0xa5   : > { %v320_v63 = vsel %vm316_vm6, 0.0, %v313_v30  ;;  %v310_v13 = vadd.f32 %v308_v3, %v287_v8  ;;  %v311_v14 = vadd.f32 %v309_v5, %v288_v9 }
  0xa6   : > { %v327_v7 = vsel %vm321_vm7, %v320_v63, 0.0 }
  0xa7   : > { %v331_v32 = vpop.permute.xlu0 %330 }
  0xa8   : > { %v315_v31 = vpop.permute.xlu1 %314  ;;  %v333_v10 = vmul.f32 %v331_v32, %v327_v7 }
  0xa9   : > { %v317_v55 = vsel %vm316_vm6, %v313_v30, %v315_v31  ;;  %v361_v30 = vshrl.u32 %v221_v35, 7 }
  0xaa   : > { %v328_v1 = vsel %vm1052_vm4, %v317_v55, 0.0  ;;  %v335_v16 = vadd.f32 %v333_v10, %v310_v13  ;;  %vm794_vm4 = vcmask 15360  }
  0xab   : > { %v334_v11 = vmul.f32 %v331_v32, %v328_v1  ;;  %v1127_v57 = vsub.s32 0, %v361_v30  ;;  %v1144_v3 = vsub.s32 1, %v361_v30 }
  0xac   : > { %v1018_v33 = vpop.permute.xlu1 %339  ;;  %v1020_v34 = vpop.permute.xlu0 %450 }
  0xad   : > { %v336_v17 = vadd.f32 %v334_v11, %v311_v14  ;;  %v342_v22 = vmul.f32 %v1018_v33, %v335_v16  ;;  %v453_v11 = vmul.f32 %v1020_v34, %v971_v2  ;;  %v454_v13 = vmul.f32 %v1020_v34, %v975_v4 }
  0xaf   : > { %v343_v23 = vmul.f32 %v1018_v33, %v336_v17 }
  0xb0   : > { %v1022_v36 = vpop.permute.xlu1 %346 }
  0xb1   : > { %v1024_v37 = vpop.permute.xlu0 %593  ;;  %v349_v26 = vadd.f32 %v1022_v36, %v342_v22  ;;  %v350_v28 = vadd.f32 %v1022_v36, %v343_v23 }
  0xb3   : > { %v351_v32 = vmax.f32 %v349_v26, 0.0  ;;  %v352_v55 = vmax.f32 %v350_v28, 0.0 }
  0xb5   : > { %v1029_v39 = vpop.permute.xlu1 %371  ;;  %v1135_v61 = vmin.f32 %v351_v32, 6.0  ;;  %v1146_v5 = vmin.f32 %v352_v55, 6.0 }
  0xb6   : > { %v1034_v41 = vpop.permute.xlu0 %357 }
  0xb7   : > { %v363_v10 = vrot.slane %v1135_v61, %v1127_v57 }
  0xba   : > { %v1036_v42 = vpop.permute.xlu1 %444  ;;  %v1040_v45 = vpop.permute.xlu0 %698 }
  0xbe   : > { %v431_v50 = vpop.permute.xlu0 %430 }
  0xbf   : > { %v1056_v51 = vpop.permute.xlu1 %475  ;;  %v436_v62 = vsel %vm432_vm12, %v431_v50, 0.0 }
  0xc2   : > { %v1066_v56 = vpop.permute.xlu0 %712 }
  0xc4   : > { %v1073_v59 = vpop.permute.xlu1 %570 }
  0xc6   : > { %v1088_v6 = vpop.permute.xlu0 %556 }
  0xc7   : > { %v562_v20 = vsel %vm558_vm9, %v1088_v6, 0.0 }
  0xc8   : > { %v1109_v24 = vsel %vm249_vm10, %v562_v20, 0.0  ;;  %v377_v20 = vrot.slane %v1135_v61, %v1144_v3 }
  0xc9   : > { %v1090_v12 = vpop.permute.xlu1 %483  ;;  %v574_v29 = vmul.f32 %v1073_v59, %v1109_v24 }
  0xca   : > { %v1092_v15 = vpop.permute.xlu0 %577  ;;  %v486_v32 = vmul.f32 %v1090_v12, %v1071_v58  ;;  %v487_v58 = vmul.f32 %v1090_v12, %v1082_v0 }
  0xcb   : > { %v583_v18 = vsel %vm579_vm8, %v1092_v15, 0.0 }
  0xcc   : > { %v591_v21 = vsel %vm585_vm11, %v583_v18, 0.0  ;;  %v367_v18 = vrot.slane %v1146_v5, %v1127_v57 }
  0xcd   : > { %v597_v27 = vmul.f32 %v1024_v37, %v591_v21  ;;  %v381_v21 = vrot.slane %v1146_v5, %v1144_v3 }
  0xce   : > { %v1101_v19 = vpop.permute.xlu1 %601  ;;  %v721_v16 = vpop.permute.xlu0 %720  ;;  %v369_v55 = vmul.f32 %v367_v18, %v1034_v41 }
  0xcf   : > { %v605_v46 = vmul.f32 %v1101_v19, %v975_v4  ;;  %v599_v47 = vadd.f32 %v597_v27, %v574_v29  ;;  %v1181_v27 = vsub.s32 3, %v361_v30  ;;  %v368_v29 = vmul.f32 %v363_v10, %v1034_v41 }
  0xd1   : > { %v607_v63 = vadd.f32 %v605_v46, %v599_v47 }
  0xd3   : > { %v1111_v25 = vpop.permute.xlu1 %704  ;;  %v1199_v44 = vpop.permute.xlu0 %387 }
  0xd7   : > { %v429_v31 = vpop.permute.xlu1 %428 }
  0xd8   : > { %v433_v52 = vsel %vm432_vm12, %v429_v31, %v431_v50  ;;  %v1158_v50 = vsub.s32 2, %v361_v30  ;;  %v382_v30 = vmul.f32 %v377_v20, %v1029_v39 }
  0xd9   : > { %v1131_v35 = vsel %vm1123_vm13, %v433_v52, 0.0 }
  0xda   : > { %v447_v7 = vmul.f32 %v1036_v42, %v1131_v35  ;;  %v393_v31 = vrot.slane %v1135_v61, %v1158_v50  ;;  %v397_v10 = vrot.slane %v1146_v5, %v1158_v50 }
  0xdb   : > { %v1133_v60 = vpop.permute.xlu1 %609 }
  0xdc   : > { %v613_v1 = vmul.f32 %v1133_v60, %v280_v54  ;;  %v442_v54 = vsel %vm1139_vm14, %v436_v62, 0.0  ;;  %v455_v34 = vadd.f32 %v453_v11, %v447_v7  ;;  %v383_v62 = vmul.f32 %v381_v21, %v1029_v39 }
  0xdd   : > { %v448_v22 = vmul.f32 %v1036_v42, %v442_v54  ;;  %v409_v11 = vrot.slane %v1135_v61, %v1181_v27  ;;  %v1213_v12 = vmul.f32 %v1066_v56, %v442_v54  ;;  %v399_v54 = vmul.f32 %v397_v10, %v1199_v44 }
  0xde   : > { %v615_v8 = vadd.f32 %v613_v1, %v607_v63  ;;  %v385_v18 = vadd.f32 %v383_v62, %v369_v55 }
  0xdf   : > { %v458_v9 = vpop.permute.xlu1 %457  ;;  %v456_v63 = vadd.f32 %v454_v13, %v448_v22  ;;  %v413_v13 = vrot.slane %v1146_v5, %v1181_v27 }
  0xe0   : > { %v617_v38 = vmul.f32 %v615_v8, %v1018_v33  ;;  %v465_v14 = vsel %vm461_vm15, 0.0, %v458_v9 }
  0xe1   : > { %v472_v17 = vsel %vm1154_vm0, %v465_v14, 0.0 }
  0xe2   : > { %v619_v23 = vadd.f32 %v617_v38, %v1022_v36  ;;  %v478_v26 = vmul.f32 %v1056_v51, %v472_v17  ;;  %v384_v17 = vadd.f32 %v382_v30, %v368_v29 }
  0xe3   : > { %v460_v28 = vpop.permute.xlu1 %459 }
  0xe4   : > { %v621_v46 = vmax.f32 %v619_v23, 0.0  ;;  %v480_v47 = vadd.f32 %v478_v26, %v455_v34  ;;  %v462_v42 = vsel %vm461_vm15, %v458_v9, %v460_v28  ;;  %v604_v23 = vmul.f32 %v1101_v19, %v971_v2 }
  0xe5   : > { %v473_v52 = vsel %vm1139_vm14, %v462_v42, 0.0 }
  0xe6   : > { %v1194_v1 = vmin.f32 %v621_v46, 6.0  ;;  %v488_v7 = vadd.f32 %v486_v32, %v480_v47  ;;  %v479_v8 = vmul.f32 %v1056_v51, %v473_v52  ;;  %v1227_v32 = vmul.f32 %v721_v16, %v971_v2 }
  0xe7   : > { %v576_v9 = vpop.permute.xlu1 %575  ;;  %v708_v2 = vmul.f32 %v1111_v25, %v1109_v24  ;;  %v612_v24 = vmul.f32 %v1133_v60, %v1062_v53 }
  0xe8   : > { %v490_v38 = vmul.f32 %v488_v7, %v1018_v33  ;;  %v481_v14 = vadd.f32 %v479_v8, %v456_v63  ;;  %v580_v51 = vsel %vm579_vm8, %v576_v9, %v1092_v15  ;;  %v631_v0 = vrot.slane %v1194_v1, %v1127_v57 }
  0xe9   : > { %v641_v20 = vrot.slane %v1194_v1, %v1144_v3  ;;  %v590_v34 = vsel %vm1046_vm3, %v580_v51, 0.0  ;;  %v398_v15 = vmul.f32 %v393_v31, %v1199_v44  ;;  %v1233_v31 = vmul.f32 %v721_v16, %v975_v4  ;;  %vm1257_vm3 = vmand %vm249_vm10, %vm1139_vm14 }
  0xea   : > { %v492_v21 = vadd.f32 %v490_v38, %v1022_v36  ;;  %v489_v22 = vadd.f32 %v487_v58, %v481_v14  ;;  %v633_v28 = vmul.f32 %v631_v0, %v1034_v41  ;;  %v596_v19 = vmul.f32 %v1024_v37, %v590_v34 }
  0xeb   : > { %v555_v26 = vpop.permute.xlu1 %554  ;;  %v643_v29 = vmul.f32 %v641_v20, %v1029_v39  ;;  %v653_v52 = vrot.slane %v1194_v1, %v1158_v50  ;;  %v400_v62 = vadd.f32 %v398_v15, %v384_v17  ;;  %v401_v16 = vadd.f32 %v399_v54, %v385_v18 }
  0xec   : > { %v494_v46 = vmax.f32 %v492_v21, 0.0  ;;  %v491_v47 = vmul.f32 %v489_v22, %v1018_v33  ;;  %v559_v48 = vsel %vm558_vm9, %v555_v26, %v1088_v6  ;;  %v715_v6 = vmul.f32 %v1066_v56, %v1131_v35 }
  0xed   : > { %v573_v42 = vmul.f32 %v1073_v59, %v559_v48  ;;  %v645_v7 = vadd.f32 %v643_v29, %v633_v28  ;;  %v655_v10 = vmul.f32 %v653_v52, %v1199_v44  ;;  %v665_v56 = vrot.slane %v1194_v1, %v1181_v27 }
  0xee   : > { %v496_v55 = vmin.f32 %v494_v46, 6.0  ;;  %v493_v30 = vadd.f32 %v491_v47, %v1022_v36  ;;  %v707_v38 = vmul.f32 %v1111_v25, %v559_v48 }
  0xef   : > { %v598_v63 = vadd.f32 %v596_v19, %v573_v42  ;;  %v681_v4 = vpop.permute.xlu1 %680  ;;  %v657_v18 = vadd.f32 %v655_v10, %v645_v7 }
  0xf0   : > { %v495_v37 = vmax.f32 %v493_v30, 0.0  ;;  %v501_v59 = vrot.slane %v496_v55, %v1127_v57  ;;  %v511_v8 = vrot.slane %v496_v55, %v1144_v3  ;;  %v523_v58 = vrot.slane %v496_v55, %v1158_v50 }
  0xf1   : > { %v606_v9 = vadd.f32 %v604_v23, %v598_v63  ;;  %v535_v1 = vrot.slane %v496_v55, %v1181_v27 }
  0xf2   : > { %v497_v35 = vmin.f32 %v495_v37, 6.0  ;;  %v506_v51 = vmul.f32 %v501_v59, %v1034_v41  ;;  %v516_v53 = vmul.f32 %v511_v8, %v1029_v39  ;;  %v528_v17 = vmul.f32 %v523_v58, %v1199_v44 }
  0xf3   : > { %v614_v60 = vadd.f32 %v612_v24, %v606_v9  ;;  %v683_v0 = vpop.permute.xlu1 %682 }
  0xf4   : > { %v685_v25 = vsel %vm684_vm2, %v681_v4, %v683_v0  ;;  %v688_v43 = vsel %vm684_vm2, %v683_v0, 0.0  ;;  %v505_v40 = vrot.slane %v497_v35, %v1127_v57  ;;  %v515_v20 = vrot.slane %v497_v35, %v1144_v3 }
  0xf5   : > { %v616_v21 = vmul.f32 %v614_v60, %v1018_v33  ;;  %v695_v22 = vsel %vm1123_vm13, %v685_v25, 0.0  ;;  %v696_v34 = vsel %vm1257_vm3, %v688_v43, 0.0  ;;  %v518_v15 = vadd.f32 %v516_v53, %v506_v51 }
  0xf6   : > { %v701_v23 = vmul.f32 %v1040_v45, %v695_v22  ;;  %v702_v26 = vmul.f32 %v1040_v45, %v696_v34  ;;  %v507_v54 = vmul.f32 %v505_v40, %v1034_v41  ;;  %v517_v28 = vmul.f32 %v515_v20, %v1029_v39 }
  0xf7   : > { %v618_v29 = vadd.f32 %v616_v21, %v1022_v36  ;;  %v1279_v46 = vpop.permute.xlu1 %403  ;;  %v527_v47 = vrot.slane %v497_v35, %v1158_v50  ;;  %v530_v49 = vadd.f32 %v528_v17, %v518_v15  ;;  %v539_v48 = vrot.slane %v497_v35, %v1181_v27 }
  0xf8   : > { %v709_v19 = vadd.f32 %v707_v38, %v701_v23  ;;  %v710_v42 = vadd.f32 %v708_v2, %v702_v26  ;;  %v414_v45 = vmul.f32 %v409_v11, %v1279_v46  ;;  %v415_v52 = vmul.f32 %v413_v13, %v1279_v46 }
  0xf9   : > { %v620_v55 = vmax.f32 %v618_v29, 0.0  ;;  %v519_v30 = vadd.f32 %v517_v28, %v507_v54  ;;  %v529_v63 = vmul.f32 %v527_v47, %v1199_v44  ;;  %v540_v4 = vmul.f32 %v535_v1, %v1279_v46 }
  0xfa   : > { %v717_v7 = vadd.f32 %v715_v6, %v709_v19  ;;  %v718_v37 = vadd.f32 %v1213_v12, %v710_v42  ;;  %v416_v2 = vadd.f32 %v414_v45, %v400_v62  ;;  %v417_v59 = vadd.f32 %v415_v52, %v401_v16 }
  0xfb   : > { %v622_v8 = vmin.f32 %v620_v55, 6.0  ;;  %v531_v58 = vadd.f32 %v529_v63, %v519_v30  ;;  %v541_v61 = vmul.f32 %v539_v48, %v1279_v46  ;;  %v542_v11 = vadd.f32 %v540_v4, %v530_v49 }
  0xfc   : > { %v725_v24 = vadd.f32 %v1227_v32, %v717_v7  ;;  %v726_v5 = vadd.f32 %v1233_v31, %v718_v37  ;;  %v418_v13 = vadd.f32 %v417_v59, %v416_v2  ;;  %v667_v9 = vmul.f32 %v665_v56, %v1279_v46 }
  0xfd   : > { %v543_v10 = vadd.f32 %v541_v61, %v531_v58  ;;  %v548_v35 = vmul.f32 %v542_v11, %v542_v11  ;;  %v627_v6 = vrot.slane %v622_v8, %v1127_v57  ;;  %v637_v12 = vrot.slane %v622_v8, %v1144_v3 }
  0xfe   : > { %v727_v62 = vmul.f32 %v725_v24, %v1018_v33  ;;  %v728_v16 = vmul.f32 %v726_v5, %v1018_v33  ;;  %419 = vadd.xlane.f32.xlu1 %v418_v13  ;;  %v649_v38 = vrot.slane %v622_v8, %v1158_v50  ;;  %v661_v32 = vrot.slane %v622_v8, %v1181_v27 }
  0xff   : > { %v544_v14 = vadd.f32 %v543_v10, %v542_v11  ;;  %v549_v31 = vmul.f32 %v543_v10, %v543_v10  ;;  %v632_v51 = vmul.f32 %v627_v6, %v1034_v41  ;;  %v642_v56 = vmul.f32 %v637_v12, %v1029_v39 }
 0x100   : > { %v729_v53 = vadd.f32 %v727_v62, %v1022_v36  ;;  %v730_v60 = vadd.f32 %v728_v16, %v1022_v36  ;;  %v654_v33 = vmul.f32 %v649_v38, %v1199_v44  ;;  %v669_v1 = vadd.f32 %v667_v9, %v657_v18 }
 0x101   : > { %545 = vadd.xlane.f32.xlu0 %v544_v14  ;;  %v550_v0 = vadd.f32 %v549_v31, %v548_v35  ;;  %v644_v17 = vadd.f32 %v642_v56, %v632_v51  ;;  %v666_v20 = vmul.f32 %v661_v32, %v1279_v46  ;;  %v422_v23 = vmul.f32 %v416_v2, %v416_v2  ;;  %v791_v32 = vld [vmem:[%s1341_s5] sm:$0xff] }
 0x102   : > { %v731_v25 = vmax.f32 %v729_v53, 0.0  ;;  %v732_v43 = vmax.f32 %v730_v60, 0.0  ;;  %v675_v15 = vmul.f32 %v669_v1, %v669_v1  ;;  %v423_v26 = vmul.f32 %v417_v59, %v417_v59 }
 0x103   : > { %551 = vadd.xlane.f32.xlu1 %v550_v0  ;;  %v656_v40 = vadd.f32 %v654_v33, %v644_v17 }
 0x104   : > { %v733_v21 = vmin.f32 %v731_v25, 6.0  ;;  %v734_v22 = vmin.f32 %v732_v43, 6.0  ;;  %v424_v7 = vadd.f32 %v423_v26, %v422_v23 }
 0x105   : > { %v668_v34 = vadd.f32 %v666_v20, %v656_v40 }
 0x106   : > { %v738_v36 = vrot.slane %v733_v21, %v1127_v57  ;;  %v742_v54 = vrot.slane %v734_v22, %v1127_v57  ;;  %v748_v28 = vrot.slane %v733_v21, %v1144_v3  ;;  %v752_v18 = vrot.slane %v734_v22, %v1144_v3 }
 0x107   : > { %v670_v29 = vadd.f32 %v669_v1, %v668_v34  ;;  %v674_v47 = vmul.f32 %v668_v34, %v668_v34  ;;  %v760_v49 = vrot.slane %v733_v21, %v1158_v50  ;;  %v764_v48 = vrot.slane %v734_v22, %v1158_v50 }
 0x108   : > { %v743_v19 = vmul.f32 %v738_v36, %v1034_v41  ;;  %v744_v42 = vmul.f32 %v742_v54, %v1034_v41  ;;  %v753_v45 = vmul.f32 %v748_v28, %v1029_v39  ;;  %v754_v52 = vmul.f32 %v752_v18, %v1029_v39 }
 0x109   : > { %671 = vadd.xlane.f32.xlu0 %v670_v29  ;;  %v676_v57 = vadd.f32 %v675_v15, %v674_v47  ;;  %v765_v55 = vmul.f32 %v760_v49, %v1199_v44  ;;  %v772_v3 = vrot.slane %v733_v21, %v1181_v27  ;;  %v766_v4 = vmul.f32 %v764_v48, %v1199_v44 }
 0x10a   : > { %v755_v30 = vadd.f32 %v753_v45, %v743_v19  ;;  %v756_v63 = vadd.f32 %v754_v52, %v744_v42  ;;  %v776_v50 = vrot.slane %v734_v22, %v1181_v27 }
 0x10b   : > { %677 = vadd.xlane.f32.xlu1 %v676_v57  ;;  %v777_v2 = vmul.f32 %v772_v3, %v1279_v46 }
 0x10c   : > { %v767_v37 = vadd.f32 %v765_v55, %v755_v30  ;;  %v768_v41 = vadd.f32 %v766_v4, %v756_v63  ;;  %v778_v39 = vmul.f32 %v776_v50, %v1279_v46 }
 0x10d   : > { %425 = vadd.xlane.f32.xlu0 %v424_v7 }
 0x10e   : > { %v779_v59 = vadd.f32 %v777_v2, %v767_v37  ;;  %v780_v8 = vadd.f32 %v778_v39, %v768_v41 }
 0x110   : > { %v781_v58 = vadd.f32 %v780_v8, %v779_v59  ;;  %v785_v61 = vmul.f32 %v779_v59, %v779_v59  ;;  %v786_v11 = vmul.f32 %v780_v8, %v780_v8 }
 0x112   : > { %782 = vadd.xlane.f32.xlu0 %v781_v58  ;;  %v787_v24 = vadd.f32 %v786_v11, %v785_v61 }
 0x114   : > { %788 = vadd.xlane.f32.xlu1 %v787_v24 }
 0x18b   : > { %v420_v5 = vpop.xlane.xlu1 %419 }
 0x18e   : > { %v546_v44 = vpop.xlane.xlu0 %545 }
 0x18f   : > { %v547_v6 = vadd.f32 %v546_v44, %v420_v5 }
 0x190   : > { %v552_v13 = vpop.xlane.xlu1 %551 }
 0x196   : > { %v672_v27 = vpop.xlane.xlu0 %671 }
 0x197   : > { %v673_v62 = vadd.f32 %v672_v27, %v547_v6 }
 0x198   : > { %v678_v35 = vpop.xlane.xlu1 %677 }
 0x19a   : > { %v426_v9 = vpop.xlane.xlu0 %425 }
 0x19b   : > { %v553_v10 = vadd.f32 %v552_v13, %v426_v9 }
 0x19d   : > { %v679_v46 = vadd.f32 %v678_v35, %v553_v10 }
 0x19f   : > { %v783_v12 = vpop.xlane.xlu0 %782 }
 0x1a0   : > { %v784_v38 = vadd.f32 %v783_v12, %v673_v62 }
 0x1a1   : > { %v789_v16 = vpop.xlane.xlu1 %788 }
 0x1a2   : > { %v790_v14 = vadd.f32 %v789_v16, %v679_v46 }
 0x1a4   : > { %v792_v31 = vsel %vm270_vm1, %v784_v38, %v790_v14 }
 0x1a5   : > { %v793_v51 = vadd.f32 %v792_v31, %v791_v32 }
 0x1a7   : > { %795 = vst.msk [vmem:[%s1341_s5] sm:$0xff] %vm794_vm4, %v793_v51 }
 0x1a8 PF: > { %s15_s18 = sadd.s32 1, %s895_s18  }
 0x1a9   : > { %p12_p5 = scmp.ge.s32.totalorder %s15_s18, 4  }
 0x1ab   :  { %14 = sbr.rel (!%p12_p5) target bundleno = 1 (0x1), region = 70 }

// kernel: deconv_block.5
= control target key start
LH: loop header
LB: loop body
LE: loop exit
PB: predicated region body
PF: predicated region fallthrough
CT: control target
= control target key end

     0   :  { %s1071_s24 = smov 0   ;;  %s1398_s0 = inlined_call_operand.vmem [shape: f32[2,4,256], index: 0, kind: input, shape index: {}]   ;;  %s1399_s1 = inlined_call_operand.vmem [shape: f32[4,16], index: 1, kind: input, shape index: {}]   ;;  %s1400_s2 = inlined_call_operand.vmem [shape: f32[4,1], index: 2, kind: input, shape index: {}]   ;;  %s1401_s3 = inlined_call_operand.vmem [shape: f32[4,1], index: 3, kind: input, shape index: {}]   ;;  %s1402_s4 = inlined_call_operand.vmem [shape: f32[8,4], index: 4, kind: input, shape index: {}]   ;;  %s1403_s5 = inlined_call_operand.vmem [shape: f32[8,1], index: 5, kind: input, shape index: {}]   ;;  %s1404_s6 = inlined_call_operand.vmem [shape: f32[8,1], index: 6, kind: input, shape index: {}]   ;;  %s1405_s7 = inlined_call_operand.vmem [shape: f32[2,4,8,256], index: 7, kind: output, shape index: {}]  }
   0x1 LB: > { %s924_s25 = sadd.s32 4294967295, %s1005_s24   ;;  %p928_p0 = scmp.ge.s32.totalorder %s1005_s24, 1  ;;  %s1005_s24 = sphi %s1071_s24, %s17_s24  }
   0x2   : > { %p237_p1 = scmp.lt.s32.totalorder %s1005_s24, 3 }
   0x4   : > { %p238_p2 = pnand %p928_p0, %p237_p1 }
   0x5   : > { %v1082_v0 = vld [vmem:[%s1399_s1] sm:$0xf] (!%p238_p2)  ;;  %p269_p3 = scmp.lt.s32.totalorder (!%p238_p2), %s924_s25, 1  ;;  %v1007_v1 = vmov (!%p238_p2), 7   ;;  %v1008_v2 = vmov (!%p238_p2), 5   ;;  %v1009_v4 = vmov (!%p238_p2), 13   ;;  %v286_v24 = vlaneseq (!%p238_p2) }
   0x6   : > { %241 = sbr.rel (%p238_p2) target bundleno = 270 (0x10e), region = 48  ;;  %976 = vset.pattern.permute.xlu1 (!%p238_p2), %v1007_v1  ;;  %975 = vset.pattern.permute.xlu0 (!%p238_p2), %v1008_v2  ;;  %v1010_v5 = vmov (!%p238_p2), 0   ;;  %s1011_s9 = smov (!%p238_p2), 1   ;;  %v1014_v7 = vmov (!%p238_p2), 15   ;;  %v281_v8 = vld [vmem:[%s1400_s2] sm:$0xf] (!%p238_p2) }
   0x7   : > { %347 = vperm.xlu1 (!%p238_p2), %976, %v1082_v0   ;;  %323 = vperm.xlu0 (!%p238_p2), %975, %v1082_v0   ;;  %s1012_s10 = smov (!%p238_p2), 16   ;;  %s1013_s11 = smov (!%p238_p2), 17   ;;  %v1015_v9 = vmov (!%p238_p2), 6   ;;  %v1016_v10 = vmov (!%p238_p2), 9   ;;  %v1017_v11 = vmov (!%p238_p2), 4   ;;  %v1018_v12 = vmov (!%p238_p2), 11  }
   0x8   : > { %v1019_v13 = vmov (!%p238_p2), 1   ;;  %v1020_v14 = vmov (!%p238_p2), 3   ;;  %v1021_v15 = vmov (!%p238_p2), 2   ;;  %s1022_s14 = smov (!%p238_p2), 127   ;;  %s1023_s15 = smov (!%p238_p2), 113   ;;  %v1024_v16 = vmov (!%p238_p2), 12  }
   0x9   : > { %s1025_s16 = smov (!%p238_p2), 111   ;;  %v1026_v17 = vmov (!%p238_p2), 8   ;;  %s1027_s17 = smov (!%p238_p2), 112   ;;  %v1028_v18 = vmov (!%p238_p2), 14   ;;  %v283_v19 = vld [vmem:[%s1402_s4] sm:$0xff] (!%p238_p2)  ;;  %v1030_v20 = vmov (!%p238_p2), 10  }
   0xa   : > { %s1029_s18 = smov (!%p238_p2), 15   ;;  %v282_v21 = vld [vmem:[%s1401_s3] sm:$0xf] (!%p238_p2)  ;;  %v1147_v25 = vand.u32 (!%p238_p2), 127, %v286_v24  ;;  %vm335_vm0 = vcmask (!%p238_p2), 7168   ;;  %vm358_vm2 = vcmask (!%p238_p2), 130048  }
   0xb   : > { %977 = vset.pattern.permute.xlu0 (!%p238_p2), %v1009_v4  ;;  %979 = vset.pattern.permute.xlu1 (!%p238_p2), %v1010_v5  ;;  %v284_v22 = vld [vmem:[%s1403_s5] sm:$0xff] (!%p238_p2)  ;;  %vm381_vm5 = vcmask (!%p238_p2), 138240   ;;  %vm507_vm7 = vcmask (!%p238_p2), 1039360   ;;  %vm634_vm9 = vcmask (!%p238_p2), 916480   ;;  %vm655_vm12 = vcmask (!%p238_p2), 924672  }
   0xc   : > { %v285_v23 = vld [vmem:[%s1404_s6] sm:$0xff] (!%p238_p2)  ;;  %v1150_v26 = vadd.s32 (!%p238_p2), 128, %v1147_v25  ;;  %v293_v57 = vand.u32 (!%p238_p2), 15, %v1147_v25  ;;  %vm315_vm4 = vcmp.ge.s32.totalorder (!%p238_p2), %v1147_v25, 16  ;;  %vm761_vm14 = vcmask (!%p238_p2), 908288  }
   0xd   : > { %s1421_s25 = smov (!%p269_p3, %s924_s25), 1  ;;  %vm536_vm15 = vcmask 121856  }
   0xe   : > { %s941_s28 = sshll.u32 %s1421_s25, 3  ;;  %v300_v27 = vand.u32 15, %v1150_v26  ;;  %vm1190_vm3 = vcmp.ge.s32.totalorder %v293_v57, 1  ;;  %vm314_vm10 = vcmp.lt.s32.totalorder %v1150_v26, 240  ;;  %vm1231_vm11 = vcmp.lt.s32.totalorder %v293_v57, 15  ;;  %s942_s29 = sshll.u32 %s1421_s25, 6 }
   0xf   : > { %s273_s8 = scalar_lea.vmem %s1398_s0, %s941_s28  ;;  %vm386_vm6 = vmand %vm315_vm4, %vm1190_vm3 }
  0x10   : > { %v1092_v3 = vld [vmem:[%s273_s8] sm:$0xff]  ;;  %vm1153_vm1 = vcmp.ge.s32.totalorder %v300_v27, 1  ;;  %vm1215_vm8 = vcmp.lt.s32.totalorder %v300_v27, 15 }
  0x11   : > { %331 = vrot.lane.b32.xlu0 %v1092_v3, %s1011_s9  ;;  %v1098_v6 = vcombine.high %v1092_v3, %v1092_v3  ;;  %vm1241_vm13 = vmand %vm314_vm10, %vm1153_vm1 }
  0x13   : > { %333 = vrot.lane.b32.xlu1 %v1098_v6, %s1011_s9  ;;  %s278_s9 = scalar_lea.vmem %s1405_s7, %s942_s29 }
  0x15   : > { %354 = vrot.lane.b32.xlu0 %v1092_v3, %s1012_s10 }
  0x17   : > { %356 = vrot.lane.b32.xlu1 %v1098_v6, %s1012_s10 }
  0x19   : > { %370 = vperm.xlu0 %977, %v1082_v0  }
  0x1b   : > { %377 = vrot.lane.b32.xlu1 %v1092_v3, %s1013_s11 }
  0x1d   : > { %978 = vset.pattern.permute.xlu0 %v1014_v7 }
  0x1e   : > { %395 = vperm.xlu0 %978, %v1082_v0  }
  0x1f   : > { %379 = vrot.lane.b32.xlu1 %v1098_v6, %s1013_s11 }
  0x22   : > { %981 = vset.pattern.permute.xlu0 %v1015_v9 }
  0x23   : > { %525 = vperm.xlu0 %981, %v1082_v0   ;;  %404 = vperm.xlu1 %979, %v281_v8  }
  0x27   : > { %986 = vset.pattern.permute.xlu0 %v1016_v10  ;;  %980 = vset.pattern.permute.xlu1 %v1017_v11 }
  0x28   : > { %677 = vperm.xlu0 %986, %v1082_v0   ;;  %519 = vperm.xlu1 %980, %v1082_v0  }
  0x2c   : > { %989 = vset.pattern.permute.xlu0 %v1018_v12  ;;  %982 = vset.pattern.permute.xlu1 %v1019_v13 }
  0x2d   : > { %685 = vperm.xlu0 %989, %v1082_v0   ;;  %646 = vperm.xlu1 %982, %v1082_v0  }
  0x31   : > { %990 = vset.pattern.permute.xlu0 %v1010_v5  ;;  %983 = vset.pattern.permute.xlu1 %v1020_v14 }
  0x32   : > { %775 = vperm.xlu0 %990, %v1082_v0   ;;  %669 = vperm.xlu1 %983, %v1082_v0  }
  0x36   : > { %984 = vset.pattern.permute.xlu1 %v1021_v15  ;;  %505 = vrot.lane.b32.xlu0 %v1098_v6, %s1022_s14 }
  0x37   : > { %781 = vperm.xlu1 %984, %v1082_v0  }
  0x3a   : > { %651 = vrot.lane.b32.xlu0 %v1092_v3, %s1023_s15 }
  0x3b   : > { %985 = vset.pattern.permute.xlu1 %v1024_v16 }
  0x3c   : > { %550 = vperm.xlu1 %985, %v1082_v0  }
  0x3e   : > { %757 = vrot.lane.b32.xlu0 %v1092_v3, %s1025_s16 }
  0x40   : > { %987 = vset.pattern.permute.xlu1 %v1026_v17 }
  0x41   : > { %789 = vperm.xlu1 %987, %v1082_v0  }
  0x42   : > { %630 = vrot.lane.b32.xlu0 %v1092_v3, %s1027_s17 }
  0x45   : > { %988 = vset.pattern.permute.xlu1 %v1028_v18 }
  0x46   : > { %558 = vperm.xlu1 %988, %v1082_v0   ;;  %534 = vrot.lane.b32.xlu0 %v1098_v6, %s1029_s18 }
  0x4a   : > { %991 = vset.pattern.permute.xlu1 %v1030_v20  ;;  %422 = vperm.xlu0 %990, %v283_v19  }
  0x4b   : > { %797 = vperm.xlu1 %991, %v1082_v0  }
  0x4e   : > { %995 = vset.pattern.permute.xlu0 %v1020_v14 }
  0x4f   : > { %503 = vrot.lane.b32.xlu1 %v1092_v3, %s1022_s14  ;;  %468 = vperm.xlu0 %995, %v283_v19  }
  0x50   : > { %992 = vset.pattern.permute.xlu1 %v1010_v5 }
  0x53   : > { %632 = vrot.lane.b32.xlu1 %v1098_v6, %s1027_s17  ;;  %997 = vset.pattern.permute.xlu0 %v1030_v20 }
  0x57   : > { %653 = vrot.lane.b32.xlu1 %v1098_v6, %s1023_s15 }
  0x5b   : > { %759 = vrot.lane.b32.xlu1 %v1098_v6, %s1025_s16 }
  0x5f   : > { %532 = vrot.lane.b32.xlu1 %v1092_v3, %s1029_s18 }
  0x63   : > { %411 = vperm.xlu1 %992, %v282_v21  }
  0x67   : > { %993 = vset.pattern.permute.xlu1 %v1019_v13  ;;  %v426_v13 = vshrl.u32 %v286_v24, 7 }
  0x68   : > { %436 = vperm.xlu1 %993, %v283_v19  }
  0x69   : > { %v1229_v27 = vsub.s32 3, %v426_v13 }
  0x6c   : > { %994 = vset.pattern.permute.xlu1 %v1021_v15 }
  0x6d   : > { %452 = vperm.xlu1 %994, %v283_v19  }
  0x71   : > { %996 = vset.pattern.permute.xlu1 %v1010_v5 }
  0x72   : > { %485 = vperm.xlu1 %996, %v284_v22   ;;  %v1219_v22 = vsub.s32 0, %v426_v13 }
  0x76   : > { %492 = vperm.xlu1 %996, %v285_v23   ;;  %v1221_v23 = vsub.s32 1, %v426_v13 }
  0x86   : > { %v348_v28 = vpop.permute.xlu1 %347  ;;  %v324_v29 = vpop.permute.xlu0 %323 }
  0x87   : > { %v330_v38 = vmul.f32 %v1098_v6, %v324_v29  ;;  %v329_v5 = vmul.f32 %v324_v29, %v1092_v3 }
  0x8a   : > { %v332_v31 = vpop.permute.xlu0 %331  ;;  %v334_v32 = vpop.permute.xlu1 %333 }
  0x8b   : > { %v336_v33 = vsel %vm335_vm0, %v332_v31, %v334_v32  ;;  %v339_v60 = vsel %vm335_vm0, 0.0, %v332_v31  ;;  %vm1270_vm0 = vmand %vm314_vm10, %vm1215_vm8 }
  0x8c   : > { %v1160_v34 = vsel %vm1153_vm1, %v336_v33, 0.0  ;;  %v344_v0 = vsel %vm1190_vm3, %v339_v60, 0.0  ;;  %v1227_v33 = vsub.s32 2, %v426_v13 }
  0x8d   : > { %v351_v35 = vmul.f32 %v348_v28, %v1160_v34  ;;  %v350_v8 = vmul.f32 %v348_v28, %v344_v0 }
  0x8e   : > { %v355_v36 = vpop.permute.xlu0 %354  ;;  %v357_v37 = vpop.permute.xlu1 %356 }
  0x8f   : > { %v1165_v39 = vsel %vm358_vm2, %v355_v36, %v357_v37  ;;  %v353_v43 = vadd.f32 %v351_v35, %v330_v38  ;;  %v362_v63 = vsel %vm358_vm2, 0.0, %v355_v36  ;;  %v352_v15 = vadd.f32 %v350_v8, %v329_v5 }
  0x90   : > { %v1202_v1 = vsel %vm315_vm4, %v362_v63, 0.0 }
  0x92   : > { %v378_v40 = vpop.permute.xlu1 %377 }
  0x93   : > { %v385_v7 = vsel %vm381_vm5, 0.0, %v378_v40 }
  0x94   : > { %v392_v12 = vsel %vm386_vm6, %v385_v7, 0.0 }
  0x96   : > { %v380_v45 = vpop.permute.xlu1 %379 }
  0x97   : > { %v382_v2 = vsel %vm381_vm5, %v378_v40, %v380_v45 }
  0x98   : > { %v371_v41 = vpop.permute.xlu0 %370  ;;  %v393_v11 = vsel %vm1153_vm1, %v382_v2, 0.0  ;;  %vm1298_vm1 = vmand %vm315_vm4, %vm1231_vm11 }
  0x99   : > { %v374_v42 = vmul.f32 %v371_v41, %v1165_v39  ;;  %v373_v10 = vmul.f32 %v371_v41, %v1202_v1 }
  0x9b   : > { %v376_v44 = vadd.f32 %v374_v42, %v353_v43  ;;  %v375_v19 = vadd.f32 %v373_v10, %v352_v15 }
  0x9d   : > { %v396_v47 = vpop.permute.xlu0 %395 }
  0x9e   : > { %v398_v14 = vmul.f32 %v396_v47, %v392_v12  ;;  %v399_v17 = vmul.f32 %v396_v47, %v393_v11 }
  0xa0   : > { %v400_v28 = vadd.f32 %v398_v14, %v375_v19  ;;  %v401_v24 = vadd.f32 %v399_v17, %v376_v44 }
  0xa2   : > { %v1168_v46 = vpop.permute.xlu1 %404  ;;  %v526_v49 = vpop.permute.xlu0 %525 }
  0xa3   : > { %v528_v36 = vmul.f32 %v526_v49, %v1092_v3  ;;  %v529_v37 = vmul.f32 %v526_v49, %v1098_v6  ;;  %v1246_v41 = vmul.f32 %v1168_v46, %v400_v28  ;;  %v408_v30 = vmul.f32 %v1168_v46, %v401_v24 }
  0xa7   : > { %v1170_v48 = vpop.permute.xlu1 %519  ;;  %v1174_v51 = vpop.permute.xlu0 %677 }
  0xa8   : > { %v680_v60 = vmul.f32 %v1174_v51, %v1092_v3  ;;  %v681_v63 = vmul.f32 %v1174_v51, %v1098_v6 }
  0xac   : > { %v1172_v50 = vpop.permute.xlu1 %646  ;;  %v1180_v54 = vpop.permute.xlu0 %685 }
  0xad   : > { %v688_v61 = vmul.f32 %v1180_v54, %v344_v0  ;;  %v689_v10 = vmul.f32 %v1180_v54, %v1160_v34 }
  0xb1   : > { %v1176_v52 = vpop.permute.xlu1 %669  ;;  %v1184_v56 = vpop.permute.xlu0 %775 }
  0xb5   : > { %v506_v59 = vpop.permute.xlu0 %505 }
  0xb6   : > { %v1178_v53 = vpop.permute.xlu1 %781  ;;  %v511_v20 = vsel %vm507_vm7, %v506_v59, 0.0 }
  0xb7   : > { %v517_v31 = vsel %vm1215_vm8, %v511_v20, 0.0 }
  0xb8   : > { %v523_v42 = vmul.f32 %v1170_v48, %v517_v31 }
  0xb9   : > { %v652_v4 = vpop.permute.xlu0 %651 }
  0xba   : > { %v531_v11 = vadd.f32 %v529_v37, %v523_v42 }
  0xbb   : > { %v1182_v55 = vpop.permute.xlu1 %550 }
  0xbd   : > { %v758_v18 = vpop.permute.xlu0 %757 }
  0xc0   : > { %v1187_v58 = vpop.permute.xlu1 %789 }
  0xc1   : > { %v631_v38 = vpop.permute.xlu0 %630 }
  0xc5   : > { %v1194_v62 = vpop.permute.xlu1 %558 }
  0xc6   : > { %v561_v28 = vmul.f32 %v1194_v62, %v1202_v1 }
  0xca   : > { %v1209_v9 = vpop.permute.xlu1 %797 }
  0xcb   : > { %v800_v1 = vmul.f32 %v1209_v9, %v1092_v3 }
  0xce   : > { %v504_v16 = vpop.permute.xlu1 %503 }
  0xcf   : > { %v508_v47 = vsel %vm507_vm7, %v504_v16, %v506_v59 }
  0xd2   : > { %v633_v29 = vpop.permute.xlu1 %632 }
  0xd3   : > { %v638_v32 = vsel %vm634_vm9, %v633_v29, 0.0  ;;  %v635_v43 = vsel %vm634_vm9, %v631_v38, %v633_v29 }
  0xd4   : > { %v644_v44 = vsel %vm314_vm10, %v638_v32, 0.0  ;;  %v649_v7 = vmul.f32 %v1172_v50, %v635_v43  ;;  %v784_v15 = vmul.f32 %v1178_v53, %v635_v43  ;;  %v535_v32 = vpop.permute.xlu0 %534 }
  0xd5   : > { %v650_v8 = vmul.f32 %v1172_v50, %v644_v44  ;;  %v516_v50 = vsel %vm1231_vm11, %v508_v47, 0.0  ;;  %v785_v16 = vmul.f32 %v1178_v53, %v644_v44 }
  0xd6   : > { %v654_v45 = vpop.permute.xlu1 %653  ;;  %v522_v29 = vmul.f32 %v1170_v48, %v516_v50  ;;  %v792_v53 = vmul.f32 %v1187_v58, %v516_v50  ;;  %v801_v48 = vmul.f32 %v1209_v9, %v1098_v6 }
  0xd7   : > { %v656_v49 = vsel %vm655_vm12, %v652_v4, %v654_v45  ;;  %v659_v57 = vsel %vm655_vm12, %v654_v45, 0.0  ;;  %v562_v45 = vmul.f32 %v1194_v62, %v1165_v39 }
  0xd8   : > { %v666_v2 = vsel %vm1190_vm3, %v656_v49, 0.0  ;;  %v667_v5 = vsel %vm1241_vm13, %v659_v57, 0.0  ;;  %v530_v47 = vadd.f32 %v528_v36, %v522_v29 }
  0xd9   : > { %v672_v59 = vmul.f32 %v1176_v52, %v666_v2  ;;  %v673_v4 = vmul.f32 %v1176_v52, %v667_v5 }
  0xda   : > { %v760_v12 = vpop.permute.xlu1 %759 }
  0xdb   : > { %v674_v13 = vadd.f32 %v672_v59, %v649_v7  ;;  %v675_v52 = vadd.f32 %v673_v4, %v650_v8  ;;  %v762_v14 = vsel %vm761_vm14, %v758_v18, %v760_v12  ;;  %v765_v26 = vsel %vm761_vm14, %v760_v12, 0.0 }
  0xdc   : > { %v772_v0 = vsel %vm1231_vm11, %v762_v14, 0.0  ;;  %v773_v34 = vsel %vm1270_vm0, %v765_v26, 0.0  ;;  %v793_v18 = vmul.f32 %v1187_v58, %v517_v31 }
  0xdd   : > { %v682_v54 = vadd.f32 %v680_v60, %v674_v13  ;;  %v683_v17 = vadd.f32 %v681_v63, %v675_v52  ;;  %v778_v19 = vmul.f32 %v1184_v56, %v772_v0  ;;  %v779_v20 = vmul.f32 %v1184_v56, %v773_v34 }
  0xde   : > { %v533_v24 = vpop.permute.xlu1 %532 }
  0xdf   : > { %v690_v37 = vadd.f32 %v688_v61, %v682_v54  ;;  %v691_v38 = vadd.f32 %v689_v10, %v683_v17  ;;  %v786_v40 = vadd.f32 %v784_v15, %v778_v19  ;;  %v787_v42 = vadd.f32 %v785_v16, %v779_v20  ;;  %v423_v17 = vpop.permute.xlu0 %422 }
  0xe0   : > { %v537_v58 = vsel %vm536_vm15, %v533_v24, %v535_v32  ;;  %v540_v31 = vsel %vm536_vm15, 0.0, %v533_v24 }
  0xe1   : > { %v692_v43 = vmul.f32 %v690_v37, %v1168_v46  ;;  %v693_v35 = vmul.f32 %v691_v38, %v1168_v46  ;;  %v794_v44 = vadd.f32 %v792_v53, %v786_v40  ;;  %v795_v25 = vadd.f32 %v793_v18, %v787_v42 }
  0xe2   : > { %v547_v3 = vsel %vm1298_vm1, %v540_v31, 0.0  ;;  %v548_v6 = vsel %vm1215_vm8, %v537_v58, 0.0  ;;  %v412_v9 = vpop.permute.xlu1 %411 }
  0xe3   : > { %v802_v49 = vadd.f32 %v800_v1, %v794_v44  ;;  %v803_v57 = vadd.f32 %v801_v48, %v795_v25  ;;  %v553_v60 = vmul.f32 %v1182_v55, %v547_v3  ;;  %v554_v63 = vmul.f32 %v1182_v55, %v548_v6 }
  0xe4   : > { %v414_v2 = vadd.f32 %v412_v9, %v1246_v41  ;;  %v415_v5 = vadd.f32 %v412_v9, %v408_v30  ;;  %v694_v7 = vadd.f32 %v692_v43, %v412_v9  ;;  %v695_v8 = vadd.f32 %v693_v35, %v412_v9 }
  0xe5   : > { %v804_v39 = vmul.f32 %v802_v49, %v1168_v46  ;;  %v805_v62 = vmul.f32 %v803_v57, %v1168_v46  ;;  %v555_v36 = vadd.f32 %v553_v60, %v530_v47  ;;  %v556_v59 = vadd.f32 %v554_v63, %v531_v11 }
  0xe6   : > { %v416_v21 = vmax.f32 %v414_v2, 0.0  ;;  %v417_v4 = vmax.f32 %v415_v5, 0.0  ;;  %v696_v51 = vmax.f32 %v694_v7, 0.0  ;;  %v697_v61 = vmax.f32 %v695_v8, 0.0 }
  0xe7   : > { %v563_v10 = vadd.f32 %v561_v28, %v555_v36  ;;  %v564_v50 = vadd.f32 %v562_v45, %v556_v59  ;;  %v806_v12 = vadd.f32 %v804_v39, %v412_v9  ;;  %v807_v13 = vadd.f32 %v805_v62, %v412_v9  ;;  %v437_v42 = vpop.permute.xlu1 %436 }
  0xe8   : > { %v1321_v55 = vmin.f32 %v416_v21, 6.0  ;;  %v1323_v41 = vmin.f32 %v417_v4, 6.0  ;;  %v1325_v30 = vmin.f32 %v696_v51, 6.0  ;;  %v1327_v52 = vmin.f32 %v697_v61, 6.0  ;;  %v469_v51 = vpop.permute.xlu0 %468 }
  0xe9   : > { %v565_v14 = vmul.f32 %v563_v10, %v1168_v46  ;;  %v566_v11 = vmul.f32 %v564_v50, %v1168_v46  ;;  %v808_v26 = vmax.f32 %v806_v12, 0.0  ;;  %v809_v15 = vmax.f32 %v807_v13, 0.0 }
  0xea   : > { %v428_v16 = vrot.slane %v1321_v55, %v1219_v22  ;;  %v442_v0 = vrot.slane %v1321_v55, %v1221_v23  ;;  %v703_v34 = vrot.slane %v1325_v30, %v1219_v22  ;;  %v713_v54 = vrot.slane %v1325_v30, %v1221_v23 }
  0xeb   : > { %v567_v19 = vadd.f32 %v565_v14, %v412_v9  ;;  %v568_v20 = vadd.f32 %v566_v11, %v412_v9  ;;  %v1339_v18 = vmin.f32 %v808_v26, 6.0  ;;  %v1341_v46 = vmin.f32 %v809_v15, 6.0 }
  0xec   : > { %v433_v28 = vmul.f32 %v428_v16, %v423_v17  ;;  %v708_v29 = vmul.f32 %v703_v34, %v423_v17  ;;  %v432_v53 = vrot.slane %v1323_v41, %v1219_v22  ;;  %v446_v24 = vrot.slane %v1323_v41, %v1221_v23  ;;  %v453_v61 = vpop.permute.xlu1 %452 }
  0xed   : > { %v569_v32 = vmax.f32 %v567_v19, 0.0  ;;  %v570_v37 = vmax.f32 %v568_v20, 0.0  ;;  %v815_v38 = vrot.slane %v1339_v18, %v1219_v22  ;;  %v819_v40 = vrot.slane %v1341_v46, %v1219_v22 }
  0xee   : > { %v825_v56 = vrot.slane %v1339_v18, %v1221_v23  ;;  %v829_v1 = vrot.slane %v1341_v46, %v1221_v23  ;;  %v434_v48 = vmul.f32 %v432_v53, %v423_v17  ;;  %v447_v58 = vmul.f32 %v442_v0, %v437_v42 }
  0xef   : > { %v571_v31 = vmin.f32 %v569_v32, 6.0  ;;  %v572_v43 = vmin.f32 %v570_v37, 6.0  ;;  %v820_v35 = vmul.f32 %v815_v38, %v423_v17  ;;  %v821_v44 = vmul.f32 %v819_v40, %v423_v17 }
  0xf0   : > { %v448_v25 = vmul.f32 %v446_v24, %v437_v42  ;;  %v449_v45 = vadd.f32 %v447_v58, %v433_v28  ;;  %v707_v47 = vrot.slane %v1327_v52, %v1219_v22  ;;  %v717_v3 = vrot.slane %v1327_v52, %v1221_v23 }
  0xf1   : > { %v576_v6 = vrot.slane %v571_v31, %v1219_v22  ;;  %v586_v9 = vrot.slane %v571_v31, %v1221_v23  ;;  %v580_v49 = vrot.slane %v572_v43, %v1219_v22  ;;  %v590_v57 = vrot.slane %v572_v43, %v1221_v23  ;;  %v486_v40 = vpop.permute.xlu1 %485 }
  0xf2   : > { %v450_v60 = vadd.f32 %v448_v25, %v434_v48  ;;  %v709_v63 = vmul.f32 %v707_v47, %v423_v17  ;;  %v718_v2 = vmul.f32 %v713_v54, %v437_v42  ;;  %v719_v5 = vmul.f32 %v717_v3, %v437_v42 }
  0xf3   : > { %v581_v7 = vmul.f32 %v576_v6, %v423_v17  ;;  %v582_v8 = vmul.f32 %v580_v49, %v423_v17  ;;  %v591_v39 = vmul.f32 %v586_v9, %v437_v42  ;;  %v592_v62 = vmul.f32 %v590_v57, %v437_v42 }
  0xf4   : > { %v720_v36 = vadd.f32 %v718_v2, %v708_v29  ;;  %v721_v59 = vadd.f32 %v719_v5, %v709_v63  ;;  %v830_v21 = vmul.f32 %v825_v56, %v437_v42  ;;  %v831_v4 = vmul.f32 %v829_v1, %v437_v42 }
  0xf5   : > { %v593_v10 = vadd.f32 %v591_v39, %v581_v7  ;;  %v594_v50 = vadd.f32 %v592_v62, %v582_v8  ;;  %v474_v22 = vrot.slane %v1321_v55, %v1229_v27  ;;  %v478_v23 = vrot.slane %v1323_v41, %v1229_v27  ;;  %v493_v2 = vpop.permute.xlu1 %492 }
  0xf6   : > { %v832_v12 = vadd.f32 %v830_v21, %v820_v35  ;;  %v833_v13 = vadd.f32 %v831_v4, %v821_v44  ;;  %v610_v14 = vrot.slane %v571_v31, %v1229_v27  ;;  %v614_v11 = vrot.slane %v572_v43, %v1229_v27 }
  0xf7   : > { %v479_v26 = vmul.f32 %v474_v22, %v469_v51  ;;  %v480_v15 = vmul.f32 %v478_v23, %v469_v51  ;;  %v737_v16 = vrot.slane %v1325_v30, %v1229_v27  ;;  %v741_v0 = vrot.slane %v1327_v52, %v1229_v27 }
  0xf8   : > { %v615_v34 = vmul.f32 %v610_v14, %v469_v51  ;;  %v616_v54 = vmul.f32 %v614_v11, %v469_v51  ;;  %v849_v17 = vrot.slane %v1339_v18, %v1229_v27  ;;  %v853_v19 = vrot.slane %v1341_v46, %v1229_v27 }
  0xf9   : > { %v742_v20 = vmul.f32 %v737_v16, %v469_v51  ;;  %v743_v28 = vmul.f32 %v741_v0, %v469_v51  ;;  %v458_v29 = vrot.slane %v1321_v55, %v1227_v33  ;;  %v598_v53 = vrot.slane %v571_v31, %v1227_v33 }
  0xfa   : > { %v854_v24 = vmul.f32 %v849_v17, %v469_v51  ;;  %v855_v32 = vmul.f32 %v853_v19, %v469_v51  ;;  %v725_v37 = vrot.slane %v1325_v30, %v1227_v33  ;;  %v837_v38 = vrot.slane %v1339_v18, %v1227_v33 }
  0xfb   : > { %v841_v42 = vrot.slane %v1341_v46, %v1227_v33  ;;  %v462_v27 = vrot.slane %v1323_v41, %v1227_v33  ;;  %v463_v56 = vmul.f32 %v458_v29, %v453_v61  ;;  %v602_v55 = vrot.slane %v572_v43, %v1227_v33 }
  0xfc   : > { %v603_v1 = vmul.f32 %v598_v53, %v453_v61  ;;  %v729_v48 = vrot.slane %v1327_v52, %v1227_v33  ;;  %v730_v58 = vmul.f32 %v725_v37, %v453_v61  ;;  %v842_v31 = vmul.f32 %v837_v38, %v453_v61 }
  0xfd   : > { %v464_v30 = vmul.f32 %v462_v27, %v453_v61  ;;  %v604_v35 = vmul.f32 %v602_v55, %v453_v61  ;;  %v843_v44 = vmul.f32 %v841_v42, %v453_v61  ;;  %v465_v18 = vadd.f32 %v463_v56, %v449_v45 }
  0xfe   : > { %v731_v25 = vmul.f32 %v729_v48, %v453_v61  ;;  %v605_v47 = vadd.f32 %v603_v1, %v593_v10  ;;  %v732_v3 = vadd.f32 %v730_v58, %v720_v36  ;;  %v844_v46 = vadd.f32 %v842_v31, %v832_v12 }
  0xff   : > { %v481_v6 = vadd.f32 %v479_v26, %v465_v18  ;;  %v845_v9 = vadd.f32 %v843_v44, %v833_v13  ;;  %v466_v41 = vadd.f32 %v464_v30, %v450_v60  ;;  %v606_v49 = vadd.f32 %v604_v35, %v594_v50 }
 0x100   : > { %v617_v43 = vadd.f32 %v615_v34, %v605_v47  ;;  %v744_v57 = vadd.f32 %v742_v20, %v732_v3  ;;  %v856_v63 = vadd.f32 %v854_v24, %v844_v46  ;;  %v733_v33 = vadd.f32 %v731_v25, %v721_v59 }
 0x101   : > { %v488_v52 = vmul.f32 %v486_v40, %v481_v6  ;;  %v857_v5 = vadd.f32 %v855_v32, %v845_v9  ;;  %v482_v7 = vadd.f32 %v480_v15, %v466_v41  ;;  %v618_v8 = vadd.f32 %v616_v54, %v606_v49 }
 0x102   : > { %v619_v39 = vmul.f32 %v617_v43, %v486_v40  ;;  %v746_v45 = vmul.f32 %v744_v57, %v486_v40  ;;  %v858_v62 = vmul.f32 %v856_v63, %v486_v40  ;;  %v745_v21 = vadd.f32 %v743_v28, %v733_v33 }
 0x103   : > { %v859_v36 = vmul.f32 %v857_v5, %v486_v40  ;;  %v489_v4 = vmul.f32 %v486_v40, %v482_v7  ;;  %v495_v51 = vadd.f32 %v493_v2, %v488_v52  ;;  %v620_v61 = vmul.f32 %v618_v8, %v486_v40 }
 0x104   : > { %v621_v60 = vadd.f32 %v619_v39, %v493_v2  ;;  %v747_v10 = vmul.f32 %v745_v21, %v486_v40  ;;  %v748_v50 = vadd.f32 %v746_v45, %v493_v2  ;;  %v860_v22 = vadd.f32 %v858_v62, %v493_v2 }
 0x105   : > { %v496_v23 = vadd.f32 %v493_v2, %v489_v4  ;;  %v497_v12 = vmax.f32 %v495_v51, 0.0  ;;  %v622_v59 = vadd.f32 %v620_v61, %v493_v2  ;;  %v861_v13 = vadd.f32 %v859_v36, %v493_v2 }
 0x106   : > { %v623_v14 = vmax.f32 %v621_v60, 0.0  ;;  %v749_v11 = vadd.f32 %v747_v10, %v493_v2  ;;  %v750_v26 = vmax.f32 %v748_v50, 0.0  ;;  %v862_v15 = vmax.f32 %v860_v22, 0.0 }
 0x107   : > { %v498_v16 = vmax.f32 %v496_v23, 0.0  ;;  %v499_v0 = vmin.f32 %v497_v12, 6.0  ;;  %v624_v34 = vmax.f32 %v622_v59, 0.0  ;;  %v863_v54 = vmax.f32 %v861_v13, 0.0 }
 0x108   : > { %v625_v17 = vmin.f32 %v623_v14, 6.0  ;;  %v751_v19 = vmax.f32 %v749_v11, 0.0  ;;  %v752_v20 = vmin.f32 %v750_v26, 6.0  ;;  %v864_v28 = vmin.f32 %v862_v15, 6.0 }
 0x109   : > { %v500_v29 = vmin.f32 %v498_v16, 6.0  ;;  %501 = vst [vmem:[%s278_s9] sm:$0xff] %v499_v0  ;;  %v626_v53 = vmin.f32 %v624_v34, 6.0  ;;  %v865_v24 = vmin.f32 %v863_v54, 6.0 }
 0x10a   : > { %933 = vst [vmem:[%s278_s9 + $0x10] sm:$0xff] %v625_v17  ;;  %v753_v32 = vmin.f32 %v751_v19, 6.0  ;;  %935 = vst [vmem:[%s278_s9 + $0x20] sm:$0xff] %v752_v20 }
 0x10b   : > { %937 = vst [vmem:[%s278_s9 + $0x30] sm:$0xff] %v864_v28  ;;  %502 = vst [vmem:[%s278_s9 + $0x8] sm:$0xff] %v500_v29 }
 0x10c   : > { %934 = vst [vmem:[%s278_s9 + $0x18] sm:$0xff] %v626_v53  ;;  %938 = vst [vmem:[%s278_s9 + $0x38] sm:$0xff] %v865_v24 }
 0x10d   : > { %936 = vst [vmem:[%s278_s9 + $0x28] sm:$0xff] %v753_v32 }
 0x10e PF: > { %s17_s24 = sadd.s32 1, %s1005_s24  }
 0x10f   : > { %p14_p4 = scmp.ge.s32.totalorder %s17_s24, 4  }
 0x111   :  { %16 = sbr.rel (!%p14_p4) target bundleno = 1 (0x1), region = 81 }

</bundles_post_ra>
